<compile_context>
chip_gen: v7x
topology: tpu7x:2x2x1
jax: 0.10.0
libtpu: 0.0.40
codegen_flags: <defaults>
</compile_context>

<pallas_src>
import functools

import jax
import jax.numpy as jnp
from jax import lax
from jax.experimental import pallas as pl
from jax.experimental.pallas import tpu as pltpu

EPS = 1e-5     # PyTorch BatchNorm2d default eps
LANE = 128     # TPU lane width
PAD = 8        # sublane-aligned halo for the f32 intermediate buffer


def _residual_block_kernel(x_ref, w1_ref, b1_ref, w3_ref, b3_ref, o_ref,
                           cur_ref, hsrc_ref, hcat_ref, *, W, use_residual):
    """One repeat of the ResidualBlock for one batch element (grid = (N, R)).

    x_ref    : (1, HW, Cp)            f32, lane-padded flattened NHWC input
    w1_ref   : (1, Cp, Cmidp)         bf16 folded 1x1 conv weights (BN folded)
    b1_ref   : (1, 1, Cmidp)          f32 folded 1x1 bias/shift
    w3_ref   : (1, 3, 3*Cmidp, Cp)    bf16 folded 3x3 weights, grouped by di and
                                      concatenated over dj on the K axis
    b3_ref   : (1, 1, Cp)             f32 folded 3x3 bias/shift
    o_ref    : (1, HW, Cp)            f32 output block (written at r == R-1)
    cur_ref  : (HW, Cp)               f32 VMEM scratch: residual stream
    hsrc_ref : (HW + 2*PAD, Cmidp)    f32 VMEM scratch: h with +-1 row halo
    hcat_ref : ((H+2)*W, 3*Cmidp)     bf16 VMEM scratch: [dj=-1 | dj=0 | dj=+1]
                                      operand slab with a zero halo of W rows
                                      above and below the data region.
    """
    _, HW, Cp = x_ref.shape
    Cmidp = hsrc_ref.shape[1]
    r = pl.program_id(1)
    num_r = pl.num_programs(1)

    @pl.when(r == 0)
    def _init():
        # New image: load the residual stream and (re)zero the slab row-halo.
        cur_ref[...] = x_ref[0]
        hcat_ref[0:W, :] = jnp.zeros((W, hcat_ref.shape[1]), hcat_ref.dtype)
        hcat_ref[W + HW:W + HW + W, :] = jnp.zeros((W, hcat_ref.shape[1]),
                                                   hcat_ref.dtype)

    xin = cur_ref[...]                                        # (HW, Cp) f32

    # ---- 1x1 conv (+ folded BN) + LeakyReLU(0.1): one bf16 matmul ----------
    h = jnp.dot(xin.astype(jnp.bfloat16), w1_ref[0],
                preferred_element_type=jnp.float32)           # (HW, Cmidp) f32
    h = h + b1_ref[0]
    h = jnp.maximum(h, 0.1 * h)

    # ---- build the lane-concatenated [dj=-1 | dj=0 | dj=+1] operand slab ----
    col = lax.broadcasted_iota(jnp.int32, (HW, 1), 0) % W
    hsrc_ref[PAD:PAD + HW, :] = h
    # Column-border masks zero the wrapped elements (and the halo rows touched
    # by the +-1 reads), so hsrc's halo never needs explicit zeroing.
    left = jnp.where(col != 0, hsrc_ref[PAD - 1:PAD - 1 + HW, :], 0.0)
    right = jnp.where(col != W - 1, hsrc_ref[PAD + 1:PAD + 1 + HW, :], 0.0)
    hcat_ref[W:W + HW, 0:Cmidp] = left.astype(jnp.bfloat16)
    hcat_ref[W:W + HW, Cmidp:2 * Cmidp] = h.astype(jnp.bfloat16)
    hcat_ref[W:W + HW, 2 * Cmidp:3 * Cmidp] = right.astype(jnp.bfloat16)

    # ---- 3x3 conv (pad=1) (+ folded BN): three K=3*Cmid bf16 matmuls --------
    # di = -1 / 0 / +1 are row-offset slices of the haloed slab.
    acc = jnp.dot(hcat_ref[0:HW, :], w3_ref[0, 0],
                  preferred_element_type=jnp.float32)
    acc = acc + jnp.dot(hcat_ref[W:W + HW, :], w3_ref[0, 1],
                        preferred_element_type=jnp.float32)
    acc = acc + jnp.dot(hcat_ref[2 * W:2 * W + HW, :], w3_ref[0, 2],
                        preferred_element_type=jnp.float32)

    y = acc + b3_ref[0]
    y = jnp.maximum(y, 0.1 * y)                               # LeakyReLU(0.1)
    if use_residual:
        y = y + xin

    @pl.when(r < num_r - 1)
    def _carry():
        cur_ref[...] = y

    @pl.when(r == num_r - 1)
    def _emit():
        o_ref[0] = y.astype(o_ref.dtype)


def _pad_to(a, shape):
    pads = [(0, t - s) for s, t in zip(a.shape, shape)]
    return jnp.pad(a, pads)


def _round_up(n, m):
    return max(m, ((n + m - 1) // m) * m)


def prepare_params(folded_params):
    """One-time (outside the jitted forward) padding / stacking / bf16 cast.

    folded_params: list of (w1f (C,Cmid) f32, b1f (1,Cmid) f32,
                            w3f (9,Cmid,C) f32 with tap k = (di+1)*3 + (dj+1),
                            b3f (1,C) f32), all BN-folded IN F32.
    Returns stacked, lane-padded arrays:
      w1s (R,Cp,Cmidp) bf16, b1s (R,1,Cmidp) f32,
      w3s (R,3,3*Cmidp,Cp) bf16 (dj taps concatenated on K, grouped by di),
      b3s (R,1,Cp) f32.
    """
    w1s, b1s, w3s, b3s = [], [], [], []
    for (w1f, b1f, w3f, b3f) in folded_params:
        C, Cmid = w1f.shape
        Cp, Cmidp = _round_up(C, LANE), _round_up(Cmid, LANE)
        w1s.append(_pad_to(w1f, (Cp, Cmidp)).astype(jnp.bfloat16))
        b1s.append(_pad_to(b1f, (1, Cmidp)).astype(jnp.float32))
        taps = [_pad_to(w3f[k], (Cmidp, Cp)) for k in range(9)]
        w3m = jnp.stack([jnp.concatenate(taps[3 * d:3 * d + 3], axis=0)
                         for d in range(3)])                  # (3, 3*Cmidp, Cp)
        w3s.append(w3m.astype(jnp.bfloat16))
        b3s.append(_pad_to(b3f, (1, Cp)).astype(jnp.float32))
    return (jnp.stack(w1s), jnp.stack(b1s), jnp.stack(w3s), jnp.stack(b3s))


@functools.partial(jax.jit, static_argnames=("use_residual",))
def residual_block_nhwc(x, w1s, b1s, w3s, b3s, use_residual=True):
    """x: (N, H, W, C) f32 NHWC.  Weights from prepare_params.  Returns NHWC."""
    N, H, W, C = x.shape
    R, Cp, Cmidp = w1s.shape[0], w1s.shape[1], w1s.shape[2]
    HW = H * W

    xf = x.reshape(N, HW, C).astype(jnp.float32)              # free in HBM
    if Cp != C:                                               # only when C % 128 != 0
        xf = jnp.pad(xf, ((0, 0), (0, 0), (0, Cp - C)))

    kernel = functools.partial(_residual_block_kernel, W=W,
                               use_residual=use_residual)
    out = pl.pallas_call(
        kernel,
        out_shape=jax.ShapeDtypeStruct((N, HW, Cp), jnp.float32),
        grid_spec=pltpu.PrefetchScalarGridSpec(
            num_scalar_prefetch=0,
            grid=(N, R),
            in_specs=[
                pl.BlockSpec((1, HW, Cp), lambda n, r: (n, 0, 0)),
                pl.BlockSpec((1, Cp, Cmidp), lambda n, r: (r, 0, 0)),
                pl.BlockSpec((1, 1, Cmidp), lambda n, r: (r, 0, 0)),
                pl.BlockSpec((1, 3, 3 * Cmidp, Cp), lambda n, r: (r, 0, 0, 0)),
                pl.BlockSpec((1, 1, Cp), lambda n, r: (r, 0, 0)),
            ],
            out_specs=pl.BlockSpec((1, HW, Cp), lambda n, r: (n, 0, 0)),
            scratch_shapes=[
                pltpu.VMEM((HW, Cp), jnp.float32),                     # cur
                pltpu.VMEM((HW + 2 * PAD, Cmidp), jnp.float32),        # hsrc
                pltpu.VMEM(((H + 2) * W, 3 * Cmidp), jnp.bfloat16),    # hcat
            ],
        ),
        compiler_params=pltpu.CompilerParams(
            dimension_semantics=("parallel", "arbitrary"),
            vmem_limit_bytes=64 * 1024 * 1024,
        ),
    )(xf, w1s, b1s, w3s, b3s)

    if Cp != C:
        out = out[..., :C]                                    # unpad
    return out.reshape(N, H, W, C)


def init_params(key, channels, num_repeats):
    """Deterministic parameter init matching the PyTorch module's shapes,
    plus BN-folded (in f32) versions consumed by prepare_params()."""
    C, Cmid = channels, channels // 2
    raw, folded = [], []
    for _ in range(num_repeats):
        keys = jax.random.split(key, 13)
        key = keys[0]
        w1 = 0.1 * jax.random.normal(keys[1], (Cmid, C, 1, 1), jnp.float32)
        b1 = 0.1 * jax.random.normal(keys[2], (Cmid,), jnp.float32)
        g1 = 1.0 + 0.1 * jax.random.normal(keys[3], (Cmid,), jnp.float32)
        be1 = 0.1 * jax.random.normal(keys[4], (Cmid,), jnp.float32)
        m1 = 0.1 * jax.random.normal(keys[5], (Cmid,), jnp.float32)
        v1 = 1.0 + 0.5 * jax.random.uniform(keys[6], (Cmid,), jnp.float32)
        w3 = 0.1 * jax.random.normal(keys[7], (C, Cmid, 3, 3), jnp.float32)
        b3 = 0.1 * jax.random.normal(keys[8], (C,), jnp.float32)
        g2 = 1.0 + 0.1 * jax.random.normal(keys[9], (C,), jnp.float32)
        be2 = 0.1 * jax.random.normal(keys[10], (C,), jnp.float32)
        m2 = 0.1 * jax.random.normal(keys[11], (C,), jnp.float32)
        v2 = 1.0 + 0.5 * jax.random.uniform(keys[12], (C,), jnp.float32)
        raw.append(dict(w1=w1, b1=b1, g1=g1, be1=be1, m1=m1, v1=v1,
                        w3=w3, b3=b3, g2=g2, be2=be2, m2=m2, v2=v2))

        # fold eval-mode BN into the convs IN F32: y = s*(conv(x)+b - m) + beta
        s1 = g1 / jnp.sqrt(v1 + EPS)
        w1f = (w1[:, :, 0, 0] * s1[:, None]).T                       # (C, Cmid)
        b1f = ((b1 - m1) * s1 + be1)[None, :]                        # (1, Cmid)
        s2 = g2 / jnp.sqrt(v2 + EPS)
        w3f = jnp.transpose(w3 * s2[:, None, None, None],
                            (2, 3, 1, 0)).reshape(9, Cmid, C)        # (9,Cmid,C)
        b3f = ((b3 - m2) * s2 + be2)[None, :]                        # (1, C)
        folded.append((w1f, b1f, w3f, b3f))
    return raw, folded


def reference_nchw(x, raw_params, use_residual=True):
    """Pure-JAX f32 reference mirroring the PyTorch (eval-mode) forward in NCHW."""
    dn = ("NCHW", "OIHW", "NCHW")
    out = x
    for p in raw_params:
        h = lax.conv_general_dilated(out, p["w1"], (1, 1), "VALID",
                                     dimension_numbers=dn)
        h = h + p["b1"][None, :, None, None]
        h = (h - p["m1"][None, :, None, None]) / jnp.sqrt(
            p["v1"][None, :, None, None] + EPS)
        h = h * p["g1"][None, :, None, None] + p["be1"][None, :, None, None]
        h = jnp.where(h > 0, h, 0.1 * h)

        z = lax.conv_general_dilated(h, p["w3"], (1, 1), ((1, 1), (1, 1)),
                                     dimension_numbers=dn)
        z = z + p["b3"][None, :, None, None]
        z = (z - p["m2"][None, :, None, None]) / jnp.sqrt(
            p["v2"][None, :, None, None] + EPS)
        z = z * p["g2"][None, :, None, None] + p["be2"][None, :, None, None]
        z = jnp.where(z > 0, z, 0.1 * z)

        out = z + out if use_residual else z
    return out


if __name__ == "__main__":
    key = jax.random.PRNGKey(0)
    k_x, k_p = jax.random.split(key)

    N, C, H, W = 2, 8, 16, 16          # small, consistent with the module
    num_repeats = 2

    x_nchw = jax.random.normal(k_x, (N, C, H, W), jnp.float32)
    raw_params, folded_params = init_params(k_p, C, num_repeats)
    # One-time weight prep (padding / regrouping / bf16 cast) outside the jit.
    w1s, b1s, w3s, b3s = prepare_params(folded_params)

    # NHWC end-to-end for the kernel; NCHW only for the torch-style reference.
    x_nhwc = jnp.transpose(x_nchw, (0, 2, 3, 1))
    out_nhwc = residual_block_nhwc(x_nhwc, w1s, b1s, w3s, b3s, use_residual=True)
    out_nhwc = jax.block_until_ready(out_nhwc)

    ref = jax.block_until_ready(reference_nchw(x_nchw, raw_params,
                                               use_residual=True))
    out_nchw = jnp.transpose(out_nhwc, (0, 3, 1, 2))
    assert out_nchw.shape == ref.shape == (N, C, H, W)
    max_err = float(jnp.max(jnp.abs(out_nchw - ref)))
    # bf16 matmul operands with f32 accumulation vs an all-f32 reference.
    if max_err > 2e-2:
        raise AssertionError(f"mismatch vs reference: max abs err {max_err}")

    print("KERNEL_OK")
</pallas_src>

<mosaic_0001>
module attributes {stable_mosaic.version = 11 : i64} {
  func.func @_residual_block_kernel(%arg0: i32, %arg1: i32, %arg2: memref<1x256x128xf32, #tpu.memory_space<vmem>>, %arg3: memref<1x128x128xbf16, #tpu.memory_space<vmem>>, %arg4: memref<1x1x128xf32, #tpu.memory_space<vmem>>, %arg5: memref<1x3x384x128xbf16, #tpu.memory_space<vmem>>, %arg6: memref<1x1x128xf32, #tpu.memory_space<vmem>>, %arg7: memref<1x256x128xf32, #tpu.memory_space<vmem>>, %arg8: memref<256x128xf32, #tpu.memory_space<vmem>>, %arg9: memref<272x128xf32, #tpu.memory_space<vmem>>, %arg10: memref<288x384xbf16, #tpu.memory_space<vmem>>) attributes {dimension_semantics = [#tpu.dimension_semantics<parallel>, #tpu.dimension_semantics<arbitrary>], iteration_bounds = array<i64: 2, 2>, scalar_prefetch = 0 : i64, scratch_operands = 3 : i64, tpu.core_type = #tpu.core_type<tc>, window_params = [{transform_indices = @transform_0, window_bounds = array<i64: 1, 256, 128>}, {transform_indices = @transform_1, window_bounds = array<i64: 1, 128, 128>}, {transform_indices = @transform_2, window_bounds = array<i64: 1, 1, 128>}, {transform_indices = @transform_3, window_bounds = array<i64: 1, 3, 384, 128>}, {transform_indices = @transform_4, window_bounds = array<i64: 1, 1, 128>}, {transform_indices = @transform_5, window_bounds = array<i64: 1, 256, 128>}]} {
    %c0_i32 = arith.constant 0 : i32
    %0 = arith.cmpi eq, %arg1, %c0_i32 : i32
    %1 = arith.extui %0 : i1 to i32
    %c0_i32_0 = arith.constant 0 : i32
    %2 = arith.cmpi ne, %1, %c0_i32_0 : i32
    scf.if %2 {
      %c0_48 = arith.constant 0 : index
      %c0_49 = arith.constant 0 : index
      %c0_50 = arith.constant 0 : index
      %81 = vector.load %arg2[%c0_48, %c0_49, %c0_50] : memref<1x256x128xf32, #tpu.memory_space<vmem>>, vector<1x256x128xf32>
      %82 = vector.shape_cast %81 : vector<1x256x128xf32> to vector<256x128xf32>
      %c0_51 = arith.constant 0 : index
      %c0_52 = arith.constant 0 : index
      %83 = vector.load %arg8[%c0_51, %c0_52] : memref<256x128xf32, #tpu.memory_space<vmem>>, vector<256x128xf32>
      tpu.vector_store %arg8[%c0_51, %c0_52], %82 {strides = array<i32>} : memref<256x128xf32, #tpu.memory_space<vmem>>, vector<256x128xf32>,
      %cst_53 = arith.constant 0.000000e+00 : bf16
      %84 = vector.broadcast %cst_53 : bf16 to vector<16x384xbf16>
      %c0_54 = arith.constant 0 : index
      %c0_55 = arith.constant 0 : index
      %85 = vector.load %arg10[%c0_54, %c0_55] : memref<288x384xbf16, #tpu.memory_space<vmem>>, vector<16x384xbf16>
      tpu.vector_store %arg10[%c0_54, %c0_55], %84 {strides = array<i32>} : memref<288x384xbf16, #tpu.memory_space<vmem>>, vector<16x384xbf16>,
      %cst_56 = arith.constant 0.000000e+00 : bf16
      %86 = vector.broadcast %cst_56 : bf16 to vector<16x384xbf16>
      %c272 = arith.constant 272 : index
      %c0_57 = arith.constant 0 : index
      %87 = vector.load %arg10[%c272, %c0_57] : memref<288x384xbf16, #tpu.memory_space<vmem>>, vector<16x384xbf16>
      tpu.vector_store %arg10[%c272, %c0_57], %86 {strides = array<i32>} : memref<288x384xbf16, #tpu.memory_space<vmem>>, vector<16x384xbf16>,
    } else {
    }
    %c0 = arith.constant 0 : index
    %c0_1 = arith.constant 0 : index
    %3 = vector.load %arg8[%c0, %c0_1] : memref<256x128xf32, #tpu.memory_space<vmem>>, vector<256x128xf32>
    %4 = arith.truncf %3 : vector<256x128xf32> to vector<256x128xbf16>
    %c0_2 = arith.constant 0 : index
    %c0_3 = arith.constant 0 : index
    %c0_4 = arith.constant 0 : index
    %5 = vector.load %arg3[%c0_2, %c0_3, %c0_4] : memref<1x128x128xbf16, #tpu.memory_space<vmem>>, vector<1x128x128xbf16>
    %6 = vector.shape_cast %5 : vector<1x128x128xbf16> to vector<128x128xbf16>
    %cst = arith.constant dense<0.000000e+00> : vector<256x128xf32>
    %7 = tpu.matmul %4, %6, %cst {dimension_numbers = #tpu.dot_dimension_numbers<[1], [0], [0], [1], [0, 0, 1, 1], [], []>} : vector<256x128xbf16>, vector<128x128xbf16>, vector<256x128xf32> -> vector<256x128xf32>
    %c0_5 = arith.constant 0 : index
    %c0_6 = arith.constant 0 : index
    %c0_7 = arith.constant 0 : index
    %8 = vector.load %arg4[%c0_5, %c0_6, %c0_7] : memref<1x1x128xf32, #tpu.memory_space<vmem>>, vector<1x1x128xf32>
    %9 = vector.shape_cast %8 : vector<1x1x128xf32> to vector<1x128xf32>
    %10 = vector.broadcast %9 : vector<1x128xf32> to vector<256x128xf32>
    %11 = arith.addf %7, %10 : vector<256x128xf32>
    %cst_8 = arith.constant 1.000000e-01 : f32
    %12 = vector.broadcast %cst_8 : f32 to vector<256x128xf32>
    %13 = arith.mulf %12, %11 : vector<256x128xf32>
    %14 = arith.maximumf %11, %13 : vector<256x128xf32>
    %15 = tpu.iota {dimensions = array<i32: 0>} : vector<256x1xi32>
    %c16_i32 = arith.constant 16 : i32
    %c0_i32_9 = arith.constant 0 : i32
    %16 = arith.cmpi eq, %c16_i32, %c0_i32_9 : i32
    %c1_i32 = arith.constant 1 : i32
    %17 = arith.select %16, %c1_i32, %c16_i32 : i32
    %18 = vector.broadcast %17 : i32 to vector<256x1xi32>
    %19 = arith.remsi %15, %18 : vector<256x1xi32>
    %c0_i32_10 = arith.constant 0 : i32
    %20 = vector.broadcast %c0_i32_10 : i32 to vector<256x1xi32>
    %21 = arith.cmpi ne, %19, %20 : vector<256x1xi32>
    %c0_i32_11 = arith.constant 0 : i32
    %22 = vector.broadcast %c0_i32_11 : i32 to vector<256x1xi32>
    %23 = arith.cmpi slt, %19, %22 : vector<256x1xi32>
    %c0_i32_12 = arith.constant 0 : i32
    %24 = arith.cmpi slt, %17, %c0_i32_12 : i32
    %25 = vector.broadcast %24 : i1 to vector<256x1xi1>
    %26 = vector.broadcast %25 : vector<256x1xi1> to vector<256x1xi1>
    %27 = arith.xori %23, %26 : vector<256x1xi1>
    %28 = arith.andi %27, %21 : vector<256x1xi1>
    %29 = vector.broadcast %17 : i32 to vector<256x1xi32>
    %30 = arith.addi %19, %29 : vector<256x1xi32>
    %31 = arith.select %28, %30, %19 : vector<256x1xi1>, vector<256x1xi32>
    %c8 = arith.constant 8 : index
    %c0_13 = arith.constant 0 : index
    %32 = vector.load %arg9[%c8, %c0_13] : memref<272x128xf32, #tpu.memory_space<vmem>>, vector<256x128xf32>
    tpu.vector_store %arg9[%c8, %c0_13], %14 {strides = array<i32>} : memref<272x128xf32, #tpu.memory_space<vmem>>, vector<256x128xf32>,
    %c0_i32_14 = arith.constant 0 : i32
    %33 = vector.broadcast %c0_i32_14 : i32 to vector<256x1xi32>
    %34 = arith.cmpi ne, %31, %33 : vector<256x1xi32>
    %c7 = arith.constant 7 : index
    %c0_15 = arith.constant 0 : index
    %35 = vector.load %arg9[%c7, %c0_15] : memref<272x128xf32, #tpu.memory_space<vmem>>, vector<256x128xf32>
    %cst_16 = arith.constant 0.000000e+00 : f32
    %36 = vector.shape_cast %34 : vector<256x1xi1> to vector<256x1xi1>
    %37 = vector.broadcast %36 : vector<256x1xi1> to vector<256x128xi1>
    %38 = vector.broadcast %cst_16 : f32 to vector<256x128xf32>
    %39 = arith.select %37, %35, %38 : vector<256x128xi1>, vector<256x128xf32>
    %c15_i32 = arith.constant 15 : i32
    %40 = vector.broadcast %c15_i32 : i32 to vector<256x1xi32>
    %41 = arith.cmpi ne, %31, %40 : vector<256x1xi32>
    %c9 = arith.constant 9 : index
    %c0_17 = arith.constant 0 : index
    %42 = vector.load %arg9[%c9, %c0_17] : memref<272x128xf32, #tpu.memory_space<vmem>>, vector<256x128xf32>
    %cst_18 = arith.constant 0.000000e+00 : f32
    %43 = vector.shape_cast %41 : vector<256x1xi1> to vector<256x1xi1>
    %44 = vector.broadcast %43 : vector<256x1xi1> to vector<256x128xi1>
    %45 = vector.broadcast %cst_18 : f32 to vector<256x128xf32>
    %46 = arith.select %44, %42, %45 : vector<256x128xi1>, vector<256x128xf32>
    %47 = arith.truncf %39 : vector<256x128xf32> to vector<256x128xbf16>
    %c16 = arith.constant 16 : index
    %c0_19 = arith.constant 0 : index
    %48 = vector.load %arg10[%c16, %c0_19] : memref<288x384xbf16, #tpu.memory_space<vmem>>, vector<256x128xbf16>
    tpu.vector_store %arg10[%c16, %c0_19], %47 {strides = array<i32>} : memref<288x384xbf16, #tpu.memory_space<vmem>>, vector<256x128xbf16>,
    %49 = arith.truncf %14 : vector<256x128xf32> to vector<256x128xbf16>
    %c16_20 = arith.constant 16 : index
    %c128 = arith.constant 128 : index
    %50 = vector.load %arg10[%c16_20, %c128] : memref<288x384xbf16, #tpu.memory_space<vmem>>, vector<256x128xbf16>
    tpu.vector_store %arg10[%c16_20, %c128], %49 {strides = array<i32>} : memref<288x384xbf16, #tpu.memory_space<vmem>>, vector<256x128xbf16>,
    %51 = arith.truncf %46 : vector<256x128xf32> to vector<256x128xbf16>
    %c16_21 = arith.constant 16 : index
    %c256 = arith.constant 256 : index
    %52 = vector.load %arg10[%c16_21, %c256] : memref<288x384xbf16, #tpu.memory_space<vmem>>, vector<256x128xbf16>
    tpu.vector_store %arg10[%c16_21, %c256], %51 {strides = array<i32>} : memref<288x384xbf16, #tpu.memory_space<vmem>>, vector<256x128xbf16>,
    %c0_22 = arith.constant 0 : index
    %c0_23 = arith.constant 0 : index
    %53 = vector.load %arg10[%c0_22, %c0_23] : memref<288x384xbf16, #tpu.memory_space<vmem>>, vector<256x384xbf16>
    %c0_24 = arith.constant 0 : index
    %c0_25 = arith.constant 0 : index
    %c0_26 = arith.constant 0 : index
    %c0_27 = arith.constant 0 : index
    %54 = vector.load %arg5[%c0_24, %c0_25, %c0_26, %c0_27] : memref<1x3x384x128xbf16, #tpu.memory_space<vmem>>, vector<1x1x384x128xbf16>
    %55 = vector.shape_cast %54 : vector<1x1x384x128xbf16> to vector<384x128xbf16>
    %cst_28 = arith.constant dense<0.000000e+00> : vector<256x128xf32>
    %56 = tpu.matmul %53, %55, %cst_28 {dimension_numbers = #tpu.dot_dimension_numbers<[1], [0], [0], [1], [0, 0, 1, 1], [], []>} : vector<256x384xbf16>, vector<384x128xbf16>, vector<256x128xf32> -> vector<256x128xf32>
    %c16_29 = arith.constant 16 : index
    %c0_30 = arith.constant 0 : index
    %57 = vector.load %arg10[%c16_29, %c0_30] : memref<288x384xbf16, #tpu.memory_space<vmem>>, vector<256x384xbf16>
    %c0_31 = arith.constant 0 : index
    %c1 = arith.constant 1 : index
    %c0_32 = arith.constant 0 : index
    %c0_33 = arith.constant 0 : index
    %58 = vector.load %arg5[%c0_31, %c1, %c0_32, %c0_33] : memref<1x3x384x128xbf16, #tpu.memory_space<vmem>>, vector<1x1x384x128xbf16>
    %59 = vector.shape_cast %58 : vector<1x1x384x128xbf16> to vector<384x128xbf16>
    %cst_34 = arith.constant dense<0.000000e+00> : vector<256x128xf32>
    %60 = tpu.matmul %57, %59, %cst_34 {dimension_numbers = #tpu.dot_dimension_numbers<[1], [0], [0], [1], [0, 0, 1, 1], [], []>} : vector<256x384xbf16>, vector<384x128xbf16>, vector<256x128xf32> -> vector<256x128xf32>
    %61 = arith.addf %56, %60 : vector<256x128xf32>
    %c32 = arith.constant 32 : index
    %c0_35 = arith.constant 0 : index
    %62 = vector.load %arg10[%c32, %c0_35] : memref<288x384xbf16, #tpu.memory_space<vmem>>, vector<256x384xbf16>
    %c0_36 = arith.constant 0 : index
    %c2 = arith.constant 2 : index
    %c0_37 = arith.constant 0 : index
    %c0_38 = arith.constant 0 : index
    %63 = vector.load %arg5[%c0_36, %c2, %c0_37, %c0_38] : memref<1x3x384x128xbf16, #tpu.memory_space<vmem>>, vector<1x1x384x128xbf16>
    %64 = vector.shape_cast %63 : vector<1x1x384x128xbf16> to vector<384x128xbf16>
    %cst_39 = arith.constant dense<0.000000e+00> : vector<256x128xf32>
    %65 = tpu.matmul %62, %64, %cst_39 {dimension_numbers = #tpu.dot_dimension_numbers<[1], [0], [0], [1], [0, 0, 1, 1], [], []>} : vector<256x384xbf16>, vector<384x128xbf16>, vector<256x128xf32> -> vector<256x128xf32>
    %66 = arith.addf %61, %65 : vector<256x128xf32>
    %c0_40 = arith.constant 0 : index
    %c0_41 = arith.constant 0 : index
    %c0_42 = arith.constant 0 : index
    %67 = vector.load %arg6[%c0_40, %c0_41, %c0_42] : memref<1x1x128xf32, #tpu.memory_space<vmem>>, vector<1x1x128xf32>
    %68 = vector.shape_cast %67 : vector<1x1x128xf32> to vector<1x128xf32>
    %69 = vector.broadcast %68 : vector<1x128xf32> to vector<256x128xf32>
    %70 = arith.addf %66, %69 : vector<256x128xf32>
    %cst_43 = arith.constant 1.000000e-01 : f32
    %71 = vector.broadcast %cst_43 : f32 to vector<256x128xf32>
    %72 = arith.mulf %71, %70 : vector<256x128xf32>
    %73 = arith.maximumf %70, %72 : vector<256x128xf32>
    %74 = arith.addf %73, %3 : vector<256x128xf32>
    %c1_i32_44 = arith.constant 1 : i32
    %75 = arith.cmpi slt, %arg1, %c1_i32_44 : i32
    %76 = arith.extui %75 : i1 to i32
    %c0_i32_45 = arith.constant 0 : i32
    %77 = arith.cmpi ne, %76, %c0_i32_45 : i32
    scf.if %77 {
      %c0_48 = arith.constant 0 : index
      %c0_49 = arith.constant 0 : index
      %81 = vector.load %arg8[%c0_48, %c0_49] : memref<256x128xf32, #tpu.memory_space<vmem>>, vector<256x128xf32>
      tpu.vector_store %arg8[%c0_48, %c0_49], %74 {strides = array<i32>} : memref<256x128xf32, #tpu.memory_space<vmem>>, vector<256x128xf32>,
    } else {
    }
    %c1_i32_46 = arith.constant 1 : i32
    %78 = arith.cmpi eq, %arg1, %c1_i32_46 : i32
    %79 = arith.extui %78 : i1 to i32
    %c0_i32_47 = arith.constant 0 : i32
    %80 = arith.cmpi ne, %79, %c0_i32_47 : i32
    scf.if %80 {
      %c0_48 = arith.constant 0 : index
      %c0_49 = arith.constant 0 : index
      %c0_50 = arith.constant 0 : index
      %81 = vector.load %arg7[%c0_48, %c0_49, %c0_50] : memref<1x256x128xf32, #tpu.memory_space<vmem>>, vector<1x256x128xf32>
      %82 = vector.shape_cast %81 : vector<1x256x128xf32> to vector<256x128xf32>
      %83 = vector.shape_cast %74 : vector<256x128xf32> to vector<1x256x128xf32>
      tpu.vector_store %arg7[%c0_48, %c0_49, %c0_50], %83 {strides = array<i32>} : memref<1x256x128xf32, #tpu.memory_space<vmem>>, vector<1x256x128xf32>,
    } else {
    }
    return
  }
  func.func @transform_0(%arg0: i32, %arg1: i32) -> (i32, i32, i32) {
    %c0_i32 = arith.constant 0 : i32
    %c0_i32_0 = arith.constant 0 : i32
    %c0_i32_1 = arith.constant 0 : i32
    return %arg0, %c0_i32, %c0_i32_0 : i32, i32, i32
  }
  func.func @transform_1(%arg0: i32, %arg1: i32) -> (i32, i32, i32) {
    %c0_i32 = arith.constant 0 : i32
    %c0_i32_0 = arith.constant 0 : i32
    %c0_i32_1 = arith.constant 0 : i32
    return %arg1, %c0_i32, %c0_i32_0 : i32, i32, i32
  }
  func.func @transform_2(%arg0: i32, %arg1: i32) -> (i32, i32, i32) {
    %c0_i32 = arith.constant 0 : i32
    %c0_i32_0 = arith.constant 0 : i32
    %c0_i32_1 = arith.constant 0 : i32
    return %arg1, %c0_i32, %c0_i32_0 : i32, i32, i32
  }
  func.func @transform_3(%arg0: i32, %arg1: i32) -> (i32, i32, i32, i32) {
    %c0_i32 = arith.constant 0 : i32
    %c0_i32_0 = arith.constant 0 : i32
    %c0_i32_1 = arith.constant 0 : i32
    %c0_i32_2 = arith.constant 0 : i32
    return %arg1, %c0_i32, %c0_i32_0, %c0_i32_1 : i32, i32, i32, i32
  }
  func.func @transform_4(%arg0: i32, %arg1: i32) -> (i32, i32, i32) {
    %c0_i32 = arith.constant 0 : i32
    %c0_i32_0 = arith.constant 0 : i32
    %c0_i32_1 = arith.constant 0 : i32
    return %arg1, %c0_i32, %c0_i32_0 : i32, i32, i32
  }
  func.func @transform_5(%arg0: i32, %arg1: i32) -> (i32, i32, i32) {
    %c0_i32 = arith.constant 0 : i32
    %c0_i32_0 = arith.constant 0 : i32
    %c0_i32_1 = arith.constant 0 : i32
    return %arg0, %c0_i32, %c0_i32_0 : i32, i32, i32
  }
}

</mosaic_0001>

<bundles_post_ra>
// kernel: residual_block_nhwc.1
= control target key start
LH: loop header
LB: loop body
LE: loop exit
PB: predicated region body
PF: predicated region fallthrough
CT: control target
= control target key end

     0   :  { %s7549_s0 = inlined_call_operand.hbm [shape: f32[2,256,128], index: 0, kind: input, shape index: {}]   ;;  %s7550_s1 = inlined_call_operand.hbm [shape: bf16[2,128,128], index: 1, kind: input, shape index: {}]   ;;  %s7551_s2 = inlined_call_operand.hbm [shape: f32[2,1,128], index: 2, kind: input, shape index: {}]   ;;  %s7552_s3 = inlined_call_operand.hbm [shape: bf16[2,3,384,128], index: 3, kind: input, shape index: {}]   ;;  %s7553_s4 = inlined_call_operand.hbm [shape: f32[2,1,128], index: 4, kind: input, shape index: {}]   ;;  %s7554_s5 = inlined_call_operand.hbm [shape: f32[2,256,128], index: 5, kind: output, shape index: {}]  }
   0x1   :  { %7634 = sst [smem:[#allocation61_spill]] %s7549_s0 }
   0x2   :  { %7635 = sst [smem:[#allocation62_spill]] %s7550_s1 }
   0x3   :  { %7636 = sst [smem:[#allocation63_spill]] %s7552_s3 }
   0x4   :  { %7637 = sst [smem:[#allocation64_spill]] %s7554_s5 }
   0x5   :  { %10 = vsyncpa [#allocation6], 0 }
   0x6   :  { %12 = vsyncpa [#allocation6 + $0x1], 0 }
   0x7   :  { %13 = vsyncpa [#allocation9], 0 }
   0x8   :  { %15 = vsyncpa [#allocation9 + $0x1], 0 }
   0x9   :  { %16 = vsyncpa [#allocation12], 0 }
   0xa   :  { %18 = vsyncpa [#allocation12 + $0x1], 0 }
   0xb   :  { %19 = vsyncpa [#allocation7], 0 }
   0xc   :  { %21 = vsyncpa [#allocation7 + $0x1], 0  ;;  %s5534_s18 = smov 0   ;;  %s5536_s19 = smov 0  }
   0xd   :  { %s5538_s20 = smov 0   ;;  %s5540_s21 = smov 0  }
   0xe   :  { %s5542_s22 = smov 0   ;;  %s5544_s23 = smov 0  }
   0xf   :  { %s5546_s24 = smov 0   ;;  %s5548_s25 = smov 0  }
  0x10   :  { %s5550_s26 = smov 0   ;;  %s5552_s27 = smov 0  }
  0x11   :  { %s5554_s28 = smov 0  }
  0x12 LB: > { %7638 = sst [smem:[#allocation19_spill]] %s5452_s19  ;;  %s36_s29 = sadd.s32 1, %s5480_s26  ;;  %s5488_s28 = sphi %s5554_s28, %s27_s28   ;;  %s5484_s27 = sphi %s5552_s27, %s7907_s27   ;;  %s5480_s26 = sphi %s5550_s26, %s7911_s26   ;;  %s5476_s25 = sphi %s5548_s25, %s7905_s25   ;;  %s5472_s24 = sphi %s5546_s24, %s7910_s24   ;;  %s5468_s23 = sphi %s5544_s23, %s7904_s23   ;;  %s5464_s22 = sphi %s5542_s22, %s7909_s22   ;;  %s5460_s21 = sphi %s5540_s21, %s7908_s21   ;;  %s5456_s20 = sphi %s5538_s20, %s7902_s20   ;;  %s5452_s19 = sphi %s5536_s19, %s7901_s19   ;;  %s5448_s18 = sphi %s5534_s18, %s7900_s18  }
  0x13   : > { %7639 = sst [smem:[#allocation20_spill]] %s5456_s20  ;;  %p7558_p0 = scmp.eq.s32.totalorder %s5488_s28, 0 }
  0x14   : > { %7640 = sst [smem:[#allocation21_spill]] %s5460_s21  ;;  %p5591_p1 = scmp.ge.s32.totalorder %s36_s29, 2 }
  0x15   : > { %7641 = sst [smem:[#allocation22_spill]] %s5468_s23  ;;  %s72_s6 = sadd.s32 1, %s5456_s20 }
  0x16   : > { %7642 = sst [smem:[#allocation23_spill]] %s5472_s24  ;;  %p79_p2 = scmp.ne.s32.totalorder %s5456_s20, %s5452_s19 }
  0x17   : > { %7643 = sst [smem:[#allocation24_spill]] %s5476_s25  ;;  %s7913_s29 = smov (%p5591_p1, %s36_s29), 0 }
  0x18   : > { %7644 = sst [smem:[#allocation25_spill]] %s5484_s27  ;;  %p81_p4 = por %p79_p2, %p7558_p0 }
  0x19   : > { %s7645_s30 = scalar_select %p5591_p1, 1, 0 }
  0x1a   : > { %7646 = sst [smem:[#allocation26_spill]] %s7913_s29  ;;  %s69_s7 = ssub.s32 %s5480_s26, %s7913_s29 }
  0x1b   : > { %p7556_p5 = scmp.lt.s32.totalorder %s5488_s28, 4  ;;  %p70_p6 = scmp.eq.s32.totalorder %s69_s7, 0 }
  0x1c   : > { %s7557_s8 = sand.u32 1, %s5488_s28   ;;  %s5611_s9 = sand.u32 1, %s5456_s20  }
  0x1d   : > { %s5614_s10 = scalar_select %p70_p6, %s5456_s20, %s72_s6  }
  0x1e   : > { %s3748_s11 = sshll.u32 %s5611_s9, 6  ;;  %s3945_s12 = sshll.u32 %s5480_s26, 10 }
  0x1f   : > { %7647 = sst [smem:[#allocation27_spill]] %s5614_s10  ;;  %s238_s16 = scalar_lea.vmem [#allocation8], %s3748_s11 }
  0x20   : > { %s7648_s1 = sld [smem:[#allocation62_spill]]  ;;  %s245_s17 = sshll.u32 %s238_s16, 4  ;;  %s5629_s17 = int_to_ptr.vmem [resolvable:$true] %s245_s17 }
  0x21   : > { %p5625_p7 = pnand %p7556_p5, %p81_p4  ;;  %s5633_s6 = scalar_lea.sflag [#allocation9], %s7557_s8 }
  0x23   : > { %s7649_s7 = scalar_select %p5625_p7, 1, 0 }
  0x24   : > { %p5639_p9 = pneg %p5625_p7 }
  0x26   : > { %s5621_s15 = scalar_lea.hbm %s7648_s1, %s3945_s12  ;;  %s5213_s16 = scalar_lea.hbm %s7648_s1, 2048 }
  0x27   : > { %s5208_s13 = scalar_lea.hbm %s5621_s15, 1024  ;;  %p5214_p12 = scmp.lt.u32.totalorder %s5621_s15, %s7648_s1 }
  0x28   : > { %p5209_p8 = scmp.ne.s32.totalorder %s5621_s15, %s5208_s13  ;;  %p5215_p13 = scmp.lt.u32.totalorder %s5213_s16, %s5208_s13 }
  0x29   : > { %p5217_p4 = scmp.lt.u32.totalorder %s5208_s13, %s5621_s15 }
  0x2a   : > { %p5211_p10 = pnand %p5639_p9, %p5209_p8  ;;  %p5216_p2 = por %p5215_p13, %p5214_p12 }
  0x2c   : > { %p5212_p11 = pneg %p5211_p10  ;;  %p5218_p6 = por %p5217_p4, %p5216_p2 }
  0x2e   : > { %p5219_p5 = pnand %p5218_p6, %p5212_p11 }
  0x30   : > { %5222 = shalt.err (!%p5219_p5)
}
  0x31   : > { %s5223_s8 = scalar_lea.vmem %s5629_s17, 1024  ;;  %s5490_s11 = smov [#allocation8]  }
  0x32   : > { %p5224_p8 = scmp.ne.s32.totalorder %s5629_s17, %s5223_s8  ;;  %s5228_s14 = sshll.u32 %s5490_s11, 4  ;;  %s5229_s14 = int_to_ptr.vmem [resolvable:$false] %s5228_s14 }
  0x33   : > { %s5230_s29 = scalar_lea.vmem %s5229_s14, 2048  ;;  %p5231_p0 = scmp.lt.s32.totalorder %s5629_s17, %s5229_s14 }
  0x34   : > { %p5226_p10 = pnand %p5224_p8, %p5639_p9  ;;  %p5232_p1 = scmp.lt.s32.totalorder %s5230_s29, %s5223_s8 }
  0x36   : > { %p5227_p3 = pneg %p5226_p10  ;;  %p5233_p12 = por %p5232_p1, %p5231_p0 }
  0x38   : > { %p5234_p13 = pnand %p5233_p12, %p5227_p3 }
  0x3a   : > { %5237 = shalt.err (!%p5234_p13)
}
  0x3b   : > { %s7562_s10 = smov 64   ;;  %s7563_s13 = smov 4  }
  0x3c   : > { %4752 = dma.hbm_to_vmem [thread:$0]  (!%p5625_p7), %s5621_s15, 1024, %s5629_s17, %s5633_s6, %s7562_s10, %s7562_s10, %s7563_s13  }
  0x3d   : > { %p3754_p0 = scmp.ge.s32.totalorder %s5488_s28, 1  ;;  %p308_p1 = scmp.lt.s32.totalorder %s5488_s28, 5 }
  0x3e   : > { %s4731_s8 = smul.u32 576, %s5611_s9  ;;  %s7652_s3 = sld [smem:[#allocation63_spill]] }
  0x3f   : > { %p5669_p3 = pnand %p3754_p0, %p308_p1  ;;  %s4732_s11 = smul.u32 9216, %s5480_s26 }
  0x40   : > { %s276_s20 = scalar_lea.vmem [#allocation11], %s4731_s8  ;;  %s7653_s15 = sand.u32 1, %s5488_s28  }
  0x41   : > { %s7651_s16 = scalar_select %p5669_p3, 1, 0 }
  0x42   : > { %s283_s5 = sshll.u32 %s276_s20, 4  ;;  %s5683_s17 = scalar_lea.sflag [#allocation12], %s7653_s15  ;;  %s5679_s5 = int_to_ptr.vmem [resolvable:$true] %s283_s5 }
  0x44   : > { %s5677_s1 = scalar_lea.hbm %s7652_s3, %s4732_s11  ;;  %s5243_s11 = scalar_lea.hbm %s7652_s3, 18432 }
  0x45   : > { %s5238_s10 = scalar_lea.hbm %s5677_s1, 9216  ;;  %p5244_p4 = scmp.lt.u32.totalorder %s5677_s1, %s7652_s3 }
  0x46   : > { %p5239_p5 = scmp.ne.s32.totalorder %s5677_s1, %s5238_s10  ;;  %p5245_p6 = scmp.lt.u32.totalorder %s5243_s11, %s5238_s10 }
  0x47   : > { %p5247_p10 = scmp.lt.u32.totalorder %s5238_s10, %s5677_s1 }
  0x48   : > { %p5241_p11 = pnand %p5239_p5, %p5639_p9  ;;  %p5246_p8 = por %p5245_p6, %p5244_p4 }
  0x4a   : > { %p5242_p2 = pneg %p5241_p11  ;;  %p5248_p12 = por %p5247_p10, %p5246_p8 }
  0x4c   : > { %p5249_p13 = pnand %p5248_p12, %p5242_p2 }
  0x4e   : > { %5252 = shalt.err (!%p5249_p13)
}
  0x4f   : > { %s5253_s20 = scalar_lea.vmem %s5679_s5, 9216  ;;  %s5493_s13 = smov [#allocation11]  }
  0x50   : > { %p5254_p0 = scmp.ne.s32.totalorder %s5679_s5, %s5253_s20  ;;  %s5258_s8 = sshll.u32 %s5493_s13, 4  ;;  %s5259_s8 = int_to_ptr.vmem [resolvable:$false] %s5258_s8 }
  0x51   : > { %s5260_s25 = scalar_lea.vmem %s5259_s8, 18432  ;;  %p5261_p11 = scmp.lt.s32.totalorder %s5679_s5, %s5259_s8 }
  0x52   : > { %p5256_p1 = pnand %p5254_p0, %p5639_p9  ;;  %p5262_p3 = scmp.lt.s32.totalorder %s5260_s25, %s5253_s20 }
  0x54   : > { %p5257_p5 = pneg %p5256_p1  ;;  %p5263_p4 = por %p5262_p3, %p5261_p11 }
  0x56   : > { %p5264_p6 = pnand %p5263_p4, %p5257_p5 }
  0x58   : > { %5267 = shalt.err (!%p5264_p6)
}
  0x59   : > { %s7654_s10 = smov 4   ;;  %s7655_s15 = smov 64  }
  0x5a   : > { %4758 = dma.hbm_to_vmem [thread:$0]  (!%p5625_p7), %s5677_s1, 9216, %s5679_s5, %s5683_s17, %s7655_s15, %s7655_s15, %s7654_s10  }
  0x5b   : > { %s5711_s14 = sadd.s32 4294967295, %s5488_s28   ;;  %s3742_s11 = sadd.s32 4294967294, %s5488_s28  }
  0x5c   : > { %s39_s29 = sadd.s32 1, %s5484_s27  ;;  %s46_s20 = sadd.s32 1, %s5468_s23 }
  0x5d   : > { %p7656_p3 = scmp.ne.s32.totalorder %s7645_s30, 0  ;;  %p53_p2 = scmp.ne.s32.totalorder %s5468_s23, %s5464_s22 }
  0x5e   : > { %p59_p8 = scmp.ne.s32.totalorder %s5464_s22, %s5460_s21  ;;  %p60_p12 = scmp.eq.s32.totalorder %s5711_s14, 0 }
  0x5f   : > { %s7915_s29 = smov (!%p7656_p3, %s39_s29), %s5484_s27  ;;  %p7657_p13 = scmp.eq.s32.totalorder %s5488_s28, 0 }
  0x60   : > { %p41_p10 = scmp.ge.s32.totalorder %s7915_s29, 2  ;;  %p187_p1 = scmp.eq.s32.totalorder %s5711_s14, 3 }
  0x61   : > { %p5726_p0 = por %p7657_p13, %p53_p2  ;;  %p5736_p5 = por %p60_p12, %p59_p8 }
  0x62   : > { %s7917_s29 = smov (%p41_p10, %s7915_s29), 0  ;;  %p7661_p11 = scmp.ne.s32.totalorder %s5452_s19, %s5448_s18 }
  0x63   : > { %7659 = sst [smem:[#allocation28_spill]] %s7917_s29  ;;  %s43_s13 = ssub.s32 %s5484_s27, %s7917_s29 }
  0x64   : > { %s7660_s5 = scalar_select %p5736_p5, 1, 0 }
  0x65   : > { %p5743_p4 = por %p7661_p11, %p60_p12  ;;  %p5749_p6 = por %p187_p1, %p53_p2 }
  0x66   : > { %p44_p3 = scmp.eq.s32.totalorder %s43_s13, 0  ;;  %p193_p13 = scmp.eq.s32.totalorder %s3742_s11, 3 }
  0x67   : > { %s7662_s30 = scalar_select %p5743_p4, 1, 0 }
  0x68   : > { %s7663_s8 = scalar_select %p5749_p6, 1, 0 }
  0x69   : > { %s213_s25 = sand.u32 1, %s5468_s23   ;;  %s3944_s10 = sshll.u32 %s5484_s27, 12 }
  0x6a   : > { %s5756_s15 = scalar_select %p44_p3, %s5468_s23, %s46_s20  }
  0x6b   : > { %p5761_p10 = por %p193_p13, %p59_p8  ;;  %s3745_s18 = sshll.u32 %s213_s25, 8 }
  0x6c   : > { %7664 = sst [smem:[#allocation29_spill]] %s5756_s15  ;;  %s7667_s0 = sld [smem:[#allocation61_spill]] }
  0x6d   : > { %s7665_s3 = scalar_select %p5761_p10, 1, 0 }
  0x6e   : > { %p7668_p2 = scmp.lt.s32.totalorder %s5488_s28, 4  ;;  %s217_s20 = scalar_lea.vmem [#allocation5], %s3745_s18 }
  0x6f   : > { %7666 = sst [smem:[#allocation30_spill]] %s7665_s3  ;;  %s224_s13 = sshll.u32 %s217_s20, 4  ;;  %s5778_s13 = int_to_ptr.vmem [resolvable:$true] %s224_s13 }
  0x70   : > { %p5774_p12 = pnand %p7668_p2, %p5726_p0  ;;  %s5780_s27 = scalar_lea.sflag [#allocation6], %s213_s25 }
  0x72   : > { %s5768_s29 = scalar_lea.hbm %s7667_s0, %s3944_s10  ;;  %p5270_p1 = pneg %p5774_p12 }
  0x73   : > { %s5268_s19 = scalar_lea.hbm %s5768_s29, 4096  ;;  %s5273_s10 = scalar_lea.hbm %s7667_s0, 8192 }
  0x74   : > { %p5269_p8 = scmp.ne.s32.totalorder %s5768_s29, %s5268_s19  ;;  %p5274_p0 = scmp.lt.u32.totalorder %s5768_s29, %s7667_s0 }
  0x75   : > { %p5275_p13 = scmp.lt.u32.totalorder %s5273_s10, %s5268_s19  ;;  %p5277_p10 = scmp.lt.u32.totalorder %s5268_s19, %s5768_s29 }
  0x76   : > { %p5271_p11 = pnand %p5270_p1, %p5269_p8 }
  0x77   : > { %p5276_p2 = por %p5275_p13, %p5274_p0 }
  0x78   : > { %p5272_p3 = pneg %p5271_p11 }
  0x79   : > { %p5278_p6 = por %p5277_p10, %p5276_p2 }
  0x7b   : > { %p5279_p4 = pnand %p5278_p6, %p5272_p3 }
  0x7d   : > { %5282 = shalt.err (!%p5279_p4)
}
  0x7e   : > { %s5283_s25 = scalar_lea.vmem %s5778_s13, 4096  ;;  %s5494_s18 = smov [#allocation5]  }
  0x7f   : > { %p5284_p8 = scmp.ne.s32.totalorder %s5778_s13, %s5283_s25  ;;  %s5288_s20 = sshll.u32 %s5494_s18, 4  ;;  %s5289_s20 = int_to_ptr.vmem [resolvable:$false] %s5288_s20 }
  0x80   : > { %s5290_s23 = scalar_lea.vmem %s5289_s20, 8192  ;;  %p5291_p7 = scmp.lt.s32.totalorder %s5778_s13, %s5289_s20 }
  0x81   : > { %p5286_p11 = pnand %p5284_p8, %p5270_p1  ;;  %p5292_p0 = scmp.lt.s32.totalorder %s5290_s23, %s5283_s25 }
  0x83   : > { %p5287_p5 = pneg %p5286_p11  ;;  %p5293_p13 = por %p5292_p0, %p5291_p7 }
  0x85   : > { %p5294_p10 = pnand %p5293_p13, %p5287_p5 }
  0x87   : > { %5297 = shalt.err (!%p5294_p10)
}
  0x88   : > { %s5495_s15 = smov 128   ;;  %s5496_s19 = smov 8  }
  0x89   : > { %4749 = dma.hbm_to_vmem [thread:$0]  (!%p5774_p12), %s5768_s29, 4096, %s5778_s13, %s5780_s27, %s5495_s15, %s5495_s15, %s5496_s19  }
  0x8a   : > { %s3751_s24 = sshll.u32 %s5480_s26, 4  ;;  %s258_s1 = scalar_lea.vmem [#allocation10], %s5611_s9 }
  0x8b   : > { %s265_s10 = sshll.u32 %s258_s1, 4  ;;  %s263_s20 = scalar_lea.hbm %s7551_s2, %s3751_s24  ;;  %s266_s10 = int_to_ptr.vmem [resolvable:$true] %s265_s10 }
  0x8c   : > { %s5298_s23 = scalar_lea.hbm %s263_s20, 16  ;;  %s5303_s21 = scalar_lea.hbm %s7551_s2, 32 }
  0x8d   : > { %p5299_p7 = scmp.ne.s32.totalorder %s263_s20, %s5298_s23  ;;  %p5304_p6 = scmp.lt.u32.totalorder %s263_s20, %s7551_s2 }
  0x8e   : > { %p5305_p12 = scmp.lt.u32.totalorder %s5303_s21, %s5298_s23  ;;  %p5307_p3 = scmp.lt.u32.totalorder %s5298_s23, %s263_s20 }
  0x8f   : > { %p5301_p5 = pnand %p5299_p7, %p5639_p9 }
  0x90   : > { %p5306_p1 = por %p5305_p12, %p5304_p6 }
  0x91   : > { %p5302_p4 = pneg %p5301_p5 }
  0x92   : > { %p5308_p2 = por %p5307_p3, %p5306_p1 }
  0x94   : > { %p5309_p8 = pnand %p5308_p2, %p5302_p4 }
  0x96   : > { %5312 = shalt.err (!%p5309_p8)
}
  0x97   : > { %s5313_s29 = scalar_lea.vmem %s266_s10, 16  ;;  %s5497_s13 = smov [#allocation10]  }
  0x98   : > { %p5314_p11 = scmp.ne.s32.totalorder %s266_s10, %s5313_s29  ;;  %s5318_s15 = sshll.u32 %s5497_s13, 4  ;;  %s5319_s15 = int_to_ptr.vmem [resolvable:$false] %s5318_s15 }
  0x99   : > { %s5320_s0 = scalar_lea.vmem %s5319_s15, 32  ;;  %p5321_p10 = scmp.lt.s32.totalorder %s266_s10, %s5319_s15 }
  0x9a   : > { %p5316_p0 = pnand %p5314_p11, %p5639_p9  ;;  %p5322_p7 = scmp.lt.s32.totalorder %s5320_s0, %s5313_s29 }
  0x9c   : > { %p5317_p13 = pneg %p5316_p0  ;;  %p5323_p5 = por %p5322_p7, %p5321_p10 }
  0x9e   : > { %p5324_p6 = pnand %p5323_p5, %p5317_p13 }
  0xa0   : > { %5327 = shalt.err (!%p5324_p6)
}
  0xa1   : > { %p7670_p12 = scmp.ne.s32.totalorder %s7649_s7, 0  ;;  %s5833_s19 = scalar_lea.hbm %s7553_s4, %s3751_s24 }
  0xa2   : > { %s296_s1 = scalar_lea.vmem [#allocation13], %s5611_s9  ;;  %s5328_s18 = scalar_lea.hbm %s5833_s19, 16 }
  0xa3   : > { %4755 = dma.hbm_to_vmem [thread:$0]  (!%p7670_p12), %s263_s20, 16, %s266_s10, %s5633_s6  }
  0xa4   : > { %s303_s25 = sshll.u32 %s296_s1, 4  ;;  %p5329_p4 = scmp.ne.s32.totalorder %s5833_s19, %s5328_s18  ;;  %s304_s25 = int_to_ptr.vmem [resolvable:$true] %s303_s25 }
  0xa5   : > { %s5333_s10 = scalar_lea.hbm %s7553_s4, 32  ;;  %p5334_p2 = scmp.lt.u32.totalorder %s5833_s19, %s7553_s4 }
  0xa6   : > { %p5331_p1 = pnand %p5329_p4, %p5639_p9  ;;  %p5335_p8 = scmp.lt.u32.totalorder %s5333_s10, %s5328_s18 }
  0xa7   : > { %p5337_p0 = scmp.lt.u32.totalorder %s5328_s18, %s5833_s19 }
  0xa8   : > { %p5332_p3 = pneg %p5331_p1  ;;  %p5336_p11 = por %p5335_p8, %p5334_p2 }
  0xaa   : > { %p5338_p13 = por %p5337_p0, %p5336_p11 }
  0xac   : > { %p5339_p10 = pnand %p5338_p13, %p5332_p3 }
  0xae   : > { %5342 = shalt.err (!%p5339_p10)
}
  0xaf   : > { %s5343_s9 = scalar_lea.vmem %s304_s25, 16  ;;  %s5498_s24 = smov [#allocation13]  }
  0xb0   : > { %p5344_p7 = scmp.ne.s32.totalorder %s304_s25, %s5343_s9  ;;  %s5348_s27 = sshll.u32 %s5498_s24, 4  ;;  %s5349_s27 = int_to_ptr.vmem [resolvable:$false] %s5348_s27 }
  0xb1   : > { %s5350_s29 = scalar_lea.vmem %s5349_s27, 32  ;;  %p5351_p4 = scmp.lt.s32.totalorder %s304_s25, %s5349_s27 }
  0xb2   : > { %p5346_p5 = pnand %p5344_p7, %p5639_p9  ;;  %p5352_p1 = scmp.lt.s32.totalorder %s5350_s29, %s5343_s9 }
  0xb4   : > { %p5347_p6 = pneg %p5346_p5  ;;  %p5353_p12 = por %p5352_p1, %p5351_p4 }
  0xb6   : > { %p5354_p2 = pnand %p5353_p12, %p5347_p6 }
  0xb8   : > { %5357 = shalt.err (!%p5354_p2)
}
  0xb9   : > { %p7671_p8 = scmp.ne.s32.totalorder %s7649_s7, 0  ;;  %p7672_p3 = scmp.ne.s32.totalorder %s7651_s16, 0 }
  0xbb   : > { %4761 = dma.hbm_to_vmem [thread:$0]  (!%p7671_p8), %s5833_s19, 16, %s304_s25, %s5683_s17  }
  0xbc   : > { %312 = sbr.rel (%p7672_p3) target bundleno = 1109 (0x455), region = 40 }
  0xc3   : > { %s5857_s12 = sand.u32 1, %s5464_s22   ;;  %p7673_p9 = scmp.ne.s32.totalorder %s7660_s5, 0 }
  0xc4   : > { %s3755_s13 = sshll.u32 %s5857_s12, 8  ;;  %s315_s15 = scalar_lea.sflag [#allocation6], %s5857_s12 }
  0xc5   : > { %s5861_s0 = scalar_lea.vmem [#allocation5], %s3755_s13 }
  0xc6   : > { %5431 = dma.done.wait (%p7673_p9), %s315_s15, 4096  }
  0xc7   : > { %5433 = vsyncadd (%p7673_p9), %s315_s15, 4294963200  ;;  %s7674_s7 = sld [smem:[#allocation19_spill]]  ;;  %s323_s16 = sand.u32 1, %s5711_s14  }
  0xc8   : > { %s324_s21 = scalar_lea.sflag [#allocation9], %s323_s16  ;;  %p7675_p12 = scmp.ne.s32.totalorder %s7662_s30, 0 }
  0xcd   : > { %s5869_s17 = sand.u32 1, %s7674_s7  }
  0xce   : > { %s3756_s3 = sshll.u32 %s5869_s17, 6 }
  0xcf   : > { %s5872_s19 = scalar_lea.vmem [#allocation8], %s3756_s3 }
  0xd0   : > { %5435 = dma.done.wait (%p7675_p12), %s324_s21, 1040  }
  0xd1   : > { %5437 = vsyncadd (%p7675_p12), %s324_s21, 4294966256  ;;  %s4733_s5 = smul.u32 576, %s5869_s17  ;;  %s335_s1 = scalar_lea.vmem [#allocation10], %s5869_s17 }
  0xd2   : > { %s341_s25 = scalar_lea.sflag [#allocation12], %s323_s16 }
  0xd3   : > { %s5880_s18 = scalar_lea.vmem [#allocation11], %s4733_s5 }
  0xd4   : > { %5439 = dma.done.wait (%p7675_p12), %s341_s25, 9232  }
  0xd5   : > { %5441 = vsyncadd (%p7675_p12), %s341_s25, 4294958064  ;;  %s352_s14 = scalar_lea.vmem [#allocation13], %s5869_s17  ;;  %s5887_s23 = scalar_lea.vmem [#allocation14], %s3755_s13 }
  0xd6   : > { %s7676_s6 = sld [smem:[#allocation23_spill]] }
  0xdc   : > { %p3758_p11 = scmp.ne.s32.totalorder %s7676_s6, 0 }
  0xdd   : > { %v402_v0 = vld [vmem:[%s5861_s0] sm:$0xff] (!%p3758_p11)  ;;  %v403_v1 = vld [vmem:[%s5861_s0 + $0x8] sm:$0xff] (!%p3758_p11)  ;;  %v404_v2 = vld [vmem:[%s5861_s0 + $0x10] sm:$0xff] (!%p3758_p11)  ;;  %v5499_v6 = vmov (!%p3758_p11), 0  }
  0xde   : > { %401 = sbr.rel (%p3758_p11) target bundleno = 241 (0xf1), region = 64  ;;  %434 = vst [vmem:[#allocation2] sm:$0xff] (!%p3758_p11), %v402_v0  ;;  %435 = vst [vmem:[#allocation2 + $0x8] sm:$0xff] (!%p3758_p11), %v403_v1  ;;  %v405_v3 = vld [vmem:[%s5861_s0 + $0x18] sm:$0xff] (!%p3758_p11)  ;;  %v406_v4 = vld [vmem:[%s5861_s0 + $0x20] sm:$0xff] (!%p3758_p11) }
  0xdf   : > { %436 = vst [vmem:[#allocation2 + $0x10] sm:$0xff] (!%p3758_p11), %v404_v2  ;;  %v407_v5 = vld [vmem:[%s5861_s0 + $0x28] sm:$0xff] (!%p3758_p11)  ;;  %466 = vst [vmem:[#allocation4] sm:$0xff] (!%p3758_p11), %v5499_v6  ;;  %v408_v7 = vld [vmem:[%s5861_s0 + $0x30] sm:$0xff] (!%p3758_p11) }
  0xe0   : > { %467 = vst [vmem:[#allocation4 + $0x8] sm:$0xff] (!%p3758_p11), %v5499_v6  ;;  %468 = vst [vmem:[#allocation4 + $0x10] sm:$0xff] (!%p3758_p11), %v5499_v6  ;;  %v409_v8 = vld [vmem:[%s5861_s0 + $0x38] sm:$0xff] (!%p3758_p11)  ;;  %v410_v9 = vld [vmem:[%s5861_s0 + $0x40] sm:$0xff] (!%p3758_p11) }
  0xe1   : > { %469 = vst [vmem:[#allocation4 + $0x198] sm:$0xff] (!%p3758_p11), %v5499_v6  ;;  %470 = vst [vmem:[#allocation4 + $0x1a0] sm:$0xff] (!%p3758_p11), %v5499_v6  ;;  %v411_v10 = vld [vmem:[%s5861_s0 + $0x48] sm:$0xff] (!%p3758_p11)  ;;  %v412_v11 = vld [vmem:[%s5861_s0 + $0x50] sm:$0xff] (!%p3758_p11) }
  0xe2   : > { %471 = vst [vmem:[#allocation4 + $0x1a8] sm:$0xff] (!%p3758_p11), %v5499_v6  ;;  %437 = vst [vmem:[#allocation2 + $0x18] sm:$0xff] (!%p3758_p11), %v405_v3  ;;  %v413_v12 = vld [vmem:[%s5861_s0 + $0x58] sm:$0xff] (!%p3758_p11)  ;;  %v414_v13 = vld [vmem:[%s5861_s0 + $0x60] sm:$0xff] (!%p3758_p11) }
  0xe3   : > { %438 = vst [vmem:[#allocation2 + $0x20] sm:$0xff] (!%p3758_p11), %v406_v4  ;;  %439 = vst [vmem:[#allocation2 + $0x28] sm:$0xff] (!%p3758_p11), %v407_v5  ;;  %v415_v14 = vld [vmem:[%s5861_s0 + $0x68] sm:$0xff] (!%p3758_p11)  ;;  %v416_v15 = vld [vmem:[%s5861_s0 + $0x70] sm:$0xff] (!%p3758_p11) }
  0xe4   : > { %440 = vst [vmem:[#allocation2 + $0x30] sm:$0xff] (!%p3758_p11), %v408_v7  ;;  %441 = vst [vmem:[#allocation2 + $0x38] sm:$0xff] (!%p3758_p11), %v409_v8  ;;  %v417_v16 = vld [vmem:[%s5861_s0 + $0x78] sm:$0xff] (!%p3758_p11)  ;;  %v418_v17 = vld [vmem:[%s5861_s0 + $0x80] sm:$0xff] (!%p3758_p11) }
  0xe5   : > { %442 = vst [vmem:[#allocation2 + $0x40] sm:$0xff] %v410_v9  ;;  %443 = vst [vmem:[#allocation2 + $0x48] sm:$0xff] %v411_v10  ;;  %v419_v18 = vld [vmem:[%s5861_s0 + $0x88] sm:$0xff]  ;;  %v420_v19 = vld [vmem:[%s5861_s0 + $0x90] sm:$0xff] }
  0xe6   : > { %444 = vst [vmem:[#allocation2 + $0x50] sm:$0xff] %v412_v11  ;;  %445 = vst [vmem:[#allocation2 + $0x58] sm:$0xff] %v413_v12  ;;  %v421_v20 = vld [vmem:[%s5861_s0 + $0x98] sm:$0xff]  ;;  %v422_v21 = vld [vmem:[%s5861_s0 + $0xa0] sm:$0xff] }
  0xe7   : > { %446 = vst [vmem:[#allocation2 + $0x60] sm:$0xff] %v414_v13  ;;  %447 = vst [vmem:[#allocation2 + $0x68] sm:$0xff] %v415_v14  ;;  %v423_v22 = vld [vmem:[%s5861_s0 + $0xa8] sm:$0xff]  ;;  %v424_v23 = vld [vmem:[%s5861_s0 + $0xb0] sm:$0xff] }
  0xe8   : > { %448 = vst [vmem:[#allocation2 + $0x70] sm:$0xff] %v416_v15  ;;  %449 = vst [vmem:[#allocation2 + $0x78] sm:$0xff] %v417_v16  ;;  %v425_v24 = vld [vmem:[%s5861_s0 + $0xb8] sm:$0xff]  ;;  %v426_v25 = vld [vmem:[%s5861_s0 + $0xc0] sm:$0xff] }
  0xe9   : > { %450 = vst [vmem:[#allocation2 + $0x80] sm:$0xff] %v418_v17  ;;  %451 = vst [vmem:[#allocation2 + $0x88] sm:$0xff] %v419_v18  ;;  %v427_v26 = vld [vmem:[%s5861_s0 + $0xc8] sm:$0xff]  ;;  %v428_v27 = vld [vmem:[%s5861_s0 + $0xd0] sm:$0xff] }
  0xea   : > { %452 = vst [vmem:[#allocation2 + $0x90] sm:$0xff] %v420_v19  ;;  %453 = vst [vmem:[#allocation2 + $0x98] sm:$0xff] %v421_v20  ;;  %v429_v28 = vld [vmem:[%s5861_s0 + $0xd8] sm:$0xff]  ;;  %v430_v29 = vld [vmem:[%s5861_s0 + $0xe0] sm:$0xff] }
  0xeb   : > { %454 = vst [vmem:[#allocation2 + $0xa0] sm:$0xff] %v422_v21  ;;  %455 = vst [vmem:[#allocation2 + $0xa8] sm:$0xff] %v423_v22  ;;  %v431_v30 = vld [vmem:[%s5861_s0 + $0xe8] sm:$0xff]  ;;  %v432_v31 = vld [vmem:[%s5861_s0 + $0xf0] sm:$0xff] }
  0xec   : > { %456 = vst [vmem:[#allocation2 + $0xb0] sm:$0xff] %v424_v23  ;;  %457 = vst [vmem:[#allocation2 + $0xb8] sm:$0xff] %v425_v24  ;;  %v433_v32 = vld [vmem:[%s5861_s0 + $0xf8] sm:$0xff] }
  0xed   : > { %458 = vst [vmem:[#allocation2 + $0xc0] sm:$0xff] %v426_v25  ;;  %459 = vst [vmem:[#allocation2 + $0xc8] sm:$0xff] %v427_v26 }
  0xee   : > { %460 = vst [vmem:[#allocation2 + $0xd0] sm:$0xff] %v428_v27  ;;  %461 = vst [vmem:[#allocation2 + $0xd8] sm:$0xff] %v429_v28 }
  0xef   : > { %462 = vst [vmem:[#allocation2 + $0xe0] sm:$0xff] %v430_v29  ;;  %463 = vst [vmem:[#allocation2 + $0xe8] sm:$0xff] %v431_v30 }
  0xf0   : > { %464 = vst [vmem:[#allocation2 + $0xf0] sm:$0xff] %v432_v31  ;;  %465 = vst [vmem:[#allocation2 + $0xf8] sm:$0xff] %v433_v32 }
  0xf1 PF: > { %v4863_v33 = vld [vmem:[%s5872_s19] sm:$0xff]   ;;  %v4864_v34 = vld [vmem:[%s5872_s19 + $0x8] sm:$0xff]   ;;  %v4865_v35 = vld [vmem:[%s5872_s19 + $0x10] sm:$0xff]   ;;  %vm7586_vm5 = vmmov 1   ;;  %s7891_s30 = sld [smem:[#allocation23_spill]] }
  0xf2   : > { %4379 = vmatprep.subr.bf16.mxu1 %v4863_v33  ;;  %v4866_v36 = vld [vmem:[%s5872_s19 + $0x18] sm:$0xff]   ;;  %v472_v37 = vld [vmem:[#allocation2] sm:$0xff]  ;;  %v473_v38 = vld [vmem:[#allocation2 + $0x8] sm:$0xff] }
  0xf3   : > { %4380 = vmatpush3.bf16.msra.mxu1 %v4863_v33  ;;  %v504_v39 = vpack.c.bf16 %v473_v38, %v472_v37  ;;  %v4867_v40 = vld [vmem:[%s5872_s19 + $0x20] sm:$0xff]   ;;  %v4868_v41 = vld [vmem:[%s5872_s19 + $0x28] sm:$0xff]   ;;  %v4869_v42 = vld [vmem:[%s5872_s19 + $0x30] sm:$0xff]  }
  0xf4   : > { %4381 = vmatprep.subr.bf16.mxu1 %v4864_v34  ;;  %v4870_v43 = vld [vmem:[%s5872_s19 + $0x38] sm:$0xff]   ;;  %v474_v44 = vld [vmem:[#allocation2 + $0x10] sm:$0xff]  ;;  %v4871_v48 = vld [vmem:[%s5880_s18 + $0x100] sm:$0xff]  }
  0xf5   : > { %4395 = vmatprep.mubr.bf16.mxu1 %v504_v39  ;;  %v475_v45 = vld [vmem:[#allocation2 + $0x18] sm:$0xff]  ;;  %v4872_v49 = vld [vmem:[%s5880_s18 + $0xc0] sm:$0xff]   ;;  %v482_v58 = vld [vmem:[#allocation2 + $0x50] sm:$0xff] }
  0xf6   : > { %v476_v46 = vld [vmem:[#allocation2 + $0x20] sm:$0xff]  ;;  %v477_v47 = vld [vmem:[#allocation2 + $0x28] sm:$0xff]  ;;  %v505_v50 = vpack.c.bf16 %v475_v45, %v474_v44  ;;  %v483_v59 = vld [vmem:[#allocation2 + $0x58] sm:$0xff] }
  0xf7   : > { %4382 = vmatpush3.bf16.msra.mxu1 %v4864_v34  ;;  %v506_v51 = vpack.c.bf16 %v477_v47, %v476_v46  ;;  %v478_v52 = vld [vmem:[#allocation2 + $0x30] sm:$0xff]  ;;  %v479_v53 = vld [vmem:[#allocation2 + $0x38] sm:$0xff]  ;;  %v480_v54 = vld [vmem:[#allocation2 + $0x40] sm:$0xff]  ;;  %v509_v62 = vpack.c.bf16 %v483_v59, %v482_v58  ;;  %p3937_p0 = scmp.ge.s32.totalorder %s7891_s30, 1 }
  0xf8   : > { %4383 = vmatprep.subr.bf16.mxu1 %v4865_v35  ;;  %v481_v55 = vld [vmem:[#allocation2 + $0x48] sm:$0xff]  ;;  %v507_v56 = vpack.c.bf16 %v479_v53, %v478_v52  ;;  %v484_v60 = vld [vmem:[#allocation2 + $0x60] sm:$0xff]  ;;  %v486_v0 = vld [vmem:[#allocation2 + $0x70] sm:$0xff] }
  0xf9   : > { %v508_v57 = vpack.c.bf16 %v481_v55, %v480_v54  ;;  %v485_v61 = vld [vmem:[#allocation2 + $0x68] sm:$0xff]  ;;  %v487_v1 = vld [vmem:[#allocation2 + $0x78] sm:$0xff]  ;;  %v488_v2 = vld [vmem:[#allocation2 + $0x80] sm:$0xff] }
  0xfa   : > { %v510_v63 = vpack.c.bf16 %v485_v61, %v484_v60  ;;  %v489_v3 = vld [vmem:[#allocation2 + $0x88] sm:$0xff]  ;;  %v511_v4 = vpack.c.bf16 %v487_v1, %v486_v0  ;;  %v490_v6 = vld [vmem:[#allocation2 + $0x90] sm:$0xff]  ;;  %v491_v7 = vld [vmem:[#allocation2 + $0x98] sm:$0xff] }
  0xfb   : > { %4384 = vmatpush3.bf16.msra.mxu1 %v4865_v35  ;;  %v512_v5 = vpack.c.bf16 %v489_v3, %v488_v2  ;;  %v492_v8 = vld [vmem:[#allocation2 + $0xa0] sm:$0xff]  ;;  %v493_v9 = vld [vmem:[#allocation2 + $0xa8] sm:$0xff]  ;;  %v513_v10 = vpack.c.bf16 %v491_v7, %v490_v6  ;;  %v494_v12 = vld [vmem:[#allocation2 + $0xb0] sm:$0xff] }
  0xfc   : > { %4385 = vmatprep.subr.bf16.mxu1 %v4866_v36  ;;  %v514_v11 = vpack.c.bf16 %v493_v9, %v492_v8  ;;  %v495_v13 = vld [vmem:[#allocation2 + $0xb8] sm:$0xff]  ;;  %v496_v14 = vld [vmem:[#allocation2 + $0xc0] sm:$0xff]  ;;  %v497_v15 = vld [vmem:[#allocation2 + $0xc8] sm:$0xff] }
  0xfd   : > { %v515_v16 = vpack.c.bf16 %v495_v13, %v494_v12  ;;  %v516_v17 = vpack.c.bf16 %v497_v15, %v496_v14  ;;  %v498_v18 = vld [vmem:[#allocation2 + $0xd0] sm:$0xff]  ;;  %v499_v19 = vld [vmem:[#allocation2 + $0xd8] sm:$0xff]  ;;  %v500_v20 = vld [vmem:[#allocation2 + $0xe0] sm:$0xff] }
  0xfe   : > { %v501_v21 = vld [vmem:[#allocation2 + $0xe8] sm:$0xff]  ;;  %v517_v22 = vpack.c.bf16 %v499_v19, %v498_v18  ;;  %v502_v24 = vld [vmem:[#allocation2 + $0xf0] sm:$0xff]  ;;  %v503_v25 = vld [vmem:[#allocation2 + $0xf8] sm:$0xff] }
  0xff   : > { %4386 = vmatpush3.bf16.msra.mxu1 %v4866_v36  ;;  %v518_v23 = vpack.c.bf16 %v501_v21, %v500_v20  ;;  %v519_v26 = vpack.c.bf16 %v503_v25, %v502_v24  ;;  %v4873_v27 = vld [vmem:[%s5880_s18 + $0x108] sm:$0xff]   ;;  %v4875_v29 = vld [vmem:[%s5880_s18 + $0x140] sm:$0xff]   ;;  %v4876_v30 = vld [vmem:[%s5880_s18 + $0x110] sm:$0xff]  }
 0x100   : > { %4387 = vmatprep.subr.bf16.mxu1 %v4867_v40  ;;  %v4874_v28 = vld [vmem:[%s5880_s18 + $0xc8] sm:$0xff]   ;;  %4427 = vmatprep.subr.bf16.mxu0 %v4875_v29  ;;  %v4877_v31 = vld [vmem:[%s5880_s18 + $0xd0] sm:$0xff]   ;;  %v4879_v33 = vld [vmem:[%s5880_s18 + $0x118] sm:$0xff]  }
 0x101   : > { %4428 = vmatpush3.bf16.msra.mxu0 %v4875_v29  ;;  %v4878_v32 = vld [vmem:[%s5880_s18 + $0x148] sm:$0xff]   ;;  %v4880_v34 = vld [vmem:[%s5880_s18 + $0xd8] sm:$0xff]   ;;  %v4881_v35 = vld [vmem:[%s5880_s18 + $0x150] sm:$0xff]  }
 0x102   : > { %4429 = vmatprep.subr.bf16.mxu0 %v4878_v32  ;;  %v4882_v36 = vld [vmem:[%s5880_s18 + $0x120] sm:$0xff]   ;;  %v4884_v38 = vld [vmem:[%s5880_s18 + $0x158] sm:$0xff]   ;;  %v4885_v39 = vld [vmem:[%s5880_s18 + $0x128] sm:$0xff]  }
 0x103   : > { %4388 = vmatpush3.bf16.msra.mxu1 %v4867_v40  ;;  %v4883_v37 = vld [vmem:[%s5880_s18 + $0xe0] sm:$0xff]   ;;  %v4886_v40 = vld [vmem:[%s5880_s18 + $0xe8] sm:$0xff]   ;;  %v4891_v45 = vld [vmem:[%s5880_s18 + $0x138] sm:$0xff]  }
 0x104   : > { %4389 = vmatprep.subr.bf16.mxu1 %v4868_v41  ;;  %v4890_v44 = vld [vmem:[%s5880_s18 + $0x168] sm:$0xff]   ;;  %v4892_v46 = vld [vmem:[%s5880_s18 + $0xf8] sm:$0xff]   ;;  %v4893_v47 = vld [vmem:[%s5880_s18 + $0x170] sm:$0xff]  }
 0x105   : > { %4430 = vmatpush3.bf16.msra.mxu0 %v4878_v32  ;;  %v5958_v52 = vld [vmem:[%s335_s1] ss:$0 sm:$0xff] }
 0x106   : > { %4431 = vmatprep.subr.bf16.mxu0 %v4881_v35 }
 0x107   : > { %4390 = vmatpush3.bf16.msra.mxu1 %v4868_v41  ;;  %v4887_v41 = vld [vmem:[%s5880_s18 + $0x160] sm:$0xff]  }
 0x108   : > { %4391 = vmatprep.subr.bf16.mxu1 %v4869_v42 }
 0x109   : > { %4432 = vmatpush3.bf16.msra.mxu0 %v4881_v35 }
 0x10a   : > { %4433 = vmatprep.subr.bf16.mxu0 %v4884_v38 }
 0x10b   : > { %4392 = vmatpush3.bf16.msra.mxu1 %v4869_v42  ;;  %v4888_v42 = vld [vmem:[%s5880_s18 + $0x130] sm:$0xff]  }
 0x10c   : > { %4393 = vmatprep.subr.bf16.mxu1 %v4870_v43 }
 0x10d   : > { %4434 = vmatpush3.bf16.msra.mxu0 %v4884_v38 }
 0x10e   : > { %4435 = vmatprep.subr.bf16.mxu0 %v4887_v41 }
 0x10f   : > { %4394 = vmatpush3.bf16.msra.mxu1 %v4870_v43  ;;  %v4889_v43 = vld [vmem:[%s5880_s18 + $0xf0] sm:$0xff]  }
 0x110   : > { %3971 = vmatprep.subr.bf16.mxu1 %v4871_v48  ;;  %v4894_v48 = vld [vmem:[%s5880_s18 + $0x178] sm:$0xff]  }
 0x111   : > { %4436 = vmatpush3.bf16.msra.mxu0 %v4887_v41 }
 0x112   : > { %4396 = vmatmul.mubr.bf16.vlgmr.msra.gmra.mrb[0].mxu1 %v505_v50  ;;  %4437 = vmatprep.subr.bf16.mxu0 %v4890_v44  ;;  %v4911_v50 = vld [vmem:[%s5880_s18 + $0x1c0] sm:$0xff]  }
 0x113   : > { %4399 = vmatprep.mubr.bf16.mxu1 %v506_v51  ;;  %3972 = vmatpush3.bf16.msra.mxu1 %v4872_v49  ;;  %v4895_v49 = vld [vmem:[%s5880_s18 + $0x40] sm:$0xff]   ;;  %v816_v51 = vlaneseq }
 0x114   : > { %3973 = vmatprep.subr.bf16.mxu1 %v4873_v27 }
 0x115   : > { %4438 = vmatpush3.bf16.msra.mxu0 %v4890_v44  ;;  %v5960_v53 = vshrl.u32 %v816_v51, 7 }
 0x116   : > { %4439 = vmatprep.subr.bf16.mxu0 %v4893_v47 }
 0x117   : > { %3974 = vmatpush3.bf16.msra.mxu1 %v4874_v28  ;;  %v853_v60 = vand.u32 15, %v5960_v53  ;;  %v818_v1 = vadd.s32 8, %v5960_v53  ;;  %v819_v2 = vadd.s32 16, %v5960_v53  ;;  %v821_v8 = vadd.s32 32, %v5960_v53 }
 0x118   : > { %3975 = vmatprep.subr.bf16.mxu1 %v4876_v30  ;;  %v5979_v19 = vadd.s32 40, %v5960_v53  ;;  %v5985_v24 = vadd.s32 48, %v5960_v53  ;;  %v5990_v28 = vadd.s32 56, %v5960_v53  ;;  %v5993_v29 = vadd.s32 64, %v5960_v53 }
 0x119   : > { %4440 = vmatpush3.bf16.msra.mxu0 %v4893_v47  ;;  %vm5971_vm0 = vcmp.ne.s32.totalorder %v853_v60, 0  ;;  %v860_v13 = vand.u32 15, %v818_v1  ;;  %v867_v14 = vand.u32 15, %v819_v2  ;;  %v6031_v60 = vadd.s32 96, %v5960_v53  ;;  %v4912_v2 = vld [vmem:[%s5880_s18 + $0x180] sm:$0xff]  }
 0x11a   : > { %4400 = vmatmul.mubr.bf16.gmra.mrb[4].mxu1 %v507_v56  ;;  %4441 = vmatprep.subr.bf16.mxu0 %v4894_v48  ;;  %v902_v44 = vand.u32 15, %v5990_v28  ;;  %vm6054_vm6 = vmpackc.low %vm7586_vm5, %vm5971_vm0  ;;  %v6094_v32 = vadd.s32 104, %v5960_v53 }
 0x11b   : > { %4403 = vmatprep.mubr.bf16.mxu1 %v508_v57  ;;  %3976 = vmatpush3.bf16.msra.mxu1 %v4877_v31  ;;  %vm5997_vm1 = vcmp.ne.s32.totalorder %v860_v13, 15  ;;  %vm6008_vm3 = vcmp.ne.s32.totalorder %v867_v14, 0  ;;  %v4931_v13 = vld [vmem:[%s5880_s18 + $0xa0] sm:$0xff]  }
 0x11c   : > { %3977 = vmatprep.subr.bf16.mxu1 %v4879_v33  ;;  %v6002_v33 = vadd.s32 72, %v5960_v53  ;;  %vm4980_vm8 = vmpackc.low %vm5997_vm1, %vm7586_vm5  ;;  %vm6072_vm9 = vcmp.ne.s32.totalorder %v902_v44, 15 }
 0x11d   : > { %4442 = vmatpush3.bf16.msra.mxu0 %v4894_v48  ;;  %vm6143_vm14 = vmpackc.low %vm7586_vm5, %vm6008_vm3 }
 0x11e   : > { %4107 = vmatprep.subr.bf16.mxu0 %v4895_v49  ;;  %v916_v49 = vand.u32 15, %v6002_v33  ;;  %v937_v33 = vand.u32 15, %v6031_v60 }
 0x11f   : > { %3978 = vmatpush3.bf16.msra.mxu1 %v4880_v34 }
 0x120   : > { %3979 = vmatprep.subr.bf16.mxu1 %v4882_v36  ;;  %vm6088_vm12 = vcmp.ne.s32.totalorder %v916_v49, 15 }
 0x122   : > { %4404 = vmatmul.mubr.bf16.gmra.mrb[8].mxu1 %v509_v62 }
 0x123   : > { %4407 = vmatprep.mubr.bf16.mxu1 %v510_v63  ;;  %3980 = vmatpush3.bf16.msra.mxu1 %v4883_v37 }
 0x124   : > { %3981 = vmatprep.subr.bf16.mxu1 %v4885_v39 }
 0x127   : > { %3982 = vmatpush3.bf16.msra.mxu1 %v4886_v40  ;;  %v888_v40 = vand.u32 15, %v5979_v19 }
 0x128   : > { %3983 = vmatprep.subr.bf16.mxu1 %v4888_v42 }
 0x129   : > { %vm6064_vm7 = vcmp.ne.s32.totalorder %v888_v40, 15 }
 0x12a   : > { %4408 = vmatmul.mubr.bf16.gmra.mrb[12].mxu1 %v511_v4  ;;  %vm6163_vm0 = vmpackc.low %vm6064_vm7, %vm7586_vm5 }
 0x12b   : > { %4411 = vmatprep.mubr.bf16.mxu1 %v512_v5  ;;  %3984 = vmatpush3.bf16.msra.mxu1 %v4889_v43  ;;  %v820_v5 = vadd.s32 24, %v5960_v53 }
 0x12c   : > { %3985 = vmatprep.subr.bf16.mxu1 %v4891_v45  ;;  %v895_v45 = vand.u32 15, %v5985_v24 }
 0x12d   : > { %v874_v18 = vand.u32 15, %v820_v5 }
 0x12e   : > { %vm6076_vm10 = vcmp.ne.s32.totalorder %v895_v45, 0 }
 0x12f   : > { %3986 = vmatpush3.bf16.msra.mxu1 %v4892_v46  ;;  %vm6004_vm2 = vcmp.ne.s32.totalorder %v874_v18, 15  ;;  %v909_v46 = vand.u32 15, %v5993_v29 }
 0x130   : > { %4243 = vmatprep.subr.bf16.mxu1 %v4911_v50  ;;  %v6022_v50 = vadd.s32 80, %v5960_v53  ;;  %vm6126_vm13 = vmpackc.low %vm6004_vm2, %vm7586_vm5 }
 0x131   : > { %vm6080_vm11 = vcmp.ne.s32.totalorder %v909_v46, 0 }
 0x132   : > { %4412 = vmatmul.mubr.bf16.gmra.mrb[16].mxu1 %v513_v10 }
 0x133   : > { %4415 = vmatprep.mubr.bf16.mxu1 %v514_v11 }
 0x13a   : > { %4416 = vmatmul.mubr.bf16.gmra.mrb[20].mxu1 %v515_v16 }
 0x13b   : > { %4419 = vmatprep.mubr.bf16.mxu1 %v516_v17 }
 0x142   : > { %4420 = vmatmul.mubr.bf16.gmra.mrb[24].mxu1 %v517_v22 }
 0x143   : > { %4423 = vmatprep.mubr.bf16.mxu1 %v518_v23  ;;  %v881_v23 = vand.u32 15, %v821_v8 }
 0x145   : > { %vm6013_vm4 = vcmp.ne.s32.totalorder %v881_v23, 0 }
 0x14a   : > { %4424 = vmatmul.mubr.bf16.gmra.mrb[28].mxu1 %v519_v26 }
 0x1e5   : > { %v4397_v54 = vpop.f32.mrb[0].mxu1 }
 0x1e6   : > { %v634_v55 = vadd.f32 %v4397_v54, %v5958_v52  ;;  %v625_v56 = vpop.f32.mrb[1].mxu1 }
 0x1e7   : > { %v626_v57 = vadd.f32 %v5958_v52, %v625_v56  ;;  %v4398_v58 = vpop.f32.mrb[2].mxu1 }
 0x1e8   : > { %v754_v59 = vmul.f32 0.1, %v634_v55  ;;  %v637_v61 = vadd.f32 %v4398_v58, %v5958_v52  ;;  %v628_v62 = vpop.f32.mrb[3].mxu1 }
 0x1e9   : > { %v752_v63 = vmul.f32 0.1, %v626_v57  ;;  %v629_v0 = vadd.f32 %v5958_v52, %v628_v62 }
 0x1ea   : > { %v786_v3 = vmax.f32 %v634_v55, %v754_v59  ;;  %v755_v4 = vmul.f32 0.1, %v637_v61  ;;  %v6028_v59 = vadd.s32 88, %v5960_v53 }
 0x1eb   : > { %v784_v6 = vmax.f32 %v626_v57, %v752_v63  ;;  %v753_v7 = vmul.f32 0.1, %v629_v0 }
 0x1ec   : > { %1235 = vst [vmem:[#allocation3 + $0x18] sm:$0xff] %v786_v3  ;;  %v787_v9 = vmax.f32 %v637_v61, %v755_v4 }
 0x1ed   : > { %1233 = vst [vmem:[#allocation3 + $0x8] sm:$0xff] %v784_v6  ;;  %v785_v11 = vmax.f32 %v629_v0, %v753_v7  ;;  %v4401_v12 = vpop.f32.mrb[4].mxu1 }
 0x1ee   : > { %1236 = vst [vmem:[#allocation3 + $0x20] sm:$0xff] %v787_v9  ;;  %v5975_v15 = vpack.c.bf16 %v787_v9, %v786_v3  ;;  %v650_v16 = vadd.f32 %v4401_v12, %v5958_v52  ;;  %v641_v17 = vpop.f32.mrb[5].mxu1  ;;  %v4914_v9 = vld [vmem:[%s5880_s18 + $0x1c8] sm:$0xff]  }
 0x1ef   : > { %1234 = vst [vmem:[#allocation3 + $0x10] sm:$0xff] %v785_v11  ;;  %v5981_v20 = vpack.c.bf16 %v785_v11, %v784_v6  ;;  %v642_v21 = vadd.f32 %v5958_v52, %v641_v17  ;;  %v4402_v22 = vpop.f32.mrb[6].mxu1 }
 0x1f0   : > { %1634 = vst [vmem:[#allocation4 + $0x38] sm:$0xff] %v5975_v15  ;;  %v758_v25 = vmul.f32 0.1, %v650_v16  ;;  %v653_v26 = vadd.f32 %v4402_v22, %v5958_v52  ;;  %v644_v27 = vpop.f32.mrb[7].mxu1 }
 0x1f1   : > { %v756_v30 = vmul.f32 0.1, %v642_v21  ;;  %v645_v31 = vadd.f32 %v5958_v52, %v644_v27  ;;  %2005 = vmatprep.mubr.bf16.mxu1 %v5981_v20 }
 0x1f2   : > { %v790_v34 = vmax.f32 %v650_v16, %v758_v25  ;;  %v759_v35 = vmul.f32 0.1, %v653_v26  ;;  %v923_v25 = vand.u32 15, %v6022_v50 }
 0x1f3   : > { %v788_v38 = vmax.f32 %v642_v21, %v756_v30  ;;  %v757_v39 = vmul.f32 0.1, %v645_v31 }
 0x1f4   : > { %v1297_v42 = vld [vmem:[#allocation3 + $0x7] sm:$0xff]  ;;  %1239 = vst [vmem:[#allocation3 + $0x38] sm:$0xff] %v790_v34  ;;  %v791_v43 = vmax.f32 %v653_v26, %v759_v35  ;;  %vm6155_vm15 = vcmp.ne.s32.totalorder %v923_v25, 0 }
 0x1f5   : > { %1237 = vst [vmem:[#allocation3 + $0x28] sm:$0xff] %v788_v38  ;;  %v789_v47 = vmax.f32 %v645_v31, %v757_v39  ;;  %v4405_v48 = vpop.f32.mrb[8].mxu1  ;;  %v6043_v7 = vld [vmem:[#allocation3 + $0x1f] sm:$0xff]  ;;  %v4915_v26 = vld [vmem:[%s5880_s18 + $0x188] sm:$0xff]   ;;  %v930_v31 = vand.u32 15, %v6028_v59 }
 0x1f6   : > { %v1298_v51 = vld [vmem:[#allocation3 + $0xf] sm:$0xff]  ;;  %1240 = vst [vmem:[#allocation3 + $0x40] sm:$0xff] %v791_v43  ;;  %v6024_v54 = vpack.c.bf16 %v791_v43, %v790_v34  ;;  %v666_v55 = vadd.f32 %v4405_v48, %v5958_v52  ;;  %v657_v56 = vpop.f32.mrb[9].mxu1  ;;  %v6038_v1 = vld [vmem:[#allocation3 + $0x17] sm:$0xff]  ;;  %v6102_v43 = vadd.s32 112, %v5960_v53 }
 0x1f7   : > { %v1457_v57 = vld [vmem:[#allocation3 + $0x9] sm:$0xff]  ;;  %v1458_v58 = vld [vmem:[#allocation3 + $0x11] sm:$0xff]  ;;  %1238 = vst [vmem:[#allocation3 + $0x30] sm:$0xff] %v789_v47  ;;  %v6033_v61 = vpack.c.bf16 %v789_v47, %v788_v38  ;;  %v658_v62 = vadd.f32 %v5958_v52, %v657_v56  ;;  %v4406_v63 = vpop.f32.mrb[10].mxu1  ;;  %v1395_v8 = vsel %vm6008_vm3, %v6038_v1, 0.0  ;;  %v6058_v14 = vpack.c.bf16 %v1298_v51, %v1297_v42  ;;  %v1459_v39 = vld [vmem:[#allocation3 + $0x19] sm:$0xff] }
 0x1f8   : > { %v1554_v0 = vsel %vm5997_vm1, %v1458_v58, 0.0  ;;  %1636 = vst [vmem:[#allocation4 + $0x68] sm:$0xff] %v6024_v54  ;;  %v762_v3 = vmul.f32 0.1, %v666_v55  ;;  %v669_v4 = vadd.f32 %v4406_v63, %v5958_v52  ;;  %v660_v5 = vpop.f32.mrb[11].mxu1  ;;  %v1586_v16 = vpack.c.bf16 %v6043_v7, %v1395_v8  ;;  %v4917_v34 = vld [vmem:[%s5880_s18 + $0x1d0] sm:$0xff]   ;;  %vm6222_vm3 = vmpackc.low %vm6072_vm9, %vm7586_vm5 }
 0x1f9   : > { %v1649_v6 = vpack.c.bf16 %v1554_v0, %v1457_v57  ;;  %1635 = vst [vmem:[#allocation4 + $0x50] sm:$0xff] %v6033_v61  ;;  %v760_v11 = vmul.f32 0.1, %v658_v62  ;;  %v661_v12 = vadd.f32 %v5958_v52, %v660_v5  ;;  %4979 = vmatmul.mubr.msk.bf16.vlgmr.msra.gmra.mrb[32].mxu1 %vm6054_vm6, %v6058_v14  ;;  %v4981_v19 = vpack.c.bf16 %v1458_v58, %v1457_v57  ;;  %v4896_v42 = vld [vmem:[%s5880_s18] sm:$0xff]   ;;  %v4897_v59 = vld [vmem:[%s5880_s18 + $0x48] sm:$0xff]   ;;  %v4920_v8 = vld [vmem:[%s5880_s18 + $0x1d8] sm:$0xff]  }
 0x1fa   : > { %v794_v18 = vmax.f32 %v666_v55, %v762_v3  ;;  %v763_v10 = vmul.f32 0.1, %v669_v4  ;;  %2013 = vmatprep.mubr.bf16.mxu1 %v5975_v15  ;;  %1602 = vst [vmem:[#allocation4 + $0x30] sm:$0xff] %v1586_v16  ;;  %4244 = vmatpush3.bf16.msra.mxu1 %v4912_v2  ;;  %v6110_v51 = vadd.s32 120, %v5960_v53  ;;  %v7701_v3 = vmov 0  ;;  %v4898_v16 = vld [vmem:[%s5880_s18 + $0x8] sm:$0xff]  }
 0x1fb   : > { %1665 = vst [vmem:[#allocation4 + $0x28] sm:$0xff] %v1649_v6  ;;  %4982 = vmatprep.mubr.msk.bf16.mxu0 %vm4980_vm8, %v4981_v19  ;;  %v792_v23 = vmax.f32 %v658_v62, %v760_v11  ;;  %v761_v24 = vmul.f32 0.1, %v661_v12  ;;  %4245 = vmatprep.subr.bf16.mxu1 %v4914_v9  ;;  %v4918_v62 = vld [vmem:[%s5880_s18 + $0x190] sm:$0xff]   ;;  %v7702_v3 = vsel %vm6126_vm13, 4294967295, %v7701_v3  ;;  %vm6173_vm1 = vcmp.ne.s32.totalorder %v930_v31, 15 }
 0x1fc   : > { %1243 = vst [vmem:[#allocation3 + $0x58] sm:$0xff] %v794_v18  ;;  %v795_v27 = vmax.f32 %v669_v4, %v763_v10  ;;  %v1460_v28 = vld [vmem:[#allocation3 + $0x21] sm:$0xff]  ;;  %7703 = vst [vmem:[#allocation33_spill] sm:$0xff] %v7702_v3  ;;  %v4899_v19 = vld [vmem:[%s5880_s18 + $0x50] sm:$0xff]  }
 0x1fd   : > { %v6086_v29 = vld [vmem:[#allocation3 + $0x27] sm:$0xff]  ;;  %1241 = vst [vmem:[#allocation3 + $0x48] sm:$0xff] %v792_v23  ;;  %v793_v35 = vmax.f32 %v661_v12, %v761_v24  ;;  %v4409_v38 = vpop.f32.mrb[12].mxu1  ;;  %v1556_v40 = vsel %vm6004_vm2, %v1460_v28, 0.0  ;;  %v6130_v4 = vpack.c.bf16 %v1460_v28, %v1459_v39  ;;  %v6135_v6 = vld [vmem:[#allocation3 + $0x3f] sm:$0xff]  ;;  %v6149_v12 = vpack.c.bf16 %v6043_v7, %v6038_v1  ;;  %v4933_v11 = vld [vmem:[%s5880_s18 + $0xb0] sm:$0xff]  }
 0x1fe   : > { %1244 = vst [vmem:[#allocation3 + $0x60] sm:$0xff] %v795_v27  ;;  %v6104_v44 = vpack.c.bf16 %v795_v27, %v794_v18  ;;  %v682_v45 = vadd.f32 %v4409_v38, %v5958_v52  ;;  %v673_v46 = vpop.f32.mrb[13].mxu1  ;;  %v1650_v47 = vpack.c.bf16 %v1556_v40, %v1459_v39  ;;  %v1461_v48 = vld [vmem:[#allocation3 + $0x29] sm:$0xff]  ;;  %v1462_v49 = vld [vmem:[#allocation3 + $0x31] sm:$0xff]  ;;  %4246 = vmatpush3.bf16.msra.mxu1 %v4915_v26  ;;  %v7709_v1 = vmov 0  ;;  %v4921_v28 = vld [vmem:[%s5880_s18 + $0x198] sm:$0xff]  }
 0x1ff   : > { %v6107_v50 = vld [vmem:[#allocation3 + $0x2f] sm:$0xff]  ;;  %1242 = vst [vmem:[#allocation3 + $0x50] sm:$0xff] %v793_v35  ;;  %v6112_v55 = vpack.c.bf16 %v793_v35, %v792_v23  ;;  %v674_v56 = vadd.f32 %v5958_v52, %v673_v46  ;;  %v4410_v57 = vpop.f32.mrb[14].mxu1  ;;  %v1558_v58 = vsel %vm6064_vm7, %v1462_v49, 0.0  ;;  %v6118_v60 = vld [vmem:[#allocation3 + $0x37] sm:$0xff]  ;;  %7704 = vst [vmem:[#allocation34_spill] sm:$0xff] %v6130_v4  ;;  %4985 = vmatmul.mubr.msk.bf16.vlgmr.msra.gmra.mrb[0].mxu0 %vm6126_vm13, %v6130_v4  ;;  %4247 = vmatprep.subr.bf16.mxu1 %v4917_v34 }
 0x200   : > { %7699 = vst [vmem:[#allocation31_spill] sm:$0xff] %v6104_v44  ;;  %1638 = vst [vmem:[#allocation4 + $0x98] sm:$0xff] %v6104_v44  ;;  %v766_v63 = vmul.f32 0.1, %v682_v45  ;;  %v685_v0 = vadd.f32 %v4410_v57, %v5958_v52  ;;  %v676_v2 = vpop.f32.mrb[15].mxu1  ;;  %v1651_v5 = vpack.c.bf16 %v1558_v58, %v1461_v48  ;;  %4108 = vmatpush3.bf16.msra.mxu0 %v4896_v42  ;;  %v7710_v1 = vsel %vm6163_vm0, 4294967295, %v7709_v1 }
 0x201   : > { %7700 = vst [vmem:[#allocation32_spill] sm:$0xff] %v6112_v55  ;;  %1666 = vst [vmem:[#allocation4 + $0x40] sm:$0xff] %v1650_v47  ;;  %v764_v9 = vmul.f32 0.1, %v674_v56  ;;  %v677_v36 = vadd.f32 %v5958_v52, %v676_v2  ;;  %4988 = vmatmul.mubr.msk.bf16.gmra.mrb[36].mxu1 %vm6143_vm14, %v6149_v12  ;;  %v6167_v7 = vpack.c.bf16 %v1462_v49, %v1461_v48  ;;  %v944_v24 = vand.u32 15, %v6094_v32  ;;  %v4922_v39 = vld [vmem:[%s5880_s18 + $0x1e0] sm:$0xff]  }
 0x202   : > { %1637 = vst [vmem:[#allocation4 + $0x80] sm:$0xff] %v6112_v55  ;;  %v798_v10 = vmax.f32 %v682_v45, %v766_v63  ;;  %v767_v37 = vmul.f32 0.1, %v685_v0  ;;  %2021 = vmatprep.mubr.bf16.mxu1 %v6033_v61  ;;  %1667 = vst [vmem:[#allocation4 + $0x58] sm:$0xff] %v1651_v5  ;;  %4109 = vmatprep.subr.bf16.mxu0 %v4897_v59  ;;  %vm6178_vm2 = vcmp.ne.s32.totalorder %v937_v33, 0  ;;  %v951_v27 = vand.u32 15, %v6102_v43 }
 0x203   : > { %7711 = vst [vmem:[#allocation35_spill] sm:$0xff] %v7710_v1  ;;  %7712 = vst [vmem:[#allocation36_spill] sm:$0xff] %v6167_v7  ;;  %4991 = vmatprep.mubr.msk.bf16.mxu0 %vm6163_vm0, %v6167_v7  ;;  %v796_v25 = vmax.f32 %v674_v56, %v764_v9  ;;  %v765_v17 = vmul.f32 0.1, %v677_v36  ;;  %4248 = vmatpush3.bf16.msra.mxu1 %v4918_v62  ;;  %v958_v35 = vand.u32 15, %v6110_v51  ;;  %v6188_v32 = vadd.s32 136, %v5960_v53 }
 0x204   : > { %1247 = vst [vmem:[#allocation3 + $0x78] sm:$0xff] %v798_v10  ;;  %v799_v31 = vmax.f32 %v685_v0, %v767_v37  ;;  %v1464_v34 = vld [vmem:[#allocation3 + $0x41] sm:$0xff]  ;;  %v6191_v33 = vadd.s32 128, %v5960_v53  ;;  %4249 = vmatprep.subr.bf16.mxu1 %v4920_v8  ;;  %v1463_v45 = vld [vmem:[#allocation3 + $0x39] sm:$0xff]  ;;  %4110 = vmatpush3.bf16.msra.mxu0 %v4898_v16  ;;  %v6198_v48 = vadd.s32 144, %v5960_v53  ;;  %v6206_v0 = vadd.s32 152, %v5960_v53  ;;  %vm6239_vm7 = vmpackc.low %vm7586_vm5, %vm6013_vm4 }
 0x205   : > { %v6185_v38 = vld [vmem:[#allocation3 + $0x47] sm:$0xff]  ;;  %1245 = vst [vmem:[#allocation3 + $0x68] sm:$0xff] %v796_v25  ;;  %v797_v40 = vmax.f32 %v677_v36, %v765_v17  ;;  %v4413_v42 = vpop.f32.mrb[16].mxu1  ;;  %v1560_v46 = vsel %vm6072_vm9, %v1464_v34, 0.0  ;;  %v4900_v47 = vld [vmem:[%s5880_s18 + $0x10] sm:$0xff]   ;;  %4111 = vmatprep.subr.bf16.mxu0 %v4899_v19  ;;  %v4901_v36 = vld [vmem:[%s5880_s18 + $0x58] sm:$0xff]  }
 0x206   : > { %1248 = vst [vmem:[#allocation3 + $0x80] sm:$0xff] %v799_v31  ;;  %v6200_v49 = vpack.c.bf16 %v799_v31, %v798_v10  ;;  %v698_v56 = vadd.f32 %v4413_v42, %v5958_v52  ;;  %v689_v57 = vpop.f32.mrb[17].mxu1  ;;  %v1652_v58 = vpack.c.bf16 %v1560_v46, %v1463_v45  ;;  %v1465_v59 = vld [vmem:[#allocation3 + $0x49] sm:$0xff]  ;;  %v1466_v62 = vld [vmem:[#allocation3 + $0x51] sm:$0xff]  ;;  %v6226_v31 = vpack.c.bf16 %v1464_v34, %v1463_v45  ;;  %vm6259_vm4 = vmpackc.low %vm6088_vm12, %vm7586_vm5 }
 0x207   : > { %v6203_v63 = vld [vmem:[#allocation3 + $0x4f] sm:$0xff]  ;;  %1246 = vst [vmem:[#allocation3 + $0x70] sm:$0xff] %v797_v40  ;;  %v6208_v2 = vpack.c.bf16 %v797_v40, %v796_v25  ;;  %v690_v5 = vadd.f32 %v5958_v52, %v689_v57  ;;  %v4414_v8 = vpop.f32.mrb[18].mxu1  ;;  %v1562_v9 = vsel %vm6088_vm12, %v1466_v62, 0.0  ;;  %v6214_v16 = vld [vmem:[#allocation3 + $0x57] sm:$0xff]  ;;  %4250 = vmatpush3.bf16.msra.mxu1 %v4921_v28  ;;  %v4923_v10 = vld [vmem:[%s5880_s18 + $0x1a0] sm:$0xff]   ;;  %v6245_v45 = vpack.c.bf16 %v6107_v50, %v6086_v29 }
 0x208   : > { %1640 = vst [vmem:[#allocation4 + $0xc8] sm:$0xff] %v6200_v49  ;;  %v770_v37 = vmul.f32 0.1, %v698_v56  ;;  %v701_v19 = vadd.f32 %v4414_v8, %v5958_v52  ;;  %v692_v17 = vpop.f32.mrb[19].mxu1  ;;  %1668 = vst [vmem:[#allocation4 + $0x70] sm:$0xff] %v1652_v58  ;;  %v7718_v25 = vmov 0  ;;  %4994 = vmatmul.mubr.msk.bf16.gmra.mrb[4].mxu0 %vm6222_vm3, %v6226_v31  ;;  %v1653_v28 = vpack.c.bf16 %v1562_v9, %v1465_v59  ;;  %4251 = vmatprep.subr.bf16.mxu1 %v4922_v39 }
 0x209   : > { %7717 = vst [vmem:[#allocation37_spill] sm:$0xff] %v6208_v2  ;;  %v7719_v25 = vsel %vm6222_vm3, 4294967295, %v7718_v25  ;;  %7721 = vst [vmem:[#allocation39_spill] sm:$0xff] %v6226_v31  ;;  %v6231_v40 = vld [vmem:[#allocation3 + $0x5f] sm:$0xff]  ;;  %v4924_v42 = vld [vmem:[%s5880_s18 + $0x1e8] sm:$0xff]   ;;  %v693_v46 = vadd.f32 %v5958_v52, %v692_v17  ;;  %4997 = vmatmul.mubr.msk.bf16.gmra.mrb[40].mxu1 %vm6239_vm7, %v6245_v45  ;;  %4112 = vmatpush3.bf16.msra.mxu0 %v4900_v47  ;;  %vm6250_vm8 = vcmp.ne.s32.totalorder %v944_v24, 15 }
 0x20a   : > { %7720 = vst [vmem:[#allocation38_spill] sm:$0xff] %v7719_v25  ;;  %1639 = vst [vmem:[#allocation4 + $0xb0] sm:$0xff] %v6208_v2  ;;  %v768_v21 = vmul.f32 0.1, %v690_v5  ;;  %v4902_v57 = vld [vmem:[%s5880_s18 + $0x18] sm:$0xff]   ;;  %v802_v41 = vmax.f32 %v698_v56, %v770_v37  ;;  %2029 = vmatprep.mubr.bf16.mxu1 %v6024_v54  ;;  %v7726_v29 = vmov 0  ;;  %v6263_v50 = vpack.c.bf16 %v1466_v62, %v1465_v59  ;;  %4113 = vmatprep.subr.bf16.mxu0 %v4901_v36 }
 0x20b   : > { %v771_v58 = vmul.f32 0.1, %v701_v19  ;;  %1669 = vst [vmem:[#allocation4 + $0x88] sm:$0xff] %v1653_v28  ;;  %v7727_v29 = vsel %vm6259_vm4, 4294967295, %v7726_v29  ;;  %v4903_v24 = vld [vmem:[%s5880_s18 + $0x60] sm:$0xff]   ;;  %vm6271_vm9 = vcmp.ne.s32.totalorder %v951_v27, 0  ;;  %4252 = vmatpush3.bf16.msra.mxu1 %v4923_v10 }
 0x20c   : > { %7728 = vst [vmem:[#allocation40_spill] sm:$0xff] %v7727_v29  ;;  %7729 = vst [vmem:[#allocation41_spill] sm:$0xff] %v6263_v50  ;;  %5000 = vmatprep.mubr.msk.bf16.mxu0 %vm6259_vm4, %v6263_v50  ;;  %v800_v30 = vmax.f32 %v690_v5, %v768_v21  ;;  %v769_v8 = vmul.f32 0.1, %v693_v46  ;;  %vm6278_vm12 = vcmp.ne.s32.totalorder %v958_v35, 15  ;;  %v4925_v43 = vld [vmem:[%s5880_s18 + $0x1a8] sm:$0xff]   ;;  %4253 = vmatprep.subr.bf16.mxu1 %v4924_v42 }
 0x20d   : > { %1251 = vst [vmem:[#allocation3 + $0x98] sm:$0xff] %v802_v41  ;;  %v803_v27 = vmax.f32 %v701_v19, %v771_v58  ;;  %v1468_v9 = vld [vmem:[#allocation3 + $0x61] sm:$0xff]  ;;  %v6289_v51 = vadd.s32 160, %v5960_v53  ;;  %v4927_v35 = vld [vmem:[%s5880_s18 + $0x1f0] sm:$0xff]   ;;  %v4417_v28 = vpop.f32.mrb[20].mxu1  ;;  %4114 = vmatpush3.bf16.msra.mxu0 %v4902_v57  ;;  %v6296_v58 = vadd.s32 168, %v5960_v53  ;;  %vm6320_vm4 = vmpackc.low %vm6173_vm1, %vm7586_vm5 }
 0x20e   : > { %v6285_v17 = vld [vmem:[#allocation3 + $0x67] sm:$0xff]  ;;  %1249 = vst [vmem:[#allocation3 + $0x88] sm:$0xff] %v800_v30  ;;  %v801_v36 = vmax.f32 %v693_v46, %v769_v8  ;;  %v1467_v10 = vld [vmem:[#allocation3 + $0x59] sm:$0xff]  ;;  %v1564_v21 = vsel %vm6173_vm1, %v1468_v9, 0.0  ;;  %v714_v5 = vadd.f32 %v4417_v28, %v5958_v52  ;;  %v705_v42 = vpop.f32.mrb[21].mxu1  ;;  %v1470_v8 = vld [vmem:[#allocation3 + $0x71] sm:$0xff]  ;;  %4115 = vmatprep.subr.bf16.mxu0 %v4903_v24 }
 0x20f   : > { %v4904_v19 = vld [vmem:[%s5880_s18 + $0x20] sm:$0xff]   ;;  %1252 = vst [vmem:[#allocation3 + $0xa0] sm:$0xff] %v803_v27  ;;  %v6298_v37 = vpack.c.bf16 %v803_v27, %v802_v41  ;;  %v1654_v62 = vpack.c.bf16 %v1564_v21, %v1467_v10  ;;  %v6301_v56 = vld [vmem:[#allocation3 + $0x6f] sm:$0xff]  ;;  %v6304_v57 = vadd.s32 176, %v5960_v53  ;;  %v706_v50 = vadd.f32 %v5958_v52, %v705_v42  ;;  %v4418_v41 = vpop.f32.mrb[22].mxu1  ;;  %v6312_v21 = vld [vmem:[#allocation3 + $0x77] sm:$0xff]  ;;  %4254 = vmatpush3.bf16.msra.mxu1 %v4925_v43 }
 0x210   : > { %v1469_v46 = vld [vmem:[#allocation3 + $0x69] sm:$0xff]  ;;  %1250 = vst [vmem:[#allocation3 + $0x90] sm:$0xff] %v801_v36  ;;  %v6306_v29 = vpack.c.bf16 %v801_v36, %v800_v30  ;;  %v1566_v27 = vsel %vm6250_vm8, %v1470_v8, 0.0  ;;  %v4928_v24 = vld [vmem:[%s5880_s18 + $0x1b0] sm:$0xff]   ;;  %v774_v25 = vmul.f32 0.1, %v714_v5  ;;  %v717_v31 = vadd.f32 %v4418_v41, %v5958_v52  ;;  %4255 = vmatprep.subr.bf16.mxu1 %v4927_v35  ;;  %vm6337_vm1 = vmpackc.low %vm7586_vm5, %vm6076_vm10 }
 0x211   : > { %v4905_v28 = vld [vmem:[%s5880_s18 + $0x68] sm:$0xff]   ;;  %1642 = vst [vmem:[#allocation4 + $0xf8] sm:$0xff] %v6298_v37  ;;  %v708_v1 = vpop.f32.mrb[23].mxu1  ;;  %1670 = vst [vmem:[#allocation4 + $0xa0] sm:$0xff] %v1654_v62  ;;  %v7734_v30 = vmov 0  ;;  %v6324_v36 = vpack.c.bf16 %v1468_v9, %v1467_v10  ;;  %v1655_v43 = vpack.c.bf16 %v1566_v27, %v1469_v46  ;;  %v6329_v42 = vld [vmem:[#allocation3 + $0x7f] sm:$0xff]  ;;  %v6343_v10 = vpack.c.bf16 %v6135_v6, %v6118_v60  ;;  %4116 = vmatpush3.bf16.msra.mxu0 %v4904_v19 }
 0x212   : > { %v7735_v30 = vsel %vm6320_vm4, 4294967295, %v7734_v30  ;;  %v4929_v41 = vld [vmem:[%s5880_s18 + $0x1f8] sm:$0xff]   ;;  %1641 = vst [vmem:[#allocation4 + $0xe0] sm:$0xff] %v6306_v29  ;;  %v772_v62 = vmul.f32 0.1, %v706_v50  ;;  %v709_v23 = vadd.f32 %v5958_v52, %v708_v1  ;;  %v7738_v9 = vmov 0  ;;  %vm6359_vm10 = vmpackc.low %vm6250_vm8, %vm7586_vm5  ;;  %4117 = vmatprep.subr.bf16.mxu0 %v4905_v28 }
 0x213   : > { %7736 = vst [vmem:[#allocation42_spill] sm:$0xff] %v7735_v30  ;;  %7737 = vst [vmem:[#allocation43_spill] sm:$0xff] %v6324_v36  ;;  %5003 = vmatmul.mubr.msk.bf16.gmra.mrb[8].mxu0 %vm6320_vm4, %v6324_v36  ;;  %v7739_v9 = vsel %vm6337_vm1, 4294967295, %v7738_v9  ;;  %5006 = vmatmul.mubr.msk.bf16.gmra.mrb[44].mxu1 %vm6337_vm1, %v6343_v10  ;;  %v4906_v35 = vld [vmem:[%s5880_s18 + $0x28] sm:$0xff]   ;;  %v7741_v1 = vand.u32 15, %v6191_v33  ;;  %v806_v27 = vmax.f32 %v714_v5, %v774_v25  ;;  %v7744_v60 = vmov 0 }
 0x214   : > { %7740 = vst [vmem:[#allocation44_spill] sm:$0xff] %v7739_v9  ;;  %v775_v30 = vmul.f32 0.1, %v717_v31  ;;  %2037 = vmatprep.mubr.bf16.mxu1 %v6112_v55  ;;  %1671 = vst [vmem:[#allocation4 + $0xb8] sm:$0xff] %v1655_v43  ;;  %v7745_v60 = vsel %vm6359_vm10, 4294967295, %v7744_v60  ;;  %v6363_v6 = vpack.c.bf16 %v1470_v8, %v1469_v46  ;;  %v7748_v33 = vand.u32 15, %v6188_v32  ;;  %4256 = vmatpush3.bf16.msra.mxu1 %v4928_v24 }
 0x215   : > { %vm6351_vm4 = vcmp.ne.s32.totalorder %v7741_v1, 0  ;;  %7746 = vst [vmem:[#allocation45_spill] sm:$0xff] %v7745_v60  ;;  %v6375_v5 = vadd.s32 184, %v5960_v53  ;;  %v4907_v39 = vld [vmem:[%s5880_s18 + $0x70] sm:$0xff]   ;;  %v804_v19 = vmax.f32 %v706_v50, %v772_v62  ;;  %v773_v43 = vmul.f32 0.1, %v709_v23  ;;  %4257 = vmatprep.subr.bf16.mxu1 %v4929_v41  ;;  %4118 = vmatpush3.bf16.msra.mxu0 %v4906_v35 }
 0x216   : > { %7747 = vst [vmem:[#allocation46_spill] sm:$0xff] %v6363_v6  ;;  %5009 = vmatprep.mubr.msk.bf16.mxu0 %vm6359_vm10, %v6363_v6  ;;  %vm6370_vm3 = vcmp.ne.s32.totalorder %v7748_v33, 15  ;;  %v7751_v46 = vand.u32 15, %v6198_v48  ;;  %v4930_v32 = vld [vmem:[%s5880_s18 + $0x1b8] sm:$0xff]   ;;  %1255 = vst [vmem:[#allocation3 + $0xb8] sm:$0xff] %v806_v27  ;;  %v807_v33 = vmax.f32 %v717_v31, %v775_v30  ;;  %v7754_v6 = vand.u32 15, %v6206_v0  ;;  %4119 = vmatprep.subr.bf16.mxu0 %v4907_v39 }
 0x217   : > { %v1472_v60 = vld [vmem:[#allocation3 + $0x81] sm:$0xff]  ;;  %v1000_v48 = vand.u32 15, %v6296_v58  ;;  %1253 = vst [vmem:[#allocation3 + $0xa8] sm:$0xff] %v804_v19  ;;  %v805_v24 = vmax.f32 %v709_v23, %v773_v43  ;;  %v1471_v1 = vld [vmem:[#allocation3 + $0x79] sm:$0xff]  ;;  %v6400_v30 = vadd.s32 192, %v5960_v53  ;;  %v1473_v36 = vld [vmem:[#allocation3 + $0x89] sm:$0xff] }
 0x218   : > { %vm6380_vm8 = vcmp.ne.s32.totalorder %v7751_v46, 0  ;;  %vm6388_vm5 = vcmp.ne.s32.totalorder %v7754_v6, 15  ;;  %v6393_v28 = vld [vmem:[#allocation3 + $0x87] sm:$0xff]  ;;  %v4421_v46 = vpop.f32.mrb[24].mxu1  ;;  %v1568_v31 = vsel %vm6278_vm12, %v1472_v60, 0.0  ;;  %v4908_v0 = vld [vmem:[%s5880_s18 + $0x30] sm:$0xff]   ;;  %v6402_v58 = vpack.c.bf16 %v807_v33, %v806_v27  ;;  %4258 = vmatpush3.bf16.msra.mxu1 %v4930_v32 }
 0x219   : > { %1256 = vst [vmem:[#allocation3 + $0xc0] sm:$0xff] %v807_v33  ;;  %v730_v6 = vadd.f32 %v4421_v46, %v5958_v52  ;;  %v721_v62 = vpop.f32.mrb[25].mxu1  ;;  %v1656_v41 = vpack.c.bf16 %v1568_v31, %v1471_v1  ;;  %v1474_v23 = vld [vmem:[#allocation3 + $0x91] sm:$0xff]  ;;  %v1014_v43 = vand.u32 15, %v6375_v5  ;;  %1254 = vst [vmem:[#allocation3 + $0xb0] sm:$0xff] %v805_v24  ;;  %v6408_v35 = vpack.c.bf16 %v805_v24, %v804_v19  ;;  %v4909_v33 = vld [vmem:[%s5880_s18 + $0x78] sm:$0xff]  }
 0x21a   : > { %v6406_v7 = vld [vmem:[#allocation3 + $0x8f] sm:$0xff]  ;;  %v722_v3 = vadd.f32 %v5958_v52, %v721_v62  ;;  %v4422_v4 = vpop.f32.mrb[26].mxu1  ;;  %v1570_v27 = vsel %vm6370_vm3, %v1474_v23, 0.0  ;;  %v6414_v46 = vld [vmem:[#allocation3 + $0x97] sm:$0xff]  ;;  %1644 = vst [vmem:[#allocation4 + $0x128] sm:$0xff] %v6402_v58  ;;  %vm7757_vm10 = vmmov 1   ;;  %v6425_v62 = vpack.c.bf16 %v1472_v60, %v1471_v1  ;;  %4120 = vmatpush3.bf16.msra.mxu0 %v4908_v0 }
 0x21b   : > { %v778_v31 = vmul.f32 0.1, %v730_v6  ;;  %v733_v5 = vadd.f32 %v4422_v4, %v5958_v52  ;;  %v724_v39 = vpop.f32.mrb[27].mxu1  ;;  %1672 = vst [vmem:[#allocation4 + $0xd0] sm:$0xff] %v1656_v41  ;;  %vm6421_vm0 = vmpackc.low %vm6278_vm12, %vm7757_vm10  ;;  %v7758_v19 = vmov 0  ;;  %v1657_v32 = vpack.c.bf16 %v1570_v27, %v1473_v36  ;;  %v6430_v24 = vld [vmem:[#allocation3 + $0x9f] sm:$0xff]  ;;  %4121 = vmatprep.subr.bf16.mxu0 %v4909_v33 }
 0x21c   : > { %v7759_v19 = vsel %vm6421_vm0, 4294967295, %v7758_v19  ;;  %7761 = vst [vmem:[#allocation48_spill] sm:$0xff] %v6425_v62  ;;  %5012 = vmatmul.mubr.msk.bf16.gmra.mrb[12].mxu0 %vm6421_vm0, %v6425_v62  ;;  %1643 = vst [vmem:[#allocation4 + $0x110] sm:$0xff] %v6408_v35  ;;  %v776_v4 = vmul.f32 0.1, %v722_v3  ;;  %v725_v41 = vadd.f32 %v5958_v52, %v724_v39  ;;  %v7762_v59 = vmov 0 }
 0x21d   : > { %7760 = vst [vmem:[#allocation47_spill] sm:$0xff] %v7759_v19  ;;  %vm6437_vm12 = vmpackc.low %vm7757_vm10, %vm6080_vm11  ;;  %v6443_v60 = vpack.c.bf16 %v6203_v63, %v6185_v38  ;;  %v6449_v1 = vadd.s32 200, %v5960_v53  ;;  %v4910_v27 = vld [vmem:[%s5880_s18 + $0x38] sm:$0xff]   ;;  %v810_v39 = vmax.f32 %v730_v6, %v778_v31  ;;  %v779_v15 = vmul.f32 0.1, %v733_v5  ;;  %v6466_v0 = vld [vmem:[%s5880_s18 + $0x80] sm:$0xff]  }
 0x21e   : > { %v7763_v59 = vsel %vm6437_vm12, 4294967295, %v7762_v59  ;;  %1673 = vst [vmem:[#allocation4 + $0xe8] sm:$0xff] %v1657_v32  ;;  %vm6456_vm11 = vmpackc.low %vm6370_vm3, %vm7757_vm10  ;;  %v7766_v38 = vmov 0  ;;  %v6460_v63 = vpack.c.bf16 %v1474_v23, %v1473_v36  ;;  %v7770_v6 = vand.u32 15, %v6289_v51  ;;  %v6485_v51 = vld [vmem:[#allocation3 + $0xa7] sm:$0xff]  ;;  %v4425_v33 = vpop.f32.mrb[28].mxu1  ;;  %4122 = vmatpush3.bf16.msra.mxu0 %v4910_v27 }
 0x21f   : > { %7764 = vst [vmem:[#allocation49_spill] sm:$0xff] %v7763_v59  ;;  %7765 = vst [vmem:[#allocation50_spill] sm:$0xff] %v6443_v60  ;;  %5015 = vmatmul.mubr.msk.bf16.gmra.mrb[48].mxu1 %vm6437_vm12, %v6443_v60  ;;  %v7767_v38 = vsel %vm6456_vm11, 4294967295, %v7766_v38  ;;  %v6475_v25 = vadd.s32 208, %v5960_v53  ;;  %v808_v32 = vmax.f32 %v722_v3, %v776_v4  ;;  %v777_v19 = vmul.f32 0.1, %v725_v41  ;;  %4475 = vmatprep.subr.bf16.mxu0 %v6466_v0 }
 0x220   : > { %2045 = vmatprep.mubr.bf16.mxu1 %v6104_v44  ;;  %7768 = vst [vmem:[#allocation51_spill] sm:$0xff] %v7767_v38  ;;  %7769 = vst [vmem:[#allocation52_spill] sm:$0xff] %v6460_v63  ;;  %5018 = vmatprep.mubr.msk.bf16.mxu0 %vm6456_vm11, %v6460_v63  ;;  %vm6470_vm0 = vcmp.ne.s32.totalorder %v7770_v6, 0  ;;  %vm6477_vm3 = vcmp.ne.s32.totalorder %v1000_v48, 15  ;;  %v811_v23 = vmax.f32 %v733_v5, %v779_v15  ;;  %v1476_v38 = vld [vmem:[#allocation3 + $0xa1] sm:$0xff]  ;;  %vm6481_vm11 = vcmp.ne.s32.totalorder %v1014_v43, 15 }
 0x221   : > { %1259 = vst [vmem:[#allocation3 + $0xd8] sm:$0xff] %v810_v39  ;;  %v7777_v6 = vand.u32 15, %v6304_v57  ;;  %v1021_v3 = vand.u32 15, %v6400_v30  ;;  %1257 = vst [vmem:[#allocation3 + $0xc8] sm:$0xff] %v808_v32  ;;  %v809_v48 = vmax.f32 %v725_v41, %v777_v19  ;;  %v1475_v4 = vld [vmem:[#allocation3 + $0x99] sm:$0xff]  ;;  %v1572_v43 = vsel %vm6388_vm5, %v1476_v38, 0.0 }
 0x222   : > { %v1028_v5 = vand.u32 15, %v6449_v1  ;;  %1260 = vst [vmem:[#allocation3 + $0xe0] sm:$0xff] %v811_v23  ;;  %v6497_v15 = vpack.c.bf16 %v811_v23, %v810_v39  ;;  %v746_v57 = vadd.f32 %v4425_v33, %v5958_v52  ;;  %v1658_v44 = vpack.c.bf16 %v1572_v43, %v1475_v4  ;;  %v1477_v59 = vld [vmem:[#allocation3 + $0xa9] sm:$0xff]  ;;  %v1478_v60 = vld [vmem:[#allocation3 + $0xb1] sm:$0xff]  ;;  %vm6516_vm12 = vmpackc.low %vm6388_vm5, %vm7757_vm10 }
 0x223   : > { %vm6489_vm13 = vcmp.ne.s32.totalorder %v7777_v6, 0  ;;  %v737_v6 = vpop.f32.mrb[29].mxu1  ;;  %v6501_v30 = vld [vmem:[#allocation3 + $0xaf] sm:$0xff]  ;;  %v1035_v19 = vand.u32 15, %v6475_v25  ;;  %1258 = vst [vmem:[#allocation3 + $0xd0] sm:$0xff] %v809_v48  ;;  %v6504_v41 = vpack.c.bf16 %v809_v48, %v808_v32  ;;  %v1574_v39 = vsel %vm6477_vm3, %v1478_v60, 0.0  ;;  %vm6532_vm5 = vmpackc.low %vm7757_vm10, %vm6155_vm15 }
 0x224   : > { %v738_v1 = vadd.f32 %v5958_v52, %v737_v6  ;;  %v4426_v27 = vpop.f32.mrb[30].mxu1  ;;  %v6509_v23 = vld [vmem:[#allocation3 + $0xb7] sm:$0xff]  ;;  %1646 = vst [vmem:[#allocation4 + $0x158] sm:$0xff] %v6497_v15  ;;  %v782_v33 = vmul.f32 0.1, %v746_v57  ;;  %1674 = vst [vmem:[#allocation4 + $0x100] sm:$0xff] %v1658_v44  ;;  %v6520_v32 = vpack.c.bf16 %v1476_v38, %v1475_v4  ;;  %v1659_v48 = vpack.c.bf16 %v1574_v39, %v1477_v59 }
 0x225   : > { %v749_v43 = vadd.f32 %v4426_v27, %v5958_v52  ;;  %v740_v55 = vpop.f32.mrb[31].mxu1  ;;  %v7780_v25 = vmov 0  ;;  %v6525_v6 = vld [vmem:[#allocation3 + $0xbf] sm:$0xff]  ;;  %1645 = vst [vmem:[#allocation4 + $0x140] sm:$0xff] %v6504_v41  ;;  %v7784_v50 = vmov 0  ;;  %v6538_v38 = vpack.c.bf16 %v6231_v40, %v6214_v16  ;;  %vm6551_vm15 = vmpackc.low %vm6477_vm3, %vm7757_vm10  ;;  %v2774_v34 = vld [vmem:[#allocation4 + $0x98] sm:$0xff] }
 0x226   : > { %v7781_v25 = vsel %vm6516_vm12, 4294967295, %v7780_v25  ;;  %7783 = vst [vmem:[#allocation54_spill] sm:$0xff] %v6520_v32  ;;  %5021 = vmatmul.mubr.msk.bf16.gmra.mrb[16].mxu0 %vm6516_vm12, %v6520_v32  ;;  %v780_v27 = vmul.f32 0.1, %v738_v1  ;;  %v741_v44 = vadd.f32 %v5958_v52, %v740_v55  ;;  %v7785_v50 = vsel %vm6532_vm5, 4294967295, %v7784_v50  ;;  %1675 = vst [vmem:[#allocation4 + $0x118] sm:$0xff] %v1659_v48 }
 0x227   : > { %7782 = vst [vmem:[#allocation53_spill] sm:$0xff] %v7781_v25  ;;  %7786 = vst [vmem:[#allocation55_spill] sm:$0xff] %v7785_v50  ;;  %5024 = vmatmul.mubr.msk.bf16.gmra.mrb[52].mxu1 %vm6532_vm5, %v6538_v38  ;;  %vm6543_vm12 = vcmp.ne.s32.totalorder %v1021_v3, 0  ;;  %v814_v52 = vmax.f32 %v746_v57, %v782_v33  ;;  %v783_v55 = vmul.f32 0.1, %v749_v43  ;;  %v7790_v18 = vmov 0 }
 0x228   : > { %7787 = vst [vmem:[#allocation56_spill] sm:$0xff] %v6538_v38  ;;  %2053 = vmatprep.mubr.bf16.mxu1 %v6208_v2  ;;  %v7791_v18 = vsel %vm6551_vm15, 4294967295, %v7790_v18  ;;  %v6555_v16 = vpack.c.bf16 %v1478_v60, %v1477_v59  ;;  %v844_v40 = vadd.s32 216, %v5960_v53  ;;  %v845_v3 = vadd.s32 224, %v5960_v53  ;;  %v1480_v48 = vld [vmem:[#allocation3 + $0xc1] sm:$0xff]  ;;  %vm6591_vm5 = vmpackc.low %vm6481_vm11, %vm7757_vm10  ;;  %v7873_v62 = vld [vmem:[#allocation48_spill] sm:$0xff] }
 0x229   : > { %7792 = vst [vmem:[#allocation57_spill] sm:$0xff] %v7791_v18  ;;  %v812_v57 = vmax.f32 %v738_v1, %v780_v27  ;;  %v781_v39 = vmul.f32 0.1, %v741_v44  ;;  %v848_v33 = vadd.s32 248, %v5960_v53  ;;  %1263 = vst [vmem:[#allocation3 + $0xf8] sm:$0xff] %v814_v52  ;;  %v815_v36 = vmax.f32 %v749_v43, %v783_v55  ;;  %v6568_v60 = vld [vmem:[#allocation3 + $0xc7] sm:$0xff] }
 0x22a   : > { %7793 = vst [vmem:[#allocation58_spill] sm:$0xff] %v6555_v16  ;;  %5027 = vmatprep.mubr.msk.bf16.mxu0 %vm6551_vm15, %v6555_v16  ;;  %vm6563_vm3 = vcmp.ne.s32.totalorder %v1028_v5, 15  ;;  %v846_v59 = vadd.s32 232, %v5960_v53  ;;  %vm6570_vm15 = vcmp.ne.s32.totalorder %v1035_v19, 0  ;;  %v7796_v18 = vmov 0  ;;  %v1479_v27 = vld [vmem:[#allocation3 + $0xb9] sm:$0xff] }
 0x22b   : > { %v7797_v18 = vsel %vm6570_vm15, 4294967295, %v7796_v18  ;;  %1261 = vst [vmem:[#allocation3 + $0xe8] sm:$0xff] %v812_v57  ;;  %v813_v1 = vmax.f32 %v741_v44, %v781_v39  ;;  %v1576_v16 = vsel %vm6481_vm11, %v1480_v48, 0.0  ;;  %v847_v43 = vadd.s32 240, %v5960_v53  ;;  %1264 = vst [vmem:[#allocation3 + $0x100] sm:$0xff] %v815_v36  ;;  %v1481_v32 = vld [vmem:[#allocation3 + $0xc9] sm:$0xff] }
 0x22c   : > { %7798 = vst [vmem:[#allocation59_spill] sm:$0xff] %v7797_v18  ;;  %v6577_v5 = vpack.c.bf16 %v815_v36, %v814_v52  ;;  %v1660_v55 = vpack.c.bf16 %v1576_v16, %v1479_v27  ;;  %v1482_v2 = vld [vmem:[#allocation3 + $0xd1] sm:$0xff]  ;;  %v1042_v50 = vand.u32 15, %v844_v40  ;;  %v1049_v19 = vand.u32 15, %v845_v3  ;;  %v6600_v3 = vld [vmem:[#allocation3 + $0xdf] sm:$0xff]  ;;  %vm6605_vm15 = vmpackc.low %vm7757_vm10, %vm6178_vm2 }
 0x22d   : > { %v6579_v38 = vld [vmem:[#allocation3 + $0xcf] sm:$0xff]  ;;  %1262 = vst [vmem:[#allocation3 + $0xf0] sm:$0xff] %v813_v1  ;;  %v6581_v18 = vpack.c.bf16 %v813_v1, %v812_v57  ;;  %v1578_v44 = vsel %vm6563_vm3, %v1482_v2, 0.0  ;;  %v1070_v39 = vand.u32 15, %v848_v33  ;;  %v6585_v9 = vld [vmem:[#allocation3 + $0xd7] sm:$0xff]  ;;  %v7799_v53 = vmov 0  ;;  %vm6620_vm11 = vmpackc.low %vm6563_vm3, %vm7757_vm10 }
 0x22e   : > { %1648 = vst [vmem:[#allocation4 + $0x188] sm:$0xff] %v6577_v5  ;;  %1676 = vst [vmem:[#allocation4 + $0x130] sm:$0xff] %v1660_v55  ;;  %v7800_v53 = vsel %vm6591_vm5, 4294967295, %v7799_v53  ;;  %v6595_v52 = vpack.c.bf16 %v1480_v48, %v1479_v27  ;;  %v1661_v16 = vpack.c.bf16 %v1578_v44, %v1481_v32  ;;  %v1056_v40 = vand.u32 15, %v846_v59  ;;  %v1483_v59 = vld [vmem:[#allocation3 + $0xd9] sm:$0xff]  ;;  %v2795_v22 = vld [vmem:[#allocation4 + $0x140] sm:$0xff] }
 0x22f   : > { %v7801_v57 = vmov 0  ;;  %v6611_v63 = vpack.c.bf16 %v6301_v56, %v6285_v17  ;;  %v1063_v33 = vand.u32 15, %v847_v43  ;;  %v7803_v26 = vmov 0  ;;  %v4926_v8 = vld [vmem:[%s5880_s18 + $0x98] sm:$0xff]  }
 0x230   : > { %5030 = vmatmul.mubr.msk.bf16.gmra.mrb[20].mxu0 %vm6591_vm5, %v6595_v52  ;;  %v7802_v57 = vsel %vm6605_vm15, 4294967295, %v7801_v57  ;;  %1677 = vst [vmem:[#allocation4 + $0x148] sm:$0xff] %v1661_v16  ;;  %v7804_v26 = vsel %vm6620_vm11, 4294967295, %v7803_v26  ;;  %v6624_v36 = vpack.c.bf16 %v1482_v2, %v1481_v32  ;;  %vm6629_vm2 = vcmp.ne.s32.totalorder %v1042_v50, 15  ;;  %v7840_v4 = vld [vmem:[#allocation50_spill] sm:$0xff]  ;;  %v7858_v2 = vld [vmem:[#allocation36_spill] sm:$0xff] }
 0x231   : > { %5033 = vmatmul.mubr.msk.bf16.gmra.mrb[56].mxu1 %vm6605_vm15, %v6611_v63  ;;  %7805 = vst [vmem:[#allocation60_spill] sm:$0xff] %v7804_v26  ;;  %vm6633_vm5 = vcmp.ne.s32.totalorder %v1049_v19, 0  ;;  %v7808_v17 = vmov 0  ;;  %vm6637_vm15 = vcmp.ne.s32.totalorder %v1070_v39, 15  ;;  %vm6641_vm3 = vcmp.ne.s32.totalorder %v1056_v40, 15 }
 0x232   : > { %2061 = vmatprep.mubr.bf16.mxu1 %v6200_v49  ;;  %5036 = vmatprep.mubr.msk.bf16.mxu0 %vm6620_vm11, %v6624_v36  ;;  %v7809_v17 = vsel %vm6633_vm5, 4294967295, %v7808_v17  ;;  %v1484_v48 = vld [vmem:[#allocation3 + $0xe1] sm:$0xff]  ;;  %v1487_v1 = vld [vmem:[#allocation3 + $0xf9] sm:$0xff]  ;;  %vm6649_vm11 = vcmp.ne.s32.totalorder %v1063_v33, 0  ;;  %v7814_v43 = vmov 0  ;;  %vm6660_vm5 = vmpackc.low %vm6629_vm2, %vm7757_vm10  ;;  %v7816_v40 = vmov 0 }
 0x233   : > { %v6645_v32 = vld [vmem:[#allocation3 + $0xe7] sm:$0xff]  ;;  %v1580_v50 = vsel %vm6629_vm2, %v1484_v48, 0.0  ;;  %v7815_v43 = vsel %vm6649_vm11, 4294967295, %v7814_v43  ;;  %v7817_v40 = vsel %vm6660_vm5, 4294967295, %v7816_v40  ;;  %v6664_v26 = vpack.c.bf16 %v1484_v48, %v1483_v59  ;;  %v6669_v33 = vld [vmem:[#allocation3 + $0xff] sm:$0xff]  ;;  %vm6674_vm11 = vmpackc.low %vm7757_vm10, %vm6271_vm9 }
 0x234   : > { %v1488_v27 = vld [vmem:[#allocation3 + $0x101] sm:$0xff]  ;;  %v1662_v55 = vpack.c.bf16 %v1580_v50, %v1483_v59  ;;  %v1485_v19 = vld [vmem:[#allocation3 + $0xe9] sm:$0xff]  ;;  %v1486_v44 = vld [vmem:[#allocation3 + $0xf1] sm:$0xff]  ;;  %v6680_v56 = vpack.c.bf16 %v6329_v42, %v6312_v21  ;;  %v7820_v47 = vmov 0  ;;  %v7822_v42 = vmov 0 }
 0x235   : > { %v6653_v39 = vld [vmem:[#allocation3 + $0xef] sm:$0xff]  ;;  %v6655_v16 = vld [vmem:[#allocation3 + $0xf7] sm:$0xff]  ;;  %vm6689_vm2 = vmpackc.low %vm6641_vm3, %vm7757_vm10  ;;  %v6693_v48 = vpack.c.bf16 %v1486_v44, %v1485_v19  ;;  %v6705_v59 = vpack.c.bf16 %v1488_v27, %v1487_v1  ;;  %v6719_v25 = vpack.c.bf16 %v6406_v7, %v6393_v28  ;;  %v6736_v7 = vpack.c.bf16 %v6430_v24, %v6414_v46 }
 0x236   : > { %1678 = vst [vmem:[#allocation4 + $0x160] sm:$0xff] %v1662_v55  ;;  %v7821_v47 = vsel %vm6689_vm2, 4294967295, %v7820_v47  ;;  %v1682_v21 = vld [vmem:[#allocation4 + $0x8] sm:$0xff]  ;;  %vm6701_vm9 = vmpackc.low %vm6637_vm15, %vm7757_vm10  ;;  %v1681_v1 = vld [vmem:[#allocation4] sm:$0xff]  ;;  %v6777_v31 = vpack.c.bf16 %v6525_v6, %v6509_v23  ;;  %vm7843_vm15 = vnez %v7809_v17 }
 0x237   : > { %v7823_v42 = vsel %vm6701_vm9, 4294967295, %v7822_v42  ;;  %vm6713_vm3 = vmpackc.low %vm7757_vm10, %vm6351_vm4  ;;  %v4916_v27 = vld [vmem:[%s5880_s18 + $0x88] sm:$0xff]   ;;  %v4919_v28 = vld [vmem:[%s5880_s18 + $0x90] sm:$0xff]  }
 0x238   : > { %5039 = vmatmul.mubr.msk.bf16.gmra.mrb[24].mxu0 %vm6660_vm5, %v6664_v26  ;;  %vm6730_vm4 = vmpackc.low %vm7757_vm10, %vm6380_vm8  ;;  %v4943_v24 = vld [vmem:[#allocation4 + $0x38] sm:$0xff]  ;;  %vm7854_vm5 = vnez %v7802_v57  ;;  %v7855_v57 = vld [vmem:[#allocation34_spill] sm:$0xff] }
 0x239   : > { %5042 = vmatmul.mubr.msk.bf16.gmra.mrb[60].mxu1 %vm6674_vm11, %v6680_v56  ;;  %5045 = vmatprep.mubr.msk.bf16.mxu0 %vm6689_vm2, %v6693_v48  ;;  %vm6751_vm8 = vmpackc.low %vm7757_vm10, %vm6470_vm0  ;;  %v7835_v23 = vld [vmem:[#allocation59_spill] sm:$0xff]  ;;  %v7847_v19 = vld [vmem:[#allocation56_spill] sm:$0xff] }
 0x23a   : > { %2069 = vmatprep.mubr.bf16.mxu1 %v6306_v29  ;;  %v7848_v44 = vld [vmem:[#allocation55_spill] sm:$0xff]  ;;  %v4937_v50 = vld [vmem:[%s5880_s18 + $0x210] sm:$0xff]  }
 0x240   : > { %5048 = vmatmul.mubr.msk.bf16.gmra.mrb[28].mxu0 %vm6701_vm9, %v6705_v59  ;;  %vm7849_vm9 = vnez %v7848_v44 }
 0x241   : > { %5051 = vmatmul.mubr.msk.bf16.gmra.mrb[64].mxu1 %vm6713_vm3, %v6719_v25  ;;  %2471 = vmatprep.mubr.bf16.mxu0 %v1682_v21  ;;  %v2765_v21 = vld [vmem:[#allocation4 + $0x50] sm:$0xff] }
 0x242   : > { %2077 = vmatprep.mubr.bf16.mxu1 %v6298_v37 }
 0x248   : > { %2472 = vmatmul.mubr.bf16.vlgmr.msra.gmra.mrb[32].mxu0 %v1681_v1  ;;  %v7861_v1 = vld [vmem:[#allocation39_spill] sm:$0xff] }
 0x249   : > { %4476 = vmatpush3.bf16.msra.mxu0 %v6466_v0  ;;  %5054 = vmatmul.mubr.msk.bf16.gmra.mrb[68].mxu1 %vm6730_vm4, %v6736_v7  ;;  %v7865_v0 = vld [vmem:[#allocation40_spill] sm:$0xff] }
 0x24a   : > { %2479 = vmatprep.mubr.bf16.mxu0 %v5981_v20  ;;  %2085 = vmatprep.mubr.bf16.mxu1 %v6408_v35  ;;  %v6757_v20 = vpack.c.bf16 %v6501_v30, %v6485_v51  ;;  %v6806_v51 = vld [vmem:[%s5880_s18 + $0x200] sm:$0xff]   ;;  %v4941_v30 = vld [vmem:[%s5880_s18 + $0x230] sm:$0xff]  }
 0x24b   : > { %4477 = vmatprep.subr.bf16.mxu0 %v4916_v27 }
 0x24d   : > { %4478 = vmatpush3.bf16.msra.mxu0 %v4916_v27  ;;  %v7862_v27 = vld [vmem:[#allocation38_spill] sm:$0xff] }
 0x24e   : > { %4479 = vmatprep.subr.bf16.mxu0 %v4919_v28 }
 0x250   : > { %5057 = vmatmul.mubr.msk.bf16.gmra.mrb[36].mxu0 %vm6054_vm6, %v6058_v14  ;;  %v4932_v14 = vld [vmem:[%s5880_s18 + $0xa8] sm:$0xff]   ;;  %vm6771_vm6 = vmpackc.low %vm7757_vm10, %vm6489_vm13 }
 0x251   : > { %5060 = vmatmul.mubr.msk.bf16.gmra.mrb[72].mxu1 %vm6751_vm8, %v6757_v20  ;;  %2487 = vmatprep.mubr.bf16.mxu0 %v4943_v24  ;;  %vm6792_vm13 = vmpackc.low %vm7757_vm10, %vm6543_vm12  ;;  %v4940_v24 = vld [vmem:[%s5880_s18 + $0x228] sm:$0xff]  }
 0x252   : > { %2093 = vmatprep.mubr.bf16.mxu1 %v6402_v58  ;;  %4480 = vmatpush3.bf16.msra.mxu0 %v4919_v28 }
 0x253   : > { %4481 = vmatprep.subr.bf16.mxu0 %v4926_v8 }
 0x256   : > { %4482 = vmatpush3.bf16.msra.mxu0 %v4926_v8 }
 0x257   : > { %4483 = vmatprep.subr.bf16.mxu0 %v4931_v13 }
 0x258   : > { %5063 = vmatmul.mubr.msk.bf16.gmra.mrb[40].mxu0 %vm6143_vm14, %v6149_v12  ;;  %v4934_v12 = vld [vmem:[%s5880_s18 + $0xb8] sm:$0xff]   ;;  %vm7836_vm14 = vnez %v7835_v23 }
 0x259   : > { %5066 = vmatmul.mubr.msk.bf16.gmra.mrb[76].mxu1 %vm6771_vm6, %v6777_v31  ;;  %2495 = vmatprep.mubr.bf16.mxu0 %v6033_v61  ;;  %v6798_v61 = vpack.c.bf16 %v6579_v38, %v6568_v60  ;;  %vm6815_vm0 = vmpackc.low %vm7757_vm10, %vm7836_vm14  ;;  %v7839_v38 = vld [vmem:[#allocation32_spill] sm:$0xff]  ;;  %v7841_v60 = vld [vmem:[#allocation49_spill] sm:$0xff] }
 0x25a   : > { %2101 = vmatprep.mubr.bf16.mxu1 %v6504_v41  ;;  %4484 = vmatpush3.bf16.msra.mxu0 %v4931_v13  ;;  %vm7842_vm12 = vnez %v7841_v60  ;;  %vm6834_vm14 = vmpackc.low %vm7757_vm10, %vm7843_vm15  ;;  %vm7850_vm15 = vnez %v7815_v43  ;;  %v2761_v43 = vld [vmem:[#allocation4 + $0x30] sm:$0xff] }
 0x25b   : > { %4485 = vmatprep.subr.bf16.mxu0 %v4932_v14  ;;  %vm6853_vm2 = vmpackc.low %vm7757_vm10, %vm7850_vm15  ;;  %vm7863_vm10 = vnez %v7862_v27 }
 0x25e   : > { %4486 = vmatpush3.bf16.msra.mxu0 %v4932_v14 }
 0x25f   : > { %4487 = vmatprep.subr.bf16.mxu0 %v4933_v11 }
 0x260   : > { %5069 = vmatmul.mubr.msk.bf16.gmra.mrb[44].mxu0 %vm6239_vm7, %v6245_v45 }
 0x261   : > { %5072 = vmatmul.mubr.msk.bf16.gmra.mrb[80].mxu1 %vm6792_vm13, %v6798_v61  ;;  %2503 = vmatprep.mubr.bf16.mxu0 %v6024_v54  ;;  %v6821_v54 = vpack.c.bf16 %v6600_v3, %v6585_v9  ;;  %v6840_v9 = vpack.c.bf16 %v6653_v39, %v6645_v32  ;;  %v7846_v3 = vld [vmem:[#allocation31_spill] sm:$0xff]  ;;  %v6859_v32 = vpack.c.bf16 %v6669_v33, %v6655_v16  ;;  %v2768_v16 = vld [vmem:[#allocation4 + $0x68] sm:$0xff] }
 0x262   : > { %2109 = vmatprep.mubr.bf16.mxu1 %v6497_v15  ;;  %4488 = vmatpush3.bf16.msra.mxu0 %v4933_v11  ;;  %v2762_v39 = vld [vmem:[#allocation4 + $0x38] sm:$0xff]  ;;  %v2792_v33 = vld [vmem:[#allocation4 + $0x128] sm:$0xff] }
 0x263   : > { %4489 = vmatprep.subr.bf16.mxu0 %v4934_v12  ;;  %v7864_v11 = vld [vmem:[#allocation41_spill] sm:$0xff] }
 0x266   : > { %4490 = vmatpush3.bf16.msra.mxu0 %v4934_v12  ;;  %v7868_v12 = vld [vmem:[#allocation42_spill] sm:$0xff] }
 0x267   : > { %4523 = vmatprep.subr.bf16.mxu0 %v6806_v51 }
 0x268   : > { %5075 = vmatmul.mubr.msk.bf16.gmra.mrb[48].mxu0 %vm6337_vm1, %v6343_v10 }
 0x269   : > { %5078 = vmatmul.mubr.msk.bf16.gmra.mrb[84].mxu1 %vm6815_vm0, %v6821_v54  ;;  %2511 = vmatprep.mubr.bf16.mxu0 %v7839_v38 }
 0x26a   : > { %2117 = vmatprep.mubr.bf16.mxu1 %v6581_v18 }
 0x270   : > { %5081 = vmatmul.mubr.msk.bf16.gmra.mrb[52].mxu0 %vm7842_vm12, %v7840_v4 }
 0x271   : > { %5084 = vmatmul.mubr.msk.bf16.gmra.mrb[88].mxu1 %vm6834_vm14, %v6840_v9  ;;  %2519 = vmatprep.mubr.bf16.mxu0 %v7846_v3  ;;  %v4942_v3 = vld [vmem:[%s5880_s18 + $0x238] sm:$0xff]  }
 0x272   : > { %2125 = vmatprep.mubr.bf16.mxu1 %v6577_v5  ;;  %v7853_v5 = vld [vmem:[#allocation37_spill] sm:$0xff] }
 0x278   : > { %5087 = vmatmul.mubr.msk.bf16.gmra.mrb[56].mxu0 %vm7849_vm9, %v7847_v19 }
 0x279   : > { %5090 = vmatmul.mubr.msk.bf16.gmra.mrb[92].mxu1 %vm6853_vm2, %v6859_v32  ;;  %2527 = vmatprep.mubr.bf16.mxu0 %v7853_v5  ;;  %v7870_v5 = vld [vmem:[#allocation46_spill] sm:$0xff] }
 0x27a   : > { %3034 = vmatprep.mubr.bf16.mxu1 %v2762_v39  ;;  %v7871_v39 = vld [vmem:[#allocation45_spill] sm:$0xff] }
 0x280   : > { %5093 = vmatmul.mubr.msk.bf16.gmra.mrb[60].mxu0 %vm7854_vm5, %v6611_v63 }
 0x281   : > { %2535 = vmatprep.mubr.bf16.mxu0 %v6200_v49  ;;  %3035 = vmatmul.mubr.bf16.vlgmr.msra.gmra.mrb[96].mxu1 %v2761_v43  ;;  %v2771_v49 = vld [vmem:[#allocation4 + $0x80] sm:$0xff] }
 0x282   : > { %3042 = vmatprep.mubr.bf16.mxu1 %v2765_v21 }
 0x288   : > { %5096 = vmatmul.mubr.msk.bf16.gmra.mrb[64].mxu0 %vm6674_vm11, %v6680_v56 }
 0x289   : > { %2543 = vmatprep.mubr.bf16.mxu0 %v6306_v29  ;;  %5099 = vmatmul.mubr.msk.bf16.gmra.mrb[100].mxu1 %vm6239_vm7, %v6245_v45  ;;  %v2777_v45 = vld [vmem:[#allocation4 + $0xb0] sm:$0xff]  ;;  %v2780_v29 = vld [vmem:[#allocation4 + $0xc8] sm:$0xff] }
 0x28a   : > { %3050 = vmatprep.mubr.bf16.mxu1 %v2768_v16 }
 0x290   : > { %5102 = vmatmul.mubr.msk.bf16.gmra.mrb[68].mxu0 %vm6713_vm3, %v6719_v25 }
 0x291   : > { %2551 = vmatprep.mubr.bf16.mxu0 %v6298_v37  ;;  %5105 = vmatmul.mubr.msk.bf16.gmra.mrb[104].mxu1 %vm6337_vm1, %v6343_v10  ;;  %v2783_v37 = vld [vmem:[#allocation4 + $0xe0] sm:$0xff]  ;;  %v2786_v10 = vld [vmem:[#allocation4 + $0xf8] sm:$0xff] }
 0x292   : > { %3058 = vmatprep.mubr.bf16.mxu1 %v2771_v49 }
 0x298   : > { %5108 = vmatmul.mubr.msk.bf16.gmra.mrb[72].mxu0 %vm6730_vm4, %v6736_v7 }
 0x299   : > { %2559 = vmatprep.mubr.bf16.mxu0 %v6408_v35  ;;  %5111 = vmatmul.mubr.msk.bf16.gmra.mrb[108].mxu1 %vm7842_vm12, %v7840_v4  ;;  %v2789_v35 = vld [vmem:[#allocation4 + $0x110] sm:$0xff]  ;;  %vm7888_vm12 = vnez %v7817_v40 }
 0x29a   : > { %3066 = vmatprep.mubr.bf16.mxu1 %v2774_v34 }
 0x2a0   : > { %5114 = vmatmul.mubr.msk.bf16.gmra.mrb[76].mxu0 %vm6751_vm8, %v6757_v20 }
 0x2a1   : > { %2567 = vmatprep.mubr.bf16.mxu0 %v6402_v58  ;;  %5117 = vmatmul.mubr.msk.bf16.gmra.mrb[112].mxu1 %vm7849_vm9, %v7847_v19  ;;  %v1683_v58 = vld [vmem:[#allocation4 + $0x10] sm:$0xff]  ;;  %vm7872_vm9 = vnez %v7871_v39 }
 0x2a2   : > { %3074 = vmatprep.mubr.bf16.mxu1 %v2777_v45 }
 0x2a8   : > { %5120 = vmatmul.mubr.msk.bf16.gmra.mrb[80].mxu0 %vm6771_vm6, %v6777_v31 }
 0x2a9   : > { %2575 = vmatprep.mubr.bf16.mxu0 %v6504_v41  ;;  %5123 = vmatmul.mubr.msk.bf16.gmra.mrb[116].mxu1 %vm7854_vm5, %v6611_v63  ;;  %v4944_v41 = vld [vmem:[#allocation4 + $0x28] sm:$0xff]  ;;  %vm7866_vm5 = vnez %v7865_v0  ;;  %v2769_v0 = vld [vmem:[#allocation4 + $0x70] sm:$0xff] }
 0x2aa   : > { %3082 = vmatprep.mubr.bf16.mxu1 %v2780_v29  ;;  %v7856_v63 = vld [vmem:[#allocation33_spill] sm:$0xff]  ;;  %v7876_v29 = vld [vmem:[#allocation52_spill] sm:$0xff] }
 0x2ab   : > { %vm7857_vm7 = vnez %v7856_v63  ;;  %v7882_v63 = vld [vmem:[#allocation58_spill] sm:$0xff] }
 0x2b0   : > { %5126 = vmatmul.mubr.msk.bf16.gmra.mrb[84].mxu0 %vm6792_vm13, %v6798_v61 }
 0x2b1   : > { %2583 = vmatprep.mubr.bf16.mxu0 %v6497_v15  ;;  %5129 = vmatmul.mubr.msk.bf16.gmra.mrb[120].mxu1 %vm6674_vm11, %v6680_v56  ;;  %v4936_v15 = vld [vmem:[%s5880_s18 + $0x208] sm:$0xff]   ;;  %v4938_v56 = vld [vmem:[%s5880_s18 + $0x218] sm:$0xff]   ;;  %vm7869_vm11 = vnez %v7868_v12 }
 0x2b2   : > { %3090 = vmatprep.mubr.bf16.mxu1 %v2783_v37  ;;  %v7877_v37 = vld [vmem:[#allocation51_spill] sm:$0xff] }
 0x2b8   : > { %5132 = vmatmul.mubr.msk.bf16.gmra.mrb[88].mxu0 %vm6815_vm0, %v6821_v54 }
 0x2b9   : > { %2591 = vmatprep.mubr.bf16.mxu0 %v6581_v18  ;;  %5135 = vmatmul.mubr.msk.bf16.gmra.mrb[124].mxu1 %vm6713_vm3, %v6719_v25  ;;  %v7859_v25 = vld [vmem:[#allocation35_spill] sm:$0xff] }
 0x2ba   : > { %3098 = vmatprep.mubr.bf16.mxu1 %v2786_v10  ;;  %vm7860_vm1 = vnez %v7859_v25  ;;  %v7879_v10 = vld [vmem:[#allocation54_spill] sm:$0xff] }
 0x2c0   : > { %5138 = vmatmul.mubr.msk.bf16.gmra.mrb[92].mxu0 %vm6834_vm14, %v6840_v9 }
 0x2c1   : > { %5141 = vmatmul.mubr.msk.bf16.gmra.mrb[128].mxu1 %vm6730_vm4, %v6736_v7  ;;  %4491 = vmatprep.mubr.bf16.mxu0 %v1683_v58  ;;  %v4939_v7 = vld [vmem:[%s5880_s18 + $0x220] sm:$0xff]   ;;  %vm7878_vm4 = vnez %v7877_v37  ;;  %v7880_v58 = vld [vmem:[#allocation53_spill] sm:$0xff] }
 0x2c2   : > { %3106 = vmatprep.mubr.bf16.mxu1 %v2789_v35 }
 0x2c8   : > { %4492 = vmatmul.mubr.bf16.vlgmr.msra.gmra.mrb[0].mxu0 %v4944_v41 }
 0x2c9   : > { %4524 = vmatpush3.bf16.msra.mxu0 %v6806_v51  ;;  %5144 = vmatprep.mubr.msk.bf16.mxu0 %vm7857_vm7, %v7855_v57  ;;  %v2798_v51 = vld [vmem:[#allocation4 + $0x158] sm:$0xff] }
 0x2ca   : > { %5147 = vmatmul.mubr.msk.bf16.gmra.mrb[132].mxu1 %vm6751_vm8, %v6757_v20  ;;  %4525 = vmatprep.subr.bf16.mxu0 %v4936_v15  ;;  %vm7881_vm8 = vnez %v7880_v58 }
 0x2cb   : > { %3114 = vmatprep.mubr.bf16.mxu1 %v2792_v33  ;;  %v7883_v33 = vld [vmem:[#allocation57_spill] sm:$0xff] }
 0x2cc   : > { %v3987_v28 = vpop.f32.mrb[32].mxu1 }
 0x2cd   : > { %4526 = vmatpush3.bf16.msra.mxu0 %v4936_v15  ;;  %v3988_v8 = vpop.f32.mrb[33].mxu1 }
 0x2ce   : > { %4527 = vmatprep.subr.bf16.mxu0 %v4937_v50  ;;  %v6944_v46 = vadd.f32 %v3988_v8, %v3987_v28  ;;  %v3990_v20 = vpop.f32.mrb[34].mxu1  ;;  %v2763_v8 = vld [vmem:[#allocation4 + $0x40] sm:$0xff] }
 0x2cf   : > { %v3991_v13 = vpop.f32.mrb[35].mxu1 }
 0x2d0   : > { %5150 = vmatmul.mubr.msk.bf16.gmra.mrb[4].mxu0 %vm7860_vm1, %v7858_v2  ;;  %v6947_v14 = vadd.f32 %v3991_v13, %v3990_v20  ;;  %v2766_v13 = vld [vmem:[#allocation4 + $0x58] sm:$0xff] }
 0x2d1   : > { %5153 = vmatprep.mubr.msk.bf16.mxu0 %vm7863_vm10, %v7861_v1  ;;  %4528 = vmatpush3.bf16.msra.mxu0 %v4937_v50  ;;  %v2807_v50 = vld [vmem:[#allocation4 + $0x1a0] sm:$0xff]  ;;  %v2806_v1 = vld [vmem:[#allocation4 + $0x198] sm:$0xff] }
 0x2d2   : > { %5156 = vmatmul.mubr.msk.bf16.gmra.mrb[136].mxu1 %vm6771_vm6, %v6777_v31  ;;  %4529 = vmatprep.subr.bf16.mxu0 %v4938_v56  ;;  %v7867_v31 = vld [vmem:[#allocation43_spill] sm:$0xff]  ;;  %vm7884_vm6 = vnez %v7883_v33 }
 0x2d3   : > { %3122 = vmatprep.mubr.bf16.mxu1 %v2795_v22  ;;  %v7886_v22 = vld [vmem:[#allocation60_spill] sm:$0xff] }
 0x2d4   : > { %v3993_v23 = vpop.f32.mrb[36].mxu1 }
 0x2d5   : > { %4530 = vmatpush3.bf16.msra.mxu0 %v4938_v56  ;;  %v3994_v38 = vpop.f32.mrb[37].mxu1 }
 0x2d6   : > { %4531 = vmatprep.subr.bf16.mxu0 %v4939_v7  ;;  %v6959_v4 = vadd.f32 %v3994_v38, %v3993_v23  ;;  %v3996_v60 = vpop.f32.mrb[38].mxu1  ;;  %v2772_v38 = vld [vmem:[#allocation4 + $0x88] sm:$0xff] }
 0x2d7   : > { %v3997_v19 = vpop.f32.mrb[39].mxu1 }
 0x2d8   : > { %5159 = vmatmul.mubr.msk.bf16.gmra.mrb[8].mxu0 %vm7866_vm5, %v7864_v11  ;;  %v6962_v44 = vadd.f32 %v3997_v19, %v3996_v60 }
 0x2d9   : > { %5162 = vmatprep.mubr.msk.bf16.mxu0 %vm7869_vm11, %v7867_v31  ;;  %4532 = vmatpush3.bf16.msra.mxu0 %v4939_v7 }
 0x2da   : > { %5165 = vmatmul.mubr.msk.bf16.gmra.mrb[140].mxu1 %vm6792_vm13, %v6798_v61  ;;  %4533 = vmatprep.subr.bf16.mxu0 %v4940_v24  ;;  %v7874_v61 = vld [vmem:[#allocation47_spill] sm:$0xff]  ;;  %vm7885_vm13 = vnez %v7800_v53 }
 0x2db   : > { %3130 = vmatprep.mubr.bf16.mxu1 %v2798_v51  ;;  %vm7875_vm3 = vnez %v7874_v61 }
 0x2dc   : > { %v3999_v43 = vpop.f32.mrb[40].mxu1 }
 0x2dd   : > { %4534 = vmatpush3.bf16.msra.mxu0 %v4940_v24  ;;  %v4000_v21 = vpop.f32.mrb[41].mxu1 }
 0x2de   : > { %4535 = vmatprep.subr.bf16.mxu0 %v4941_v30  ;;  %v6974_v16 = vadd.f32 %v4000_v21, %v3999_v43  ;;  %v4002_v49 = vpop.f32.mrb[42].mxu1  ;;  %v2778_v43 = vld [vmem:[#allocation4 + $0xb8] sm:$0xff] }
 0x2df   : > { %v4003_v34 = vpop.f32.mrb[43].mxu1 }
 0x2e0   : > { %5168 = vmatmul.mubr.msk.bf16.gmra.mrb[12].mxu0 %vm7872_vm9, %v7870_v5  ;;  %v6976_v45 = vadd.f32 %v4003_v34, %v4002_v49  ;;  %v2781_v49 = vld [vmem:[#allocation4 + $0xd0] sm:$0xff] }
 0x2e1   : > { %5171 = vmatprep.mubr.msk.bf16.mxu0 %vm7875_vm3, %v7873_v62  ;;  %4536 = vmatpush3.bf16.msra.mxu0 %v4941_v30 }
 0x2e2   : > { %5174 = vmatmul.mubr.msk.bf16.gmra.mrb[144].mxu1 %vm6815_vm0, %v6821_v54  ;;  %4537 = vmatprep.subr.bf16.mxu0 %v4942_v3  ;;  %vm7887_vm0 = vnez %v7886_v22 }
 0x2e3   : > { %3138 = vmatprep.mubr.bf16.mxu1 %v6581_v18  ;;  %v2804_v18 = vld [vmem:[#allocation4 + $0x188] sm:$0xff] }
 0x2e5   : > { %4538 = vmatpush3.bf16.msra.mxu0 %v4942_v3  ;;  %v2775_v3 = vld [vmem:[#allocation4 + $0xa0] sm:$0xff] }
 0x2e6   : > { %v4005_v6 = vpop.f32.mrb[44].mxu1 }
 0x2e7   : > { %v4006_v54 = vpop.f32.mrb[45].mxu1 }
 0x2e8   : > { %5177 = vmatmul.mubr.msk.bf16.gmra.mrb[16].mxu0 %vm7878_vm4, %v7876_v29  ;;  %v6987_v35 = vadd.f32 %v4006_v54, %v4005_v6  ;;  %v4008_v15 = vpop.f32.mrb[46].mxu1 }
 0x2e9   : > { %5180 = vmatprep.mubr.msk.bf16.mxu0 %vm7881_vm8, %v7879_v10  ;;  %v4009_v41 = vpop.f32.mrb[47].mxu1 }
 0x2ea   : > { %5183 = vmatmul.mubr.msk.bf16.gmra.mrb[148].mxu1 %vm6834_vm14, %v6840_v9  ;;  %v6989_v57 = vadd.f32 %v4009_v41, %v4008_v15  ;;  %vm7890_vm14 = vnez %v7823_v42 }
 0x2eb   : > { %3146 = vmatprep.mubr.bf16.mxu1 %v2804_v18 }
 0x2f0   : > { %5186 = vmatmul.mubr.msk.bf16.gmra.mrb[20].mxu0 %vm7884_vm6, %v7882_v63 }
 0x2f1   : > { %5189 = vmatprep.mubr.msk.bf16.mxu0 %vm7885_vm13, %v6595_v52 }
 0x2f2   : > { %5192 = vmatmul.mubr.msk.bf16.gmra.mrb[152].mxu1 %vm6853_vm2, %v6859_v32  ;;  %v4011_v55 = vpop.f32.mrb[48].mxu1  ;;  %vm7889_vm2 = vnez %v7821_v47 }
 0x2f3   : > { %3154 = vmatprep.mubr.bf16.mxu1 %v2807_v50  ;;  %v4012_v9 = vpop.f32.mrb[49].mxu1  ;;  %v2784_v50 = vld [vmem:[#allocation4 + $0xe8] sm:$0xff] }
 0x2f4   : > { %v7000_v56 = vadd.f32 %v4012_v9, %v4011_v55  ;;  %v4014_v2 = vpop.f32.mrb[50].mxu1  ;;  %v2787_v9 = vld [vmem:[#allocation4 + $0x100] sm:$0xff] }
 0x2f5   : > { %v4015_v25 = vpop.f32.mrb[51].mxu1 }
 0x2f6   : > { %v7002_v27 = vadd.f32 %v4015_v25, %v4014_v2 }
 0x2f8   : > { %5195 = vmatmul.mubr.msk.bf16.gmra.mrb[24].mxu0 %vm7887_vm0, %v6624_v36 }
 0x2f9   : > { %5198 = vmatprep.mubr.msk.bf16.mxu0 %vm7888_vm12, %v6664_v26 }
 0x2fa   : > { %3155 = vmatmul.mubr.bf16.gmra.mrb[156].mxu1 %v2806_v1  ;;  %v4017_v53 = vpop.f32.mrb[52].mxu1 }
 0x2fb   : > { %v4018_v52 = vpop.f32.mrb[53].mxu1 }
 0x2fc   : > { %v7010_v17 = vadd.f32 %v4018_v52, %v4017_v53  ;;  %v4020_v32 = vpop.f32.mrb[54].mxu1 }
 0x2fd   : > { %v4021_v7 = vpop.f32.mrb[55].mxu1 }
 0x2fe   : > { %v7012_v28 = vadd.f32 %v4021_v7, %v4020_v32 }
 0x300   : > { %5201 = vmatmul.mubr.msk.bf16.gmra.mrb[28].mxu0 %vm7889_vm2, %v6693_v48 }
 0x301   : > { %4539 = vmatprep.mubr.bf16.mxu0 %v2763_v8 }
 0x304   : > { %v4023_v36 = vpop.f32.mrb[56].mxu1 }
 0x305   : > { %v4024_v20 = vpop.f32.mrb[57].mxu1 }
 0x306   : > { %v7017_v24 = vadd.f32 %v4024_v20, %v4023_v36  ;;  %v4026_v26 = vpop.f32.mrb[58].mxu1 }
 0x307   : > { %v4027_v40 = vpop.f32.mrb[59].mxu1 }
 0x308   : > { %v7019_v11 = vadd.f32 %v4027_v40, %v4026_v26  ;;  %4540 = vmatmul.mubr.bf16.vlgmr.msra.gmra.mrb[0].mxu0 %v2766_v13  ;;  %v2790_v40 = vld [vmem:[#allocation4 + $0x118] sm:$0xff] }
 0x309   : > { %4543 = vmatprep.mubr.bf16.mxu0 %v2769_v0 }
 0x30c   : > { %v4029_v31 = vpop.f32.mrb[60].mxu1 }
 0x30d   : > { %v4030_v12 = vpop.f32.mrb[61].mxu1 }
 0x30e   : > { %v7021_v51 = vadd.f32 %v4030_v12, %v4029_v31  ;;  %v4032_v30 = vpop.f32.mrb[62].mxu1 }
 0x30f   : > { %v4033_v23 = vpop.f32.mrb[63].mxu1 }
 0x310   : > { %v7023_v60 = vadd.f32 %v4033_v23, %v4032_v30  ;;  %4544 = vmatmul.mubr.bf16.gmra.mrb[4].mxu0 %v2772_v38 }
 0x311   : > { %4547 = vmatprep.mubr.bf16.mxu0 %v2775_v3 }
 0x314   : > { %v4035_v19 = vpop.f32.mrb[64].mxu1 }
 0x315   : > { %v4036_v5 = vpop.f32.mrb[65].mxu1 }
 0x316   : > { %v7025_v39 = vadd.f32 %v4036_v5, %v4035_v19  ;;  %v4038_v62 = vpop.f32.mrb[66].mxu1 }
 0x317   : > { %v4039_v61 = vpop.f32.mrb[67].mxu1 }
 0x318   : > { %v7027_v21 = vadd.f32 %v4039_v61, %v4038_v62  ;;  %4548 = vmatmul.mubr.bf16.gmra.mrb[8].mxu0 %v2778_v43 }
 0x319   : > { %4551 = vmatprep.mubr.bf16.mxu0 %v2781_v49  ;;  %v2796_v49 = vld [vmem:[#allocation4 + $0x148] sm:$0xff] }
 0x31b   : > { %v4123_v34 = vpop.f32.mrb[32].mxu0 }
 0x31c   : > { %v4041_v29 = vpop.f32.mrb[68].mxu1  ;;  %v4124_v37 = vpop.f32.mrb[33].mxu0 }
 0x31d   : > { %v4125_v10 = vadd.f32 %v4124_v37, %v4123_v34  ;;  %v4042_v58 = vpop.f32.mrb[69].mxu1  ;;  %v4126_v18 = vpop.f32.mrb[34].mxu0 }
 0x31e   : > { %v7029_v6 = vadd.f32 %v4042_v58, %v4041_v29  ;;  %v4044_v54 = vpop.f32.mrb[70].mxu1  ;;  %v4127_v15 = vpop.f32.mrb[35].mxu0 }
 0x31f   : > { %v7032_v41 = vadd.f32 %v4125_v10, %v6944_v46  ;;  %v4128_v63 = vadd.f32 %v4127_v15, %v4126_v18  ;;  %v4045_v33 = vpop.f32.mrb[71].mxu1 }
 0x320   : > { %v7034_v55 = vadd.f32 %v4045_v33, %v4044_v54  ;;  %4552 = vmatmul.mubr.bf16.gmra.mrb[12].mxu0 %v2784_v50 }
 0x321   : > { %v7037_v2 = vadd.f32 %v4128_v63, %v6947_v14  ;;  %4555 = vmatprep.mubr.bf16.mxu0 %v2787_v9  ;;  %v2793_v14 = vld [vmem:[#allocation4 + $0x130] sm:$0xff] }
 0x323   : > { %v4129_v25 = vpop.f32.mrb[36].mxu0 }
 0x324   : > { %v4047_v1 = vpop.f32.mrb[72].mxu1  ;;  %v4130_v22 = vpop.f32.mrb[37].mxu0 }
 0x325   : > { %v4131_v53 = vadd.f32 %v4130_v22, %v4129_v25  ;;  %v4048_v52 = vpop.f32.mrb[73].mxu1  ;;  %v4132_v32 = vpop.f32.mrb[38].mxu0 }
 0x326   : > { %v7039_v7 = vadd.f32 %v4048_v52, %v4047_v1  ;;  %v4050_v46 = vpop.f32.mrb[74].mxu1  ;;  %v4133_v8 = vpop.f32.mrb[39].mxu0 }
 0x327   : > { %v7042_v36 = vadd.f32 %v4131_v53, %v6959_v4  ;;  %v4134_v20 = vadd.f32 %v4133_v8, %v4132_v32  ;;  %v4051_v26 = vpop.f32.mrb[75].mxu1  ;;  %v2808_v8 = vld [vmem:[#allocation4 + $0x1a8] sm:$0xff] }
 0x328   : > { %v7044_v13 = vadd.f32 %v4051_v26, %v4050_v46  ;;  %4556 = vmatmul.mubr.bf16.gmra.mrb[16].mxu0 %v2790_v40 }
 0x329   : > { %v7047_v0 = vadd.f32 %v4134_v20, %v6962_v44  ;;  %4559 = vmatprep.mubr.bf16.mxu0 %v2793_v14  ;;  %v2799_v44 = vld [vmem:[#allocation4 + $0x160] sm:$0xff] }
 0x32b   : > { %v4135_v31 = vpop.f32.mrb[40].mxu0 }
 0x32c   : > { %v4053_v12 = vpop.f32.mrb[76].mxu1  ;;  %v4136_v30 = vpop.f32.mrb[41].mxu0 }
 0x32d   : > { %v4137_v23 = vadd.f32 %v4136_v30, %v4135_v31  ;;  %v4054_v38 = vpop.f32.mrb[77].mxu1  ;;  %v4138_v3 = vpop.f32.mrb[42].mxu0 }
 0x32e   : > { %v7049_v19 = vadd.f32 %v4054_v38, %v4053_v12  ;;  %v4056_v4 = vpop.f32.mrb[78].mxu1  ;;  %v4139_v5 = vpop.f32.mrb[43].mxu0 }
 0x32f   : > { %v7052_v62 = vadd.f32 %v4137_v23, %v6974_v16  ;;  %v4140_v61 = vadd.f32 %v4139_v5, %v4138_v3  ;;  %v4057_v43 = vpop.f32.mrb[79].mxu1 }
 0x330   : > { %v7054_v34 = vadd.f32 %v4057_v43, %v4056_v4  ;;  %4560 = vmatmul.mubr.bf16.gmra.mrb[20].mxu0 %v2796_v49 }
 0x331   : > { %v7057_v29 = vadd.f32 %v4140_v61, %v6976_v45  ;;  %4563 = vmatprep.mubr.bf16.mxu0 %v2799_v44 }
 0x333   : > { %v4141_v37 = vpop.f32.mrb[44].mxu0 }
 0x334   : > { %v4059_v10 = vpop.f32.mrb[80].mxu1  ;;  %v4142_v58 = vpop.f32.mrb[45].mxu0 }
 0x335   : > { %v4143_v18 = vadd.f32 %v4142_v58, %v4141_v37  ;;  %v4060_v54 = vpop.f32.mrb[81].mxu1  ;;  %v4144_v15 = vpop.f32.mrb[46].mxu0 }
 0x336   : > { %v7059_v63 = vadd.f32 %v4060_v54, %v4059_v10  ;;  %v4062_v16 = vpop.f32.mrb[82].mxu1  ;;  %v4145_v33 = vpop.f32.mrb[47].mxu0 }
 0x337   : > { %v7062_v50 = vadd.f32 %v4143_v18, %v6987_v35  ;;  %v4146_v9 = vadd.f32 %v4145_v33, %v4144_v15  ;;  %v4063_v25 = vpop.f32.mrb[83].mxu1 }
 0x338   : > { %v7064_v1 = vadd.f32 %v4063_v25, %v4062_v16  ;;  %5204 = vmatmul.mubr.msk.bf16.gmra.mrb[24].mxu0 %vm7889_vm2, %v6693_v48 }
 0x339   : > { %v7070_v45 = vadd.f32 %v4146_v9, %v6989_v57  ;;  %5207 = vmatprep.mubr.msk.bf16.mxu0 %vm7890_vm14, %v6705_v59 }
 0x33b   : > { %v4147_v22 = vpop.f32.mrb[48].mxu0 }
 0x33c   : > { %v4065_v53 = vpop.f32.mrb[84].mxu1  ;;  %v4148_v52 = vpop.f32.mrb[49].mxu0 }
 0x33d   : > { %v4149_v35 = vadd.f32 %v4148_v52, %v4147_v22  ;;  %v4066_v32 = vpop.f32.mrb[85].mxu1  ;;  %v4150_v46 = vpop.f32.mrb[50].mxu0 }
 0x33e   : > { %v7075_v20 = vadd.f32 %v4066_v32, %v4065_v53  ;;  %v4068_v26 = vpop.f32.mrb[86].mxu1  ;;  %v4151_v40 = vpop.f32.mrb[51].mxu0 }
 0x33f   : > { %v7078_v47 = vadd.f32 %v4149_v35, %v7000_v56  ;;  %v4152_v48 = vadd.f32 %v4151_v40, %v4150_v46  ;;  %v4069_v57 = vpop.f32.mrb[87].mxu1 }
 0x340   : > { %v7080_v14 = vadd.f32 %v4069_v57, %v4068_v26  ;;  %4568 = vmatmul.mubr.bf16.gmra.mrb[28].mxu0 %v2808_v8 }
 0x341   : > { %v7083_v42 = vadd.f32 %v4152_v48, %v7002_v27 }
 0x343   : > { %v4153_v59 = vpop.f32.mrb[52].mxu0 }
 0x344   : > { %v4071_v31 = vpop.f32.mrb[88].mxu1  ;;  %v4154_v12 = vpop.f32.mrb[53].mxu0 }
 0x345   : > { %v4155_v30 = vadd.f32 %v4154_v12, %v4153_v59  ;;  %v4072_v23 = vpop.f32.mrb[89].mxu1  ;;  %v4156_v38 = vpop.f32.mrb[54].mxu0 }
 0x346   : > { %v7085_v3 = vadd.f32 %v4072_v23, %v4071_v31  ;;  %v4074_v4 = vpop.f32.mrb[90].mxu1  ;;  %v4157_v5 = vpop.f32.mrb[55].mxu0 }
 0x347   : > { %v7088_v56 = vadd.f32 %v4155_v30, %v7010_v17  ;;  %v4158_v61 = vadd.f32 %v4157_v5, %v4156_v38  ;;  %v4075_v43 = vpop.f32.mrb[91].mxu1 }
 0x348   : > { %v7090_v49 = vadd.f32 %v4075_v43, %v4074_v4 }
 0x349   : > { %v7093_v27 = vadd.f32 %v4158_v61, %v7012_v28 }
 0x34b   : > { %v4159_v44 = vpop.f32.mrb[56].mxu0 }
 0x34c   : > { %v4077_v37 = vpop.f32.mrb[92].mxu1  ;;  %v4160_v10 = vpop.f32.mrb[57].mxu0 }
 0x34d   : > { %v4161_v58 = vadd.f32 %v4160_v10, %v4159_v44  ;;  %v4078_v18 = vpop.f32.mrb[93].mxu1  ;;  %v4162_v54 = vpop.f32.mrb[58].mxu0 }
 0x34e   : > { %v7095_v15 = vadd.f32 %v4078_v18, %v4077_v37  ;;  %v4080_v16 = vpop.f32.mrb[94].mxu1  ;;  %v4163_v33 = vpop.f32.mrb[59].mxu0 }
 0x34f   : > { %v7098_v17 = vadd.f32 %v4161_v58, %v7017_v24  ;;  %v4164_v9 = vadd.f32 %v4163_v33, %v4162_v54  ;;  %v4081_v25 = vpop.f32.mrb[95].mxu1 }
 0x350   : > { %v7100_v22 = vadd.f32 %v4081_v25, %v4080_v16 }
 0x351   : > { %v7103_v28 = vadd.f32 %v4164_v9, %v7019_v11 }
 0x353   : > { %v4165_v53 = vpop.f32.mrb[60].mxu0 }
 0x354   : > { %v4166_v52 = vpop.f32.mrb[61].mxu0  ;;  %v4259_v35 = vpop.f32.mrb[96].mxu1 }
 0x355   : > { %v4167_v32 = vadd.f32 %v4166_v52, %v4165_v53  ;;  %v4168_v46 = vpop.f32.mrb[62].mxu0  ;;  %v4260_v8 = vpop.f32.mrb[97].mxu1 }
 0x356   : > { %v4261_v26 = vadd.f32 %v4260_v8, %v4259_v35  ;;  %v4169_v40 = vpop.f32.mrb[63].mxu0  ;;  %v4262_v48 = vpop.f32.mrb[98].mxu1 }
 0x357   : > { %v7106_v57 = vadd.f32 %v4167_v32, %v7021_v51  ;;  %v4170_v24 = vadd.f32 %v4169_v40, %v4168_v46  ;;  %v4263_v59 = vpop.f32.mrb[99].mxu1 }
 0x358   : > { %v4264_v31 = vadd.f32 %v4263_v59, %v4262_v48  ;;  %v7109_v12 = vadd.f32 %v7032_v41, %v4261_v26 }
 0x359   : > { %v7112_v11 = vadd.f32 %v4170_v24, %v7023_v60 }
 0x35a   : > { %v7115_v30 = vadd.f32 %v7037_v2, %v4264_v31 }
 0x35b   : > { %v4171_v23 = vpop.f32.mrb[64].mxu0 }
 0x35c   : > { %v4172_v38 = vpop.f32.mrb[65].mxu0  ;;  %v4265_v4 = vpop.f32.mrb[100].mxu1 }
 0x35d   : > { %v4173_v5 = vadd.f32 %v4172_v38, %v4171_v23  ;;  %v4174_v61 = vpop.f32.mrb[66].mxu0  ;;  %v4266_v43 = vpop.f32.mrb[101].mxu1 }
 0x35e   : > { %v4267_v51 = vadd.f32 %v4266_v43, %v4265_v4  ;;  %v4175_v44 = vpop.f32.mrb[67].mxu0  ;;  %v4268_v37 = vpop.f32.mrb[102].mxu1 }
 0x35f   : > { %v7118_v10 = vadd.f32 %v4173_v5, %v7025_v39  ;;  %v4176_v41 = vadd.f32 %v4175_v44, %v4174_v61  ;;  %v4269_v58 = vpop.f32.mrb[103].mxu1 }
 0x360   : > { %v4270_v18 = vadd.f32 %v4269_v58, %v4268_v37  ;;  %v7121_v60 = vadd.f32 %v7042_v36, %v4267_v51 }
 0x361   : > { %v7124_v2 = vadd.f32 %v4176_v41, %v7027_v21 }
 0x362   : > { %v7127_v54 = vadd.f32 %v7047_v0, %v4270_v18 }
 0x363   : > { %v4177_v16 = vpop.f32.mrb[68].mxu0 }
 0x364   : > { %v4178_v33 = vpop.f32.mrb[69].mxu0  ;;  %v4271_v9 = vpop.f32.mrb[104].mxu1 }
 0x365   : > { %v4179_v25 = vadd.f32 %v4178_v33, %v4177_v16  ;;  %v4180_v53 = vpop.f32.mrb[70].mxu0  ;;  %v4272_v52 = vpop.f32.mrb[105].mxu1 }
 0x366   : > { %v4273_v39 = vadd.f32 %v4272_v52, %v4271_v9  ;;  %v4181_v35 = vpop.f32.mrb[71].mxu0  ;;  %v4274_v32 = vpop.f32.mrb[106].mxu1 }
 0x367   : > { %v7130_v46 = vadd.f32 %v4179_v25, %v7029_v6  ;;  %v4182_v36 = vadd.f32 %v4181_v35, %v4180_v53  ;;  %v4275_v8 = vpop.f32.mrb[107].mxu1 }
 0x368   : > { %v4276_v26 = vadd.f32 %v4275_v8, %v4274_v32  ;;  %v7133_v21 = vadd.f32 %v7052_v62, %v4273_v39 }
 0x369   : > { %v7136_v0 = vadd.f32 %v4182_v36, %v7034_v55 }
 0x36a   : > { %v7139_v40 = vadd.f32 %v7057_v29, %v4276_v26 }
 0x36b   : > { %v4183_v48 = vpop.f32.mrb[72].mxu0 }
 0x36c   : > { %v4184_v24 = vpop.f32.mrb[73].mxu0  ;;  %v4277_v59 = vpop.f32.mrb[108].mxu1 }
 0x36d   : > { %v4185_v31 = vadd.f32 %v4184_v24, %v4183_v48  ;;  %v4186_v23 = vpop.f32.mrb[74].mxu0  ;;  %v4278_v38 = vpop.f32.mrb[109].mxu1 }
 0x36e   : > { %v4279_v6 = vadd.f32 %v4278_v38, %v4277_v59  ;;  %v4187_v4 = vpop.f32.mrb[75].mxu0  ;;  %v4280_v5 = vpop.f32.mrb[110].mxu1 }
 0x36f   : > { %v7142_v61 = vadd.f32 %v4185_v31, %v7039_v7  ;;  %v4188_v62 = vadd.f32 %v4187_v4, %v4186_v23  ;;  %v4281_v43 = vpop.f32.mrb[111].mxu1 }
 0x370   : > { %v4282_v51 = vadd.f32 %v4281_v43, %v4280_v5  ;;  %v7145_v55 = vadd.f32 %v7062_v50, %v4279_v6 }
 0x371   : > { %v7148_v29 = vadd.f32 %v4188_v62, %v7044_v13 }
 0x372   : > { %v7151_v44 = vadd.f32 %v7070_v45, %v4282_v51 }
 0x373   : > { %v4189_v37 = vpop.f32.mrb[76].mxu0 }
 0x374   : > { %v4190_v41 = vpop.f32.mrb[77].mxu0  ;;  %v4283_v58 = vpop.f32.mrb[112].mxu1 }
 0x375   : > { %v4191_v18 = vadd.f32 %v4190_v41, %v4189_v37  ;;  %v4192_v16 = vpop.f32.mrb[78].mxu0  ;;  %v4284_v33 = vpop.f32.mrb[113].mxu1 }
 0x376   : > { %v4285_v7 = vadd.f32 %v4284_v33, %v4283_v58  ;;  %v4193_v9 = vpop.f32.mrb[79].mxu0  ;;  %v4286_v25 = vpop.f32.mrb[114].mxu1 }
 0x377   : > { %v7154_v53 = vadd.f32 %v4191_v18, %v7049_v19  ;;  %v4194_v50 = vadd.f32 %v4193_v9, %v4192_v16  ;;  %v4287_v52 = vpop.f32.mrb[115].mxu1 }
 0x378   : > { %v4288_v39 = vadd.f32 %v4287_v52, %v4286_v25  ;;  %v7157_v13 = vadd.f32 %v7078_v47, %v4285_v7 }
 0x379   : > { %v7160_v45 = vadd.f32 %v4194_v50, %v7054_v34 }
 0x37a   : > { %v7163_v35 = vadd.f32 %v7083_v42, %v4288_v39 }
 0x37b   : > { %v4195_v32 = vpop.f32.mrb[80].mxu0 }
 0x37c   : > { %v4196_v36 = vpop.f32.mrb[81].mxu0  ;;  %v4289_v8 = vpop.f32.mrb[116].mxu1 }
 0x37d   : > { %v4197_v26 = vadd.f32 %v4196_v36, %v4195_v32  ;;  %v4198_v48 = vpop.f32.mrb[82].mxu0  ;;  %v4290_v24 = vpop.f32.mrb[117].mxu1 }
 0x37e   : > { %v4291_v19 = vadd.f32 %v4290_v24, %v4289_v8  ;;  %v4199_v59 = vpop.f32.mrb[83].mxu0  ;;  %v4292_v31 = vpop.f32.mrb[118].mxu1 }
 0x37f   : > { %v7166_v23 = vadd.f32 %v4197_v26, %v7059_v63  ;;  %v4200_v47 = vadd.f32 %v4199_v59, %v4198_v48  ;;  %v4293_v38 = vpop.f32.mrb[119].mxu1 }
 0x380   : > { %v4294_v6 = vadd.f32 %v4293_v38, %v4292_v31  ;;  %v7169_v34 = vadd.f32 %v7088_v56, %v4291_v19 }
 0x381   : > { %v7172_v42 = vadd.f32 %v4200_v47, %v7064_v1 }
 0x382   : > { %v7175_v4 = vadd.f32 %v7093_v27, %v4294_v6 }
 0x383   : > { %v4201_v5 = vpop.f32.mrb[84].mxu0 }
 0x384   : > { %v4202_v62 = vpop.f32.mrb[85].mxu0  ;;  %v4295_v43 = vpop.f32.mrb[120].mxu1 }
 0x385   : > { %v4203_v51 = vadd.f32 %v4202_v62, %v4201_v5  ;;  %v4204_v37 = vpop.f32.mrb[86].mxu0  ;;  %v4296_v41 = vpop.f32.mrb[121].mxu1 }
 0x386   : > { %v4297_v63 = vadd.f32 %v4296_v41, %v4295_v43  ;;  %v4205_v58 = vpop.f32.mrb[87].mxu0  ;;  %v4298_v18 = vpop.f32.mrb[122].mxu1 }
 0x387   : > { %v7178_v16 = vadd.f32 %v4203_v51, %v7075_v20  ;;  %v4206_v56 = vadd.f32 %v4205_v58, %v4204_v37  ;;  %v4299_v33 = vpop.f32.mrb[123].mxu1 }
 0x388   : > { %v4300_v7 = vadd.f32 %v4299_v33, %v4298_v18  ;;  %v7181_v1 = vadd.f32 %v7098_v17, %v4297_v63 }
 0x389   : > { %v7184_v27 = vadd.f32 %v4206_v56, %v7080_v14 }
 0x38a   : > { %v7187_v9 = vadd.f32 %v7103_v28, %v4300_v7 }
 0x38b   : > { %v4207_v25 = vpop.f32.mrb[88].mxu0 }
 0x38c   : > { %v4208_v50 = vpop.f32.mrb[89].mxu0  ;;  %v4301_v52 = vpop.f32.mrb[124].mxu1 }
 0x38d   : > { %v4209_v39 = vadd.f32 %v4208_v50, %v4207_v25  ;;  %v4210_v32 = vpop.f32.mrb[90].mxu0  ;;  %v4302_v36 = vpop.f32.mrb[125].mxu1 }
 0x38e   : > { %v4303_v20 = vadd.f32 %v4302_v36, %v4301_v52  ;;  %v4211_v8 = vpop.f32.mrb[91].mxu0  ;;  %v4304_v26 = vpop.f32.mrb[126].mxu1 }
 0x38f   : > { %v7190_v48 = vadd.f32 %v4209_v39, %v7085_v3  ;;  %v4212_v17 = vadd.f32 %v4211_v8, %v4210_v32  ;;  %v4305_v24 = vpop.f32.mrb[127].mxu1 }
 0x390   : > { %v4306_v19 = vadd.f32 %v4305_v24, %v4304_v26  ;;  %v7193_v14 = vadd.f32 %v7106_v57, %v4303_v20 }
 0x391   : > { %v7196_v28 = vadd.f32 %v4212_v17, %v7090_v49 }
 0x392   : > { %v7199_v59 = vadd.f32 %v7112_v11, %v4306_v19 }
 0x393   : > { %v4213_v31 = vpop.f32.mrb[92].mxu0 }
 0x394   : > { %v4214_v47 = vpop.f32.mrb[93].mxu0  ;;  %v4307_v38 = vpop.f32.mrb[128].mxu1 }
 0x395   : > { %v4215_v6 = vadd.f32 %v4214_v47, %v4213_v31  ;;  %v4216_v5 = vpop.f32.mrb[94].mxu0  ;;  %v4308_v62 = vpop.f32.mrb[129].mxu1 }
 0x396   : > { %v4309_v3 = vadd.f32 %v4308_v62, %v4307_v38  ;;  %v4217_v43 = vpop.f32.mrb[95].mxu0  ;;  %v4310_v51 = vpop.f32.mrb[130].mxu1 }
 0x397   : > { %v4655_v37 = vadd.f32 %v4215_v6, %v7095_v15  ;;  %v4218_v41 = vadd.f32 %v4217_v43, %v4216_v5  ;;  %v4311_v57 = vpop.f32.mrb[131].mxu1 }
 0x398   : > { %v4312_v63 = vadd.f32 %v4311_v57, %v4310_v51  ;;  %v7203_v49 = vadd.f32 %v7118_v10, %v4309_v3 }
 0x399   : > { %v4661_v11 = vadd.f32 %v4218_v41, %v7100_v22 }
 0x39a   : > { %v7207_v58 = vadd.f32 %v7124_v2, %v4312_v63 }
 0x39d   : > { %v4313_v18 = vpop.f32.mrb[132].mxu1 }
 0x39e   : > { %v4314_v56 = vpop.f32.mrb[133].mxu1 }
 0x39f   : > { %v4315_v33 = vadd.f32 %v4314_v56, %v4313_v18  ;;  %v4316_v7 = vpop.f32.mrb[134].mxu1 }
 0x3a0   : > { %v4317_v25 = vpop.f32.mrb[135].mxu1 }
 0x3a1   : > { %v4318_v50 = vadd.f32 %v4317_v25, %v4316_v7  ;;  %v7210_v52 = vadd.f32 %v7130_v46, %v4315_v33 }
 0x3a3   : > { %v7213_v15 = vadd.f32 %v7136_v0, %v4318_v50 }
 0x3a5   : > { %v4319_v39 = vpop.f32.mrb[136].mxu1 }
 0x3a6   : > { %v4320_v10 = vpop.f32.mrb[137].mxu1 }
 0x3a7   : > { %v4321_v32 = vadd.f32 %v4320_v10, %v4319_v39  ;;  %v4322_v36 = vpop.f32.mrb[138].mxu1 }
 0x3a8   : > { %v4323_v22 = vpop.f32.mrb[139].mxu1 }
 0x3a9   : > { %v4324_v20 = vadd.f32 %v4323_v22, %v4322_v36  ;;  %v7216_v2 = vadd.f32 %v7142_v61, %v4321_v32 }
 0x3ab   : > { %v7219_v8 = vadd.f32 %v7148_v29, %v4324_v20 }
 0x3ad   : > { %v4325_v26 = vpop.f32.mrb[140].mxu1 }
 0x3ae   : > { %v4326_v17 = vpop.f32.mrb[141].mxu1 }
 0x3af   : > { %v4327_v24 = vadd.f32 %v4326_v17, %v4325_v26  ;;  %v4328_v46 = vpop.f32.mrb[142].mxu1 }
 0x3b0   : > { %v4329_v19 = vpop.f32.mrb[143].mxu1 }
 0x3b1   : > { %v4330_v31 = vadd.f32 %v4329_v19, %v4328_v46  ;;  %v7222_v0 = vadd.f32 %v7154_v53, %v4327_v24  ;;  %v7251_v46 = vld [vmem:[%s352_s14] ss:$0 sm:$0xff] }
 0x3b3   : > { %v7225_v47 = vadd.f32 %v7160_v45, %v4330_v31 }
 0x3b5   : > { %v4331_v38 = vpop.f32.mrb[144].mxu1 }
 0x3b6   : > { %v4332_v6 = vpop.f32.mrb[145].mxu1 }
 0x3b7   : > { %v4333_v5 = vadd.f32 %v4332_v6, %v4331_v38  ;;  %v4334_v61 = vpop.f32.mrb[146].mxu1 }
 0x3b8   : > { %v4335_v62 = vpop.f32.mrb[147].mxu1 }
 0x3b9   : > { %v4336_v3 = vadd.f32 %v4335_v62, %v4334_v61  ;;  %v7228_v29 = vadd.f32 %v7166_v23, %v4333_v5 }
 0x3bb   : > { %v7231_v43 = vadd.f32 %v7172_v42, %v4336_v3 }
 0x3bd   : > { %v4337_v51 = vpop.f32.mrb[148].mxu1 }
 0x3be   : > { %v4338_v41 = vpop.f32.mrb[149].mxu1 }
 0x3bf   : > { %v4339_v57 = vadd.f32 %v4338_v41, %v4337_v51  ;;  %v4340_v53 = vpop.f32.mrb[150].mxu1 }
 0x3c0   : > { %v4341_v63 = vpop.f32.mrb[151].mxu1 }
 0x3c1   : > { %v4342_v18 = vadd.f32 %v4341_v63, %v4340_v53  ;;  %v7234_v45 = vadd.f32 %v7178_v16, %v4339_v57  ;;  %v4945_v63 = vld [vmem:[#allocation2 + $0x10] sm:$0xff] }
 0x3c3   : > { %v7237_v56 = vadd.f32 %v7184_v27, %v4342_v18 }
 0x3c5   : > { %v4343_v33 = vpop.f32.mrb[152].mxu1 }
 0x3c6   : > { %v4344_v7 = vpop.f32.mrb[153].mxu1 }
 0x3c7   : > { %v4345_v23 = vadd.f32 %v4344_v7, %v4343_v33  ;;  %v4346_v25 = vpop.f32.mrb[154].mxu1 }
 0x3c8   : > { %v4347_v50 = vpop.f32.mrb[155].mxu1 }
 0x3c9   : > { %v4348_v42 = vadd.f32 %v4347_v50, %v4346_v25  ;;  %v7240_v39 = vadd.f32 %v7190_v48, %v4345_v23  ;;  %v4946_v23 = vld [vmem:[#allocation2] sm:$0xff] }
 0x3cb   : > { %v7243_v10 = vadd.f32 %v7196_v28, %v4348_v42 }
 0x3cd   : > { %v4349_v32 = vpop.f32.mrb[156].mxu1 }
 0x3ce   : > { %v4350_v36 = vpop.f32.mrb[157].mxu1 }
 0x3cf   : > { %v4351_v16 = vadd.f32 %v4350_v36, %v4349_v32  ;;  %v4352_v22 = vpop.f32.mrb[158].mxu1  ;;  %v4947_v32 = vld [vmem:[#allocation2 + $0x18] sm:$0xff] }
 0x3d0   : > { %v4353_v20 = vpop.f32.mrb[159].mxu1 }
 0x3d1   : > { %v4354_v27 = vadd.f32 %v4353_v20, %v4352_v22  ;;  %v7245_v26 = vadd.f32 %v4655_v37, %v4351_v16 }
 0x3d3   : > { %v7247_v17 = vadd.f32 %v4661_v11, %v4354_v27  ;;  %v4948_v27 = vld [vmem:[#allocation2 + $0x8] sm:$0xff] }
 0x3db   : > { %v4541_v24 = vpop.f32.mrb[0].mxu0 }
 0x3dc   : > { %v4573_v48 = vadd.f32 %v7121_v60, %v4541_v24  ;;  %v3197_v19 = vpop.f32.mrb[1].mxu0 }
 0x3dd   : > { %v4576_v28 = vadd.f32 %v7109_v12, %v3197_v19  ;;  %v4542_v31 = vpop.f32.mrb[2].mxu0 }
 0x3de   : > { %v3365_v38 = vadd.f32 %v4573_v48, %v7251_v46  ;;  %v4579_v6 = vadd.f32 %v7127_v54, %v4542_v31  ;;  %v3200_v5 = vpop.f32.mrb[3].mxu0 }
 0x3df   : > { %v3363_v37 = vadd.f32 %v4576_v28, %v7251_v46  ;;  %v4582_v11 = vadd.f32 %v7115_v30, %v3200_v5 }
 0x3e0   : > { %v3397_v61 = vmul.f32 0.1, %v3365_v38  ;;  %v3366_v62 = vadd.f32 %v4579_v6, %v7251_v46 }
 0x3e1   : > { %v3395_v3 = vmul.f32 0.1, %v3363_v37  ;;  %v3364_v51 = vadd.f32 %v4582_v11, %v7251_v46 }
 0x3e2   : > { %v3429_v60 = vmax.f32 %v3365_v38, %v3397_v61  ;;  %v3398_v41 = vmul.f32 0.1, %v3366_v62 }
 0x3e3   : > { %v3427_v57 = vmax.f32 %v3363_v37, %v3395_v3  ;;  %v3396_v12 = vmul.f32 0.1, %v3364_v51  ;;  %v4545_v53 = vpop.f32.mrb[4].mxu0 }
 0x3e4   : > { %v7261_v18 = vadd.f32 %v4945_v63, %v3429_v60  ;;  %v3430_v54 = vmax.f32 %v3366_v62, %v3398_v41  ;;  %v4585_v33 = vadd.f32 %v7145_v55, %v4545_v53  ;;  %v3213_v7 = vpop.f32.mrb[5].mxu0  ;;  %v4950_v60 = vld [vmem:[#allocation2 + $0x20] sm:$0xff]  ;;  %v4951_v53 = vld [vmem:[#allocation2 + $0x38] sm:$0xff] }
 0x3e5   : > { %v7264_v30 = vadd.f32 %v4946_v23, %v3427_v57  ;;  %v3428_v25 = vmax.f32 %v3364_v51, %v3396_v12  ;;  %v4588_v50 = vadd.f32 %v7133_v21, %v3213_v7  ;;  %v4546_v42 = vpop.f32.mrb[6].mxu0  ;;  %v4952_v23 = vld [vmem:[#allocation2 + $0x28] sm:$0xff] }
 0x3e6   : > { %v7267_v36 = vadd.f32 %v4947_v32, %v3430_v54  ;;  %v3369_v16 = vadd.f32 %v4585_v33, %v7251_v46  ;;  %v4591_v22 = vadd.f32 %v7151_v44, %v4546_v42  ;;  %v3216_v20 = vpop.f32.mrb[7].mxu0  ;;  %v4949_v44 = vld [vmem:[#allocation2 + $0x30] sm:$0xff]  ;;  %3497 = vst [vmem:[#allocation2 + $0x10] sm:$0xff] (!%p3937_p0), %v7261_v18 }
 0x3e7   : > { %v7271_v24 = vadd.f32 %v4948_v27, %v3428_v25  ;;  %v3367_v55 = vadd.f32 %v4588_v50, %v7251_v46  ;;  %v4594_v48 = vadd.f32 %v7139_v40, %v3216_v20  ;;  %3495 = vst [vmem:[#allocation2] sm:$0xff] (!%p3937_p0), %v7264_v30 }
 0x3e8   : > { %v3401_v19 = vmul.f32 0.1, %v3369_v16  ;;  %v3370_v28 = vadd.f32 %v4591_v22, %v7251_v46  ;;  %3498 = vst [vmem:[#allocation2 + $0x18] sm:$0xff] (!%p3937_p0), %v7267_v36 }
 0x3e9   : > { %v3399_v21 = vmul.f32 0.1, %v3367_v55  ;;  %v3368_v31 = vadd.f32 %v4594_v48, %v7251_v46  ;;  %3496 = vst [vmem:[#allocation2 + $0x8] sm:$0xff] (!%p3937_p0), %v7271_v24 }
 0x3ea   : > { %v3433_v38 = vmax.f32 %v3369_v16, %v3401_v19  ;;  %v3402_v6 = vmul.f32 0.1, %v3370_v28 }
 0x3eb   : > { %v3431_v5 = vmax.f32 %v3367_v55, %v3399_v21  ;;  %v3400_v37 = vmul.f32 0.1, %v3368_v31  ;;  %v4549_v11 = vpop.f32.mrb[8].mxu0 }
 0x3ec   : > { %v7277_v61 = vadd.f32 %v4949_v44, %v3433_v38  ;;  %v3434_v62 = vmax.f32 %v3370_v28, %v3402_v6  ;;  %v4597_v3 = vadd.f32 %v7169_v34, %v4549_v11  ;;  %v3229_v51 = vpop.f32.mrb[9].mxu0  ;;  %v4954_v38 = vld [vmem:[#allocation2 + $0x40] sm:$0xff]  ;;  %v4955_v11 = vld [vmem:[#allocation2 + $0x58] sm:$0xff] }
 0x3ed   : > { %v7280_v40 = vadd.f32 %v4950_v60, %v3431_v5  ;;  %v3432_v41 = vmax.f32 %v3368_v31, %v3400_v37  ;;  %v4600_v57 = vadd.f32 %v7157_v13, %v3229_v51  ;;  %v4550_v12 = vpop.f32.mrb[10].mxu0  ;;  %v4956_v60 = vld [vmem:[#allocation2 + $0x48] sm:$0xff] }
 0x3ee   : > { %v7283_v63 = vadd.f32 %v4951_v53, %v3434_v62  ;;  %v3373_v54 = vadd.f32 %v4597_v3, %v7251_v46  ;;  %v4603_v33 = vadd.f32 %v7175_v4, %v4550_v12  ;;  %v3232_v7 = vpop.f32.mrb[11].mxu0  ;;  %v4953_v4 = vld [vmem:[#allocation2 + $0x50] sm:$0xff]  ;;  %3501 = vst [vmem:[#allocation2 + $0x30] sm:$0xff] (!%p3937_p0), %v7277_v61 }
 0x3ef   : > { %v7287_v25 = vadd.f32 %v4952_v23, %v3432_v41  ;;  %v3371_v34 = vadd.f32 %v4600_v57, %v7251_v46  ;;  %v4606_v50 = vadd.f32 %v7163_v35, %v3232_v7  ;;  %3499 = vst [vmem:[#allocation2 + $0x20] sm:$0xff] (!%p3937_p0), %v7280_v40 }
 0x3f0   : > { %v3405_v42 = vmul.f32 0.1, %v3373_v54  ;;  %v3374_v32 = vadd.f32 %v4603_v33, %v7251_v46  ;;  %3502 = vst [vmem:[#allocation2 + $0x38] sm:$0xff] (!%p3937_p0), %v7283_v63 }
 0x3f1   : > { %v3403_v13 = vmul.f32 0.1, %v3371_v34  ;;  %v3372_v16 = vadd.f32 %v4606_v50, %v7251_v46  ;;  %3500 = vst [vmem:[#allocation2 + $0x28] sm:$0xff] (!%p3937_p0), %v7287_v25 }
 0x3f2   : > { %v3437_v22 = vmax.f32 %v3373_v54, %v3405_v42  ;;  %v3406_v20 = vmul.f32 0.1, %v3374_v32 }
 0x3f3   : > { %v3435_v27 = vmax.f32 %v3371_v34, %v3403_v13  ;;  %v3404_v55 = vmul.f32 0.1, %v3372_v16  ;;  %v4553_v48 = vpop.f32.mrb[12].mxu0 }
 0x3f4   : > { %v7293_v19 = vadd.f32 %v4953_v4, %v3437_v22  ;;  %v3438_v28 = vmax.f32 %v3374_v32, %v3406_v20  ;;  %v4609_v21 = vadd.f32 %v7193_v14, %v4553_v48  ;;  %v3245_v31 = vpop.f32.mrb[13].mxu0  ;;  %v4958_v22 = vld [vmem:[#allocation2 + $0x60] sm:$0xff]  ;;  %v4959_v48 = vld [vmem:[#allocation2 + $0x78] sm:$0xff] }
 0x3f5   : > { %v7296_v35 = vadd.f32 %v4954_v38, %v3435_v27  ;;  %v3436_v6 = vmax.f32 %v3372_v16, %v3404_v55  ;;  %v4612_v5 = vadd.f32 %v7181_v1, %v3245_v31  ;;  %v4554_v37 = vpop.f32.mrb[14].mxu0  ;;  %v4960_v38 = vld [vmem:[#allocation2 + $0x68] sm:$0xff] }
 0x3f6   : > { %v7299_v44 = vadd.f32 %v4955_v11, %v3438_v28  ;;  %v3377_v62 = vadd.f32 %v4609_v21, %v7251_v46  ;;  %v4615_v3 = vadd.f32 %v7199_v59, %v4554_v37  ;;  %v3248_v51 = vpop.f32.mrb[15].mxu0  ;;  %v4957_v59 = vld [vmem:[#allocation2 + $0x70] sm:$0xff]  ;;  %3505 = vst [vmem:[#allocation2 + $0x50] sm:$0xff] (!%p3937_p0), %v7293_v19 }
 0x3f7   : > { %v7303_v41 = vadd.f32 %v4956_v60, %v3436_v6  ;;  %v3375_v14 = vadd.f32 %v4612_v5, %v7251_v46  ;;  %v4618_v57 = vadd.f32 %v7187_v9, %v3248_v51  ;;  %3503 = vst [vmem:[#allocation2 + $0x40] sm:$0xff] (!%p3937_p0), %v7296_v35 }
 0x3f8   : > { %v3409_v12 = vmul.f32 0.1, %v3377_v62  ;;  %v3378_v53 = vadd.f32 %v4615_v3, %v7251_v46  ;;  %3506 = vst [vmem:[#allocation2 + $0x58] sm:$0xff] (!%p3937_p0), %v7299_v44 }
 0x3f9   : > { %v3407_v1 = vmul.f32 0.1, %v3375_v14  ;;  %v3376_v54 = vadd.f32 %v4618_v57, %v7251_v46  ;;  %3504 = vst [vmem:[#allocation2 + $0x48] sm:$0xff] (!%p3937_p0), %v7303_v41 }
 0x3fa   : > { %v3441_v33 = vmax.f32 %v3377_v62, %v3409_v12  ;;  %v3410_v7 = vmul.f32 0.1, %v3378_v53 }
 0x3fb   : > { %v3439_v23 = vmax.f32 %v3375_v14, %v3407_v1  ;;  %v3408_v34 = vmul.f32 0.1, %v3376_v54  ;;  %v4557_v50 = vpop.f32.mrb[16].mxu0 }
 0x3fc   : > { %v7309_v42 = vadd.f32 %v4957_v59, %v3441_v33  ;;  %v3442_v32 = vmax.f32 %v3378_v53, %v3410_v7  ;;  %v4621_v13 = vadd.f32 %v7210_v52, %v4557_v50  ;;  %v3261_v16 = vpop.f32.mrb[17].mxu0  ;;  %v4962_v33 = vld [vmem:[#allocation2 + $0x80] sm:$0xff]  ;;  %v4963_v50 = vld [vmem:[#allocation2 + $0x98] sm:$0xff] }
 0x3fd   : > { %v7312_v9 = vadd.f32 %v4958_v22, %v3439_v23  ;;  %v3440_v20 = vmax.f32 %v3376_v54, %v3408_v34  ;;  %v4624_v27 = vadd.f32 %v7203_v49, %v3261_v16  ;;  %v4558_v55 = vpop.f32.mrb[18].mxu0  ;;  %v4964_v22 = vld [vmem:[#allocation2 + $0x88] sm:$0xff] }
 0x3fe   : > { %v7315_v4 = vadd.f32 %v4959_v48, %v3442_v32  ;;  %v3381_v28 = vadd.f32 %v4621_v13, %v7251_v46  ;;  %v4627_v21 = vadd.f32 %v7213_v15, %v4558_v55  ;;  %v3264_v31 = vpop.f32.mrb[19].mxu0  ;;  %v4961_v15 = vld [vmem:[#allocation2 + $0x90] sm:$0xff]  ;;  %3509 = vst [vmem:[#allocation2 + $0x70] sm:$0xff] (!%p3937_p0), %v7309_v42 }
 0x3ff   : > { %v7319_v6 = vadd.f32 %v4960_v38, %v3440_v20  ;;  %v3379_v52 = vadd.f32 %v4624_v27, %v7251_v46  ;;  %v4630_v5 = vadd.f32 %v7207_v58, %v3264_v31  ;;  %3507 = vst [vmem:[#allocation2 + $0x60] sm:$0xff] (!%p3937_p0), %v7312_v9 }
 0x400   : > { %v3413_v37 = vmul.f32 0.1, %v3381_v28  ;;  %v3382_v11 = vadd.f32 %v4627_v21, %v7251_v46  ;;  %3510 = vst [vmem:[#allocation2 + $0x78] sm:$0xff] (!%p3937_p0), %v7315_v4 }
 0x401   : > { %v3411_v49 = vmul.f32 0.1, %v3379_v52  ;;  %v3380_v62 = vadd.f32 %v4630_v5, %v7251_v46  ;;  %3508 = vst [vmem:[#allocation2 + $0x68] sm:$0xff] (!%p3937_p0), %v7319_v6 }
 0x402   : > { %v3445_v3 = vmax.f32 %v3381_v28, %v3413_v37  ;;  %v3414_v51 = vmul.f32 0.1, %v3382_v11 }
 0x403   : > { %v3443_v60 = vmax.f32 %v3379_v52, %v3411_v49  ;;  %v3412_v14 = vmul.f32 0.1, %v3380_v62  ;;  %v4561_v57 = vpop.f32.mrb[20].mxu0 }
 0x404   : > { %v7325_v12 = vadd.f32 %v4961_v15, %v3445_v3  ;;  %v3446_v53 = vmax.f32 %v3382_v11, %v3414_v51  ;;  %v4633_v1 = vadd.f32 %v7222_v0, %v4561_v57  ;;  %v3277_v54 = vpop.f32.mrb[21].mxu0  ;;  %v4966_v3 = vld [vmem:[#allocation2 + $0xa0] sm:$0xff]  ;;  %v4967_v57 = vld [vmem:[#allocation2 + $0xb8] sm:$0xff] }
 0x405   : > { %v7328_v58 = vadd.f32 %v4962_v33, %v3443_v60  ;;  %v3444_v7 = vmax.f32 %v3380_v62, %v3412_v14  ;;  %v4636_v23 = vadd.f32 %v7216_v2, %v3277_v54  ;;  %v4562_v34 = vpop.f32.mrb[22].mxu0  ;;  %v4968_v33 = vld [vmem:[#allocation2 + $0xa8] sm:$0xff] }
 0x406   : > { %v7331_v59 = vadd.f32 %v4963_v50, %v3446_v53  ;;  %v3385_v32 = vadd.f32 %v4633_v1, %v7251_v46  ;;  %v4639_v13 = vadd.f32 %v7225_v47, %v4562_v34  ;;  %v3280_v16 = vpop.f32.mrb[23].mxu0  ;;  %v4965_v47 = vld [vmem:[#allocation2 + $0xb0] sm:$0xff]  ;;  %3513 = vst [vmem:[#allocation2 + $0x90] sm:$0xff] (!%p3937_p0), %v7325_v12 }
 0x407   : > { %v7335_v20 = vadd.f32 %v4964_v22, %v3444_v7  ;;  %v3383_v0 = vadd.f32 %v4636_v23, %v7251_v46  ;;  %v4642_v27 = vadd.f32 %v7219_v8, %v3280_v16  ;;  %3511 = vst [vmem:[#allocation2 + $0x80] sm:$0xff] (!%p3937_p0), %v7328_v58 }
 0x408   : > { %v3417_v55 = vmul.f32 0.1, %v3385_v32  ;;  %v3386_v48 = vadd.f32 %v4639_v13, %v7251_v46  ;;  %3514 = vst [vmem:[#allocation2 + $0x98] sm:$0xff] (!%p3937_p0), %v7331_v59 }
 0x409   : > { %v3415_v2 = vmul.f32 0.1, %v3383_v0  ;;  %v3384_v28 = vadd.f32 %v4642_v27, %v7251_v46  ;;  %3512 = vst [vmem:[#allocation2 + $0x88] sm:$0xff] (!%p3937_p0), %v7335_v20 }
 0x40a   : > { %v3449_v21 = vmax.f32 %v3385_v32, %v3417_v55  ;;  %v3418_v31 = vmul.f32 0.1, %v3386_v48 }
 0x40b   : > { %v3447_v38 = vmax.f32 %v3383_v0, %v3415_v2  ;;  %v3416_v52 = vmul.f32 0.1, %v3384_v28  ;;  %v4565_v5 = vpop.f32.mrb[24].mxu0 }
 0x40c   : > { %v7341_v37 = vadd.f32 %v4965_v47, %v3449_v21  ;;  %v3450_v11 = vmax.f32 %v3386_v48, %v3418_v31  ;;  %v4645_v49 = vadd.f32 %v7234_v45, %v4565_v5  ;;  %v3293_v62 = vpop.f32.mrb[25].mxu0  ;;  %v4970_v21 = vld [vmem:[#allocation2 + $0xc0] sm:$0xff]  ;;  %v4971_v5 = vld [vmem:[#allocation2 + $0xd8] sm:$0xff] }
 0x40d   : > { %v7344_v8 = vadd.f32 %v4966_v3, %v3447_v38  ;;  %v3448_v51 = vmax.f32 %v3384_v28, %v3416_v52  ;;  %v4648_v60 = vadd.f32 %v7228_v29, %v3293_v62  ;;  %v4566_v14 = vpop.f32.mrb[26].mxu0  ;;  %v4972_v3 = vld [vmem:[#allocation2 + $0xc8] sm:$0xff] }
 0x40e   : > { %v7347_v15 = vadd.f32 %v4967_v57, %v3450_v11  ;;  %v3389_v53 = vadd.f32 %v4645_v49, %v7251_v46  ;;  %v4651_v1 = vadd.f32 %v7237_v56, %v4566_v14  ;;  %v3296_v54 = vpop.f32.mrb[27].mxu0  ;;  %v4969_v56 = vld [vmem:[#allocation2 + $0xd0] sm:$0xff]  ;;  %3517 = vst [vmem:[#allocation2 + $0xb0] sm:$0xff] (!%p3937_p0), %v7341_v37 }
 0x40f   : > { %v7351_v7 = vadd.f32 %v4968_v33, %v3448_v51  ;;  %v3387_v45 = vadd.f32 %v4648_v60, %v7251_v46  ;;  %v4654_v23 = vadd.f32 %v7231_v43, %v3296_v54  ;;  %3515 = vst [vmem:[#allocation2 + $0xa0] sm:$0xff] (!%p3937_p0), %v7344_v8 }
 0x410   : > { %v3421_v34 = vmul.f32 0.1, %v3389_v53  ;;  %v3390_v50 = vadd.f32 %v4651_v1, %v7251_v46  ;;  %3518 = vst [vmem:[#allocation2 + $0xb8] sm:$0xff] (!%p3937_p0), %v7347_v15 }
 0x411   : > { %v3419_v29 = vmul.f32 0.1, %v3387_v45  ;;  %v3388_v32 = vadd.f32 %v4654_v23, %v7251_v46  ;;  %v4973_v23 = vld [vmem:[#allocation2 + $0xf0] sm:$0xff]  ;;  %3516 = vst [vmem:[#allocation2 + $0xa8] sm:$0xff] (!%p3937_p0), %v7351_v7 }
 0x412   : > { %v3453_v13 = vmax.f32 %v3389_v53, %v3421_v34  ;;  %v3422_v16 = vmul.f32 0.1, %v3390_v50 }
 0x413   : > { %v3451_v22 = vmax.f32 %v3387_v45, %v3419_v29  ;;  %v3420_v0 = vmul.f32 0.1, %v3388_v32  ;;  %v4569_v27 = vpop.f32.mrb[28].mxu0 }
 0x414   : > { %v7357_v55 = vadd.f32 %v4969_v56, %v3453_v13  ;;  %v3454_v48 = vmax.f32 %v3390_v50, %v3422_v16  ;;  %v4657_v2 = vadd.f32 %v7245_v26, %v4569_v27  ;;  %v3309_v28 = vpop.f32.mrb[29].mxu0  ;;  %v4974_v50 = vld [vmem:[#allocation2 + $0xe0] sm:$0xff]  ;;  %v4975_v13 = vld [vmem:[#allocation2 + $0xf8] sm:$0xff]  ;;  %v4976_v16 = vld [vmem:[#allocation2 + $0xe8] sm:$0xff] }
 0x415   : > { %v7360_v43 = vadd.f32 %v4970_v21, %v3451_v22  ;;  %v3452_v31 = vmax.f32 %v3388_v32, %v3420_v0  ;;  %v4660_v38 = vadd.f32 %v7240_v39, %v3309_v28  ;;  %v4570_v52 = vpop.f32.mrb[30].mxu0 }
 0x416   : > { %v7363_v47 = vadd.f32 %v4971_v5, %v3454_v48  ;;  %v3393_v11 = vadd.f32 %v4657_v2, %v7251_v46  ;;  %v4663_v49 = vadd.f32 %v7247_v17, %v4570_v52  ;;  %v3312_v62 = vpop.f32.mrb[31].mxu0  ;;  %3521 = vst [vmem:[#allocation2 + $0xd0] sm:$0xff] (!%p3937_p0), %v7357_v55 }
 0x417   : > { %v7367_v51 = vadd.f32 %v4972_v3, %v3452_v31  ;;  %v3391_v26 = vadd.f32 %v4660_v38, %v7251_v46  ;;  %v4666_v60 = vadd.f32 %v7243_v10, %v3312_v62  ;;  %3519 = vst [vmem:[#allocation2 + $0xc0] sm:$0xff] (!%p3937_p0), %v7360_v43 }
 0x418   : > { %v3425_v14 = vmul.f32 0.1, %v3393_v11  ;;  %v3394_v57 = vadd.f32 %v4663_v49, %v7251_v46  ;;  %3522 = vst [vmem:[#allocation2 + $0xd8] sm:$0xff] (!%p3937_p0), %v7363_v47 }
 0x419   : > { %v3423_v39 = vmul.f32 0.1, %v3391_v26  ;;  %v3392_v53 = vadd.f32 %v4666_v60, %v7251_v46  ;;  %3494 = sbr.rel (%p3937_p0) target bundleno = 1058 (0x422), region = 68  ;;  %3520 = vst [vmem:[#allocation2 + $0xc8] sm:$0xff] (!%p3937_p0), %v7367_v51 }
 0x41a   : > { %v3457_v1 = vmax.f32 %v3393_v11, %v3425_v14  ;;  %v3426_v54 = vmul.f32 0.1, %v3394_v57 }
 0x41b   : > { %v3455_v33 = vmax.f32 %v3391_v26, %v3423_v39  ;;  %v3424_v45 = vmul.f32 0.1, %v3392_v53 }
 0x41c   : > { %v7373_v17 = vadd.f32 %v4973_v23, %v3457_v1  ;;  %v3458_v34 = vmax.f32 %v3394_v57, %v3426_v54 }
 0x41d   : > { %v7375_v29 = vadd.f32 %v4974_v50, %v3455_v33  ;;  %v3456_v32 = vmax.f32 %v3392_v53, %v3424_v45 }
 0x41e   : > { %v7377_v10 = vadd.f32 %v4975_v13, %v3458_v34  ;;  %3525 = vst [vmem:[#allocation2 + $0xf0] sm:$0xff] (!%p3937_p0), %v7373_v17 }
 0x41f   : > { %v7379_v22 = vadd.f32 %v4976_v16, %v3456_v32  ;;  %3523 = vst [vmem:[#allocation2 + $0xe0] sm:$0xff] (!%p3937_p0), %v7375_v29 }
 0x420   : > { %3526 = vst [vmem:[#allocation2 + $0xf8] sm:$0xff] %v7377_v10 }
 0x421   : > { %3524 = vst [vmem:[#allocation2 + $0xe8] sm:$0xff] %v7379_v22 }
 0x422 PF: > { %s7892_s10 = sld [smem:[#allocation23_spill]] }
 0x428   : > { %p3938_p13 = scmp.ne.s32.totalorder %s7892_s10, 1 }
 0x429   : > { %3531 = vst [vmem:[%s5887_s23] sm:$0xff] (!%p3938_p13), %v7264_v30  ;;  %3532 = vst [vmem:[%s5887_s23 + $0x8] sm:$0xff] (!%p3938_p13), %v7271_v24 }
 0x42a   : > { %3530 = sbr.rel (%p3938_p13) target bundleno = 1081 (0x439), region = 72  ;;  %3533 = vst [vmem:[%s5887_s23 + $0x10] sm:$0xff] (!%p3938_p13), %v7261_v18  ;;  %3534 = vst [vmem:[%s5887_s23 + $0x18] sm:$0xff] (!%p3938_p13), %v7267_v36 }
 0x42b   : > { %3535 = vst [vmem:[%s5887_s23 + $0x20] sm:$0xff] (!%p3938_p13), %v7280_v40  ;;  %3536 = vst [vmem:[%s5887_s23 + $0x28] sm:$0xff] (!%p3938_p13), %v7287_v25 }
 0x42c   : > { %3537 = vst [vmem:[%s5887_s23 + $0x30] sm:$0xff] (!%p3938_p13), %v7277_v61  ;;  %3538 = vst [vmem:[%s5887_s23 + $0x38] sm:$0xff] (!%p3938_p13), %v7283_v63 }
 0x42d   : > { %3539 = vst [vmem:[%s5887_s23 + $0x40] sm:$0xff] (!%p3938_p13), %v7296_v35  ;;  %3540 = vst [vmem:[%s5887_s23 + $0x48] sm:$0xff] (!%p3938_p13), %v7303_v41 }
 0x42e   : > { %3541 = vst [vmem:[%s5887_s23 + $0x50] sm:$0xff] (!%p3938_p13), %v7293_v19  ;;  %3542 = vst [vmem:[%s5887_s23 + $0x58] sm:$0xff] (!%p3938_p13), %v7299_v44 }
 0x42f   : > { %3543 = vst [vmem:[%s5887_s23 + $0x60] sm:$0xff] (!%p3938_p13), %v7312_v9  ;;  %3544 = vst [vmem:[%s5887_s23 + $0x68] sm:$0xff] (!%p3938_p13), %v7319_v6 }
 0x430   : > { %3545 = vst [vmem:[%s5887_s23 + $0x70] sm:$0xff] (!%p3938_p13), %v7309_v42  ;;  %3546 = vst [vmem:[%s5887_s23 + $0x78] sm:$0xff] (!%p3938_p13), %v7315_v4 }
 0x431   : > { %3547 = vst [vmem:[%s5887_s23 + $0x80] sm:$0xff] %v7328_v58  ;;  %3548 = vst [vmem:[%s5887_s23 + $0x88] sm:$0xff] %v7335_v20 }
 0x432   : > { %3549 = vst [vmem:[%s5887_s23 + $0x90] sm:$0xff] %v7325_v12  ;;  %3550 = vst [vmem:[%s5887_s23 + $0x98] sm:$0xff] %v7331_v59 }
 0x433   : > { %3551 = vst [vmem:[%s5887_s23 + $0xa0] sm:$0xff] %v7344_v8  ;;  %3552 = vst [vmem:[%s5887_s23 + $0xa8] sm:$0xff] %v7351_v7 }
 0x434   : > { %3553 = vst [vmem:[%s5887_s23 + $0xb0] sm:$0xff] %v7341_v37  ;;  %3554 = vst [vmem:[%s5887_s23 + $0xb8] sm:$0xff] %v7347_v15 }
 0x435   : > { %3555 = vst [vmem:[%s5887_s23 + $0xc0] sm:$0xff] %v7360_v43  ;;  %3556 = vst [vmem:[%s5887_s23 + $0xc8] sm:$0xff] %v7367_v51 }
 0x436   : > { %3557 = vst [vmem:[%s5887_s23 + $0xd0] sm:$0xff] %v7357_v55  ;;  %3558 = vst [vmem:[%s5887_s23 + $0xd8] sm:$0xff] %v7363_v47 }
 0x437   : > { %3559 = vst [vmem:[%s5887_s23 + $0xe0] sm:$0xff] %v7375_v29  ;;  %3560 = vst [vmem:[%s5887_s23 + $0xe8] sm:$0xff] %v7379_v22 }
 0x438   : > { %3561 = vst [vmem:[%s5887_s23 + $0xf0] sm:$0xff] %v7373_v17  ;;  %3562 = vst [vmem:[%s5887_s23 + $0xf8] sm:$0xff] %v7377_v10 }
 0x439 PF: > { %s7893_s20 = sld [smem:[#allocation24_spill]]  ;;  %s7894_s27 = sld [smem:[#allocation64_spill]] }
 0x43a   : > { %s3577_s15 = sshll.u32 %s5887_s23, 4  ;;  %s3564_s0 = scalar_lea.sflag [#allocation7], %s5857_s12  ;;  %s7486_s15 = int_to_ptr.vmem [resolvable:$true] %s3577_s15 }
 0x43b   : > { %s5358_s7 = scalar_lea.vmem %s7486_s15, 4096  ;;  %p7896_p7 = scmp.ne.s32.totalorder %s7663_s8, 0 }
 0x43c   : > { %p5359_p10 = scmp.ne.s32.totalorder %s7486_s15, %s5358_s7  ;;  %s5501_s16 = smov [#allocation14]  }
 0x43d   : > { %s5362_s17 = sshll.u32 %s5501_s16, 4  ;;  %s5363_s17 = int_to_ptr.vmem [resolvable:$false] %s5362_s17 }
 0x43e   : > { %p5360_p5 = pnand %p5359_p10, %p7896_p7  ;;  %s5364_s3 = scalar_lea.vmem %s5363_s17, 8192 }
 0x43f   : > { %s3946_s11 = sshll.u32 %s7893_s20, 12  ;;  %s7895_s29 = smov %s7894_s27 }
 0x440   : > { %s7483_s13 = scalar_lea.hbm %s7894_s27, %s3946_s11  ;;  %p5361_p6 = pneg %p5360_p5 }
 0x441   : > { %p5365_p4 = scmp.lt.s32.totalorder %s7486_s15, %s5363_s17  ;;  %p5366_p1 = scmp.lt.s32.totalorder %s5364_s3, %s5358_s7 }
 0x443   : > { %p5367_p2 = por %p5366_p1, %p5365_p4 }
 0x445   : > { %p5368_p8 = pnand %p5367_p2, %p5361_p6 }
 0x447   : > { %5371 = shalt.err (!%p5368_p8)
}
 0x448   : > { %s5372_s21 = scalar_lea.hbm %s7483_s13, 4096  ;;  %s5376_s1 = scalar_lea.hbm %s7895_s29, 8192 }
 0x449   : > { %p5373_p3 = scmp.ne.s32.totalorder %s7483_s13, %s5372_s21  ;;  %p5377_p11 = scmp.lt.u32.totalorder %s7483_s13, %s7895_s29 }
 0x44a   : > { %p5378_p0 = scmp.lt.u32.totalorder %s5376_s1, %s5372_s21  ;;  %p5380_p10 = scmp.lt.u32.totalorder %s5372_s21, %s7483_s13 }
 0x44b   : > { %p5374_p9 = pnand %p5373_p3, %p7896_p7 }
 0x44c   : > { %p5379_p13 = por %p5378_p0, %p5377_p11 }
 0x44d   : > { %p5375_p12 = pneg %p5374_p9 }
 0x44e   : > { %p5381_p5 = por %p5380_p10, %p5379_p13 }
 0x450   : > { %p5382_p6 = pnand %p5381_p5, %p5375_p12 }
 0x452   : > { %5385 = shalt.err (!%p5382_p6)
}
 0x453   : > { %s5502_s14 = smov 128   ;;  %s5503_s23 = smov 8  }
 0x454   : > { %4744 = dma.vmem_to_hbm [thread:$0]  (%p7896_p7), %s7486_s15, 4096, %s7483_s13, %s3564_s0, %s5502_s14, %s5502_s14, %s5503_s23  }
 0x455 PF: > { %s7897_s6 = sld [smem:[#allocation21_spill]]  ;;  %s7898_s30 = sld [smem:[#allocation30_spill]] }
 0x456   : > { %p4767_p4 = scmp.ge.s32.totalorder %s5488_s28, 2 }
 0x45b   : > { %s3592_s10 = sand.u32 1, %s7897_s6   ;;  %p7899_p1 = scmp.ne.s32.totalorder %s7898_s30, 0 }
 0x45c   : > { %s3593_s20 = scalar_lea.sflag [#allocation7], %s3592_s10 }
 0x45d   : > { %p4763_p2 = pnand %p4767_p4, %p7899_p1 }
 0x45f   : > { %5443 = dma.done.wait (!%p4763_p2), %s3593_s20, 4096  }
 0x460   : > { %5445 = vsyncadd (!%p4763_p2), %s3593_s20, 4294963200  ;;  %s27_s28 = sadd.s32 1, %s5488_s28   ;;  %s7900_s18 = sld [smem:[#allocation19_spill]] }
 0x461   : > { %p24_p8 = scmp.ge.s32.totalorder %s27_s28, 6   ;;  %s7901_s19 = sld [smem:[#allocation20_spill]] }
 0x462   : > { %s7902_s20 = sld [smem:[#allocation27_spill]]  ;;  %s7903_s8 = sld [smem:[#allocation22_spill]] }
 0x463   : > { %s7904_s23 = sld [smem:[#allocation29_spill]]  ;;  %s7905_s25 = sld [smem:[#allocation25_spill]] }
 0x464   : > { %s7906_s12 = sld [smem:[#allocation26_spill]]  ;;  %s7907_s27 = sld [smem:[#allocation28_spill]] }
 0x465   : > { %s7908_s21 = smov %s5464_s22  ;;  %s7910_s24 = smov %s5480_s26 }
 0x466   :  { %26 = sbr.rel (!%p24_p8) target bundleno = 18 (0x12), region = 147 }
 0x468   : > { %s7909_s22 = smov %s7903_s8 }
 0x46a   : > { %s7911_s26 = smov %s7906_s12 }
 0x46d   :  { %3598 = vsyncpa [#allocation6], 1 }
 0x46e   :  { %3600 = vsyncpa [#allocation6 + $0x1], 1 }
 0x46f   :  { %3601 = vsyncpa [#allocation9], 1 }
 0x470   :  { %3603 = vsyncpa [#allocation9 + $0x1], 1 }
 0x471   :  { %3604 = vsyncpa [#allocation12], 1 }
 0x472   :  { %3606 = vsyncpa [#allocation12 + $0x1], 1 }
 0x473   :  { %3607 = vsyncpa [#allocation7], 1 }
 0x474   :  { %3609 = vsyncpa [#allocation7 + $0x1], 1 }

</bundles_post_ra>
